<compile_context>
chip_gen: v6e
topology: v6e:2x2x1
jax: 0.10.0
libtpu: 0.0.40
codegen_flags: <defaults>
</compile_context>

<pallas_src>
import math

import jax
import jax.numpy as jnp
import numpy as np
from jax.experimental import pallas as pl
from jax.experimental.pallas import tpu as pltpu  # noqa: F401  (kept for CompilerParams at larger sizes)

D_MODEL = 32
N_HEADS = 4
D_HEAD = D_MODEL // N_HEADS
D_FF = 64
# TODO(synk): matches the from-scratch LayerNormalization reference (biased variance,
# eps=1e-12); PyTorch nn.LayerNorm's default would be eps=1e-5.
EPS = 1e-12


# ----------------------------- kernel helpers ------------------------------ #
def _layernorm(x, gamma, beta):
    # x: (T, D); gamma/beta: (1, D)
    mean = jnp.mean(x, axis=-1, keepdims=True)
    var = jnp.mean((x - mean) ** 2, axis=-1, keepdims=True)
    return gamma * (x - mean) * jax.lax.rsqrt(var + EPS) + beta


def _mha(xq, xkv, wq_ref, bq_ref, w_kvT, b_kvT, wo, bo):
    # xq: (T, D) query source; xkv: (S, D) key/value source.
    # wq_ref: (H, D, dk) per-head Q weights (1/sqrt(dk) pre-folded); bq_ref: (H, 1, dk)
    # w_kvT: (2D, D) = [Wk^T ; Wv^T]; b_kvT: (2D, 1).  wo: (D, D); bo: (1, D).
    # TODO(synk): attention masks omitted — the module's forward is exercised with
    # src_mask=tgt_mask=None.
    #
    # Fused K/V projection in transposed layout: ONE matmul, heads land on the
    # sublane axis so per-head slicing below is free (no lane masking).
    kvT = jnp.dot(w_kvT, xkv.T, preferred_element_type=jnp.float32) + b_kvT   # (2D, S)

    heads = []
    for h in range(N_HEADS):  # static unroll over heads
        # Per-head Q via leading-axis weight indexing — no lane slicing of activations.
        qh = jnp.dot(xq, wq_ref[h], preferred_element_type=jnp.float32) + bq_ref[h]  # (T, dk)
        khT = kvT[h * D_HEAD:(h + 1) * D_HEAD, :]                                    # (dk, S)
        vhT = kvT[D_MODEL + h * D_HEAD:D_MODEL + (h + 1) * D_HEAD, :]                # (dk, S)

        s = jnp.dot(qh, khT, preferred_element_type=jnp.float32)                     # (T, S)
        s = s - jnp.max(s, axis=-1, keepdims=True)
        p = jnp.exp(s)
        p = p * pl.reciprocal(jnp.sum(p, axis=-1, keepdims=True), approx=True)
        heads.append(jnp.dot(p, vhT.T, preferred_element_type=jnp.float32))          # (T, dk)

    # concat(heads) @ Wo == sum_h head_h @ Wo[rows_h]  -> one matmul instead of four.
    o = jnp.concatenate(heads, axis=-1)                                              # (T, D)
    return jnp.dot(o, wo, preferred_element_type=jnp.float32) + bo


# -------------------------------- kernel ----------------------------------- #
def decoder_layer_kernel(x_ref, mem_ref,
                         wq_s_ref, bq_s_ref, wkv_s_ref, bkv_s_ref, wo_s_ref, bo_s_ref,
                         wq_c_ref, bq_c_ref, wkv_c_ref, bkv_c_ref, wo_c_ref, bo_c_ref,
                         ln_ref, wff1_ref, bff1_ref, wff2_ref, bff2_ref,
                         out_ref):
    batch = x_ref.shape[0]

    # Hoist shared parameter loads out of the unrolled batch loop (no re-broadcasts).
    wkv_s, bkv_s = wkv_s_ref[...], bkv_s_ref[...]
    wo_s, bo_s = wo_s_ref[...], bo_s_ref[...]
    wkv_c, bkv_c = wkv_c_ref[...], bkv_c_ref[...]
    wo_c, bo_c = wo_c_ref[...], bo_c_ref[...]
    wff1, bff1 = wff1_ref[...], bff1_ref[...]
    wff2, bff2 = wff2_ref[...], bff2_ref[...]
    g1, b1 = ln_ref[0:1, :], ln_ref[1:2, :]
    g2, b2 = ln_ref[2:3, :], ln_ref[3:4, :]
    g3, b3 = ln_ref[4:5, :], ln_ref[5:6, :]

    for b in range(batch):  # static unroll; leading-axis ref indexing is free
        x = x_ref[b]        # (T, D)
        mem = mem_ref[b]    # (S, D)

        # --- self-attention + residual + norm1 (dropout1 = identity in eval) ---
        sa = _mha(x, x, wq_s_ref, bq_s_ref, wkv_s, bkv_s, wo_s, bo_s)
        x = _layernorm(sa + x, g1, b1)

        # --- encoder-decoder attention + residual + norm2 ---
        ca = _mha(x, mem, wq_c_ref, bq_c_ref, wkv_c, bkv_c, wo_c, bo_c)
        x = _layernorm(ca + x, g2, b2)

        # --- feed-forward (Linear -> ReLU -> Linear) + residual + norm3 ---
        h = jnp.maximum(jnp.dot(x, wff1, preferred_element_type=jnp.float32) + bff1, 0.0)
        f = jnp.dot(h, wff2, preferred_element_type=jnp.float32) + bff2
        x = _layernorm(f + x, g3, b3)

        # TODO(synk): with D=32 this is a masked 32-lane store; presenting a lane-dense
        # (B, T*D) output would need an in-kernel relayout costing about as much, so it
        # is left as-is per the perf review's caveat.
        out_ref[b] = x


# ------------------------------- wrapper ------------------------------------ #
def _prep_attention_params(w, b):
    # w: (4, D, D) = [Wq, Wk, Wv, Wo] stored (d_in, d_out); b: (4, D)
    scale = 1.0 / math.sqrt(D_HEAD)
    wq = (w[0] * scale).reshape(D_MODEL, N_HEADS, D_HEAD).transpose(1, 0, 2)  # (H, D, dk)
    bq = (b[0] * scale).reshape(N_HEADS, 1, D_HEAD)                           # (H, 1, dk)
    w_kvT = jnp.concatenate([w[1].T, w[2].T], axis=0)                         # (2D, D)
    b_kvT = jnp.concatenate([b[1], b[2]], axis=0).reshape(2 * D_MODEL, 1)     # (2D, 1)
    wo = w[3]                                                                 # (D, D)
    bo = b[3].reshape(1, D_MODEL)                                             # (1, D)
    return wq, bq, w_kvT, b_kvT, wo, bo


def transformer_decoder_layer(x, memory, params):
    B, T, D = x.shape
    (w_self, b_self, w_cross, b_cross, ln, wff1, bff1, wff2, bff2) = params

    self_p = _prep_attention_params(w_self, b_self)
    cross_p = _prep_attention_params(w_cross, b_cross)
    inputs = (x, memory) + self_p + cross_p + (ln, wff1, bff1, wff2, bff2)

    def full_spec(arr):
        zeros = (0,) * arr.ndim
        return pl.BlockSpec(arr.shape, lambda: zeros)

    # Single invocation, no batch grid: the entire layer (<100 KB of params + acts)
    # sits in VMEM; a per-batch grid step (~0.35us each) would exceed the compute.
    # TODO(synk): on v7x (2 TensorCores) at production sizes, reintroduce a
    # grid=(B,) "parallel" axis plus K-tiling / bf16 weights for the 64 MiB VMEM.
    return pl.pallas_call(
        decoder_layer_kernel,
        out_shape=jax.ShapeDtypeStruct((B, T, D), jnp.float32),
        in_specs=[full_spec(a) for a in inputs],
        out_specs=pl.BlockSpec((B, T, D), lambda: (0, 0, 0)),
    )(*inputs)


# --------------------------- pure-JAX reference ----------------------------- #
def reference(x, memory, params):
    (w_self, b_self, w_cross, b_cross, ln, wff1, bff1, wff2, bff2) = params
    dk = D_MODEL // N_HEADS

    def mha(xq, xkv, w, b):
        q = xq @ w[0] + b[0]
        k = xkv @ w[1] + b[1]
        v = xkv @ w[2] + b[2]
        B_, T_, _ = q.shape
        S_ = k.shape[1]
        qh = q.reshape(B_, T_, N_HEADS, dk).transpose(0, 2, 1, 3)
        kh = k.reshape(B_, S_, N_HEADS, dk).transpose(0, 2, 1, 3)
        vh = v.reshape(B_, S_, N_HEADS, dk).transpose(0, 2, 1, 3)
        s = jnp.einsum('bhtd,bhsd->bhts', qh, kh) / math.sqrt(dk)
        p = jax.nn.softmax(s, axis=-1)
        o = jnp.einsum('bhts,bhsd->bhtd', p, vh).transpose(0, 2, 1, 3).reshape(B_, T_, D_MODEL)
        return o @ w[3] + b[3]

    def lnorm(y, g, bta):
        m = y.mean(-1, keepdims=True)
        v = ((y - m) ** 2).mean(-1, keepdims=True)
        return g * (y - m) / jnp.sqrt(v + EPS) + bta

    y = lnorm(mha(x, x, w_self, b_self) + x, ln[0], ln[1])
    y = lnorm(mha(y, memory, w_cross, b_cross) + y, ln[2], ln[3])
    f = jnp.maximum(y @ wff1 + bff1, 0.0) @ wff2 + bff2
    return lnorm(f + y, ln[4], ln[5])


# --------------------------------- main ------------------------------------- #
if __name__ == "__main__":
    key = jax.random.PRNGKey(0)
    keys = jax.random.split(key, 10)
    B, T, S = 2, 8, 8
    scale = 0.1

    x = jax.random.normal(keys[0], (B, T, D_MODEL), jnp.float32)
    memory = jax.random.normal(keys[1], (B, S, D_MODEL), jnp.float32)

    w_self = jax.random.normal(keys[2], (4, D_MODEL, D_MODEL), jnp.float32) * scale
    b_self = jax.random.normal(keys[3], (4, D_MODEL), jnp.float32) * scale
    w_cross = jax.random.normal(keys[4], (4, D_MODEL, D_MODEL), jnp.float32) * scale
    b_cross = jax.random.normal(keys[5], (4, D_MODEL), jnp.float32) * scale
    # LayerNorm params, rows: [gamma1, beta1, gamma2, beta2, gamma3, beta3]
    ln = jnp.stack([jnp.ones(D_MODEL), jnp.zeros(D_MODEL)] * 3).astype(jnp.float32)
    wff1 = jax.random.normal(keys[6], (D_MODEL, D_FF), jnp.float32) * scale
    bff1 = jax.random.normal(keys[7], (1, D_FF), jnp.float32) * scale
    wff2 = jax.random.normal(keys[8], (D_FF, D_MODEL), jnp.float32) * scale
    bff2 = jax.random.normal(keys[9], (1, D_MODEL), jnp.float32) * scale

    params = (w_self, b_self, w_cross, b_cross, ln, wff1, bff1, wff2, bff2)

    out = transformer_decoder_layer(x, memory, params)
    out = jax.block_until_ready(out)

    ref = reference(x, memory, params)
    assert out.shape == (B, T, D_MODEL)
    assert bool(jnp.all(jnp.isfinite(out)))
    np.testing.assert_allclose(np.asarray(out), np.asarray(ref), rtol=2e-2, atol=2e-2)
    print("KERNEL_OK")
</pallas_src>

<mosaic_0001>
module attributes {stable_mosaic.version = 11 : i64} {
  func.func @decoder_layer_kernel(%arg0: memref<2x8x32xf32, #tpu.memory_space<vmem>>, %arg1: memref<2x8x32xf32, #tpu.memory_space<vmem>>, %arg2: memref<4x32x8xf32, #tpu.memory_space<vmem>>, %arg3: memref<4x1x8xf32, #tpu.memory_space<vmem>>, %arg4: memref<64x32xf32, #tpu.memory_space<vmem>>, %arg5: memref<64x1xf32, #tpu.memory_space<vmem>>, %arg6: memref<32x32xf32, #tpu.memory_space<vmem>>, %arg7: memref<1x32xf32, #tpu.memory_space<vmem>>, %arg8: memref<4x32x8xf32, #tpu.memory_space<vmem>>, %arg9: memref<4x1x8xf32, #tpu.memory_space<vmem>>, %arg10: memref<64x32xf32, #tpu.memory_space<vmem>>, %arg11: memref<64x1xf32, #tpu.memory_space<vmem>>, %arg12: memref<32x32xf32, #tpu.memory_space<vmem>>, %arg13: memref<1x32xf32, #tpu.memory_space<vmem>>, %arg14: memref<6x32xf32, #tpu.memory_space<vmem>>, %arg15: memref<32x64xf32, #tpu.memory_space<vmem>>, %arg16: memref<1x64xf32, #tpu.memory_space<vmem>>, %arg17: memref<64x32xf32, #tpu.memory_space<vmem>>, %arg18: memref<1x32xf32, #tpu.memory_space<vmem>>, %arg19: memref<2x8x32xf32, #tpu.memory_space<vmem>>) attributes {dimension_semantics = [], scalar_prefetch = 0 : i64, scratch_operands = 0 : i64, tpu.core_type = #tpu.core_type<tc>} {
    %c0 = arith.constant 0 : index
    %c0_0 = arith.constant 0 : index
    %0 = vector.load %arg4[%c0, %c0_0] : memref<64x32xf32, #tpu.memory_space<vmem>>, vector<64x32xf32>
    %c0_1 = arith.constant 0 : index
    %c0_2 = arith.constant 0 : index
    %1 = vector.load %arg5[%c0_1, %c0_2] : memref<64x1xf32, #tpu.memory_space<vmem>>, vector<64x1xf32>
    %c0_3 = arith.constant 0 : index
    %c0_4 = arith.constant 0 : index
    %2 = vector.load %arg6[%c0_3, %c0_4] : memref<32x32xf32, #tpu.memory_space<vmem>>, vector<32x32xf32>
    %c0_5 = arith.constant 0 : index
    %c0_6 = arith.constant 0 : index
    %3 = vector.load %arg7[%c0_5, %c0_6] : memref<1x32xf32, #tpu.memory_space<vmem>>, vector<1x32xf32>
    %c0_7 = arith.constant 0 : index
    %c0_8 = arith.constant 0 : index
    %4 = vector.load %arg10[%c0_7, %c0_8] : memref<64x32xf32, #tpu.memory_space<vmem>>, vector<64x32xf32>
    %c0_9 = arith.constant 0 : index
    %c0_10 = arith.constant 0 : index
    %5 = vector.load %arg11[%c0_9, %c0_10] : memref<64x1xf32, #tpu.memory_space<vmem>>, vector<64x1xf32>
    %c0_11 = arith.constant 0 : index
    %c0_12 = arith.constant 0 : index
    %6 = vector.load %arg12[%c0_11, %c0_12] : memref<32x32xf32, #tpu.memory_space<vmem>>, vector<32x32xf32>
    %c0_13 = arith.constant 0 : index
    %c0_14 = arith.constant 0 : index
    %7 = vector.load %arg13[%c0_13, %c0_14] : memref<1x32xf32, #tpu.memory_space<vmem>>, vector<1x32xf32>
    %c0_15 = arith.constant 0 : index
    %c0_16 = arith.constant 0 : index
    %8 = vector.load %arg15[%c0_15, %c0_16] : memref<32x64xf32, #tpu.memory_space<vmem>>, vector<32x64xf32>
    %c0_17 = arith.constant 0 : index
    %c0_18 = arith.constant 0 : index
    %9 = vector.load %arg16[%c0_17, %c0_18] : memref<1x64xf32, #tpu.memory_space<vmem>>, vector<1x64xf32>
    %c0_19 = arith.constant 0 : index
    %c0_20 = arith.constant 0 : index
    %10 = vector.load %arg17[%c0_19, %c0_20] : memref<64x32xf32, #tpu.memory_space<vmem>>, vector<64x32xf32>
    %c0_21 = arith.constant 0 : index
    %c0_22 = arith.constant 0 : index
    %11 = vector.load %arg18[%c0_21, %c0_22] : memref<1x32xf32, #tpu.memory_space<vmem>>, vector<1x32xf32>
    %c0_23 = arith.constant 0 : index
    %c0_24 = arith.constant 0 : index
    %12 = vector.load %arg14[%c0_23, %c0_24] : memref<6x32xf32, #tpu.memory_space<vmem>>, vector<1x32xf32>
    %c1 = arith.constant 1 : index
    %c0_25 = arith.constant 0 : index
    %13 = vector.load %arg14[%c1, %c0_25] : memref<6x32xf32, #tpu.memory_space<vmem>>, vector<1x32xf32>
    %c2 = arith.constant 2 : index
    %c0_26 = arith.constant 0 : index
    %14 = vector.load %arg14[%c2, %c0_26] : memref<6x32xf32, #tpu.memory_space<vmem>>, vector<1x32xf32>
    %c3 = arith.constant 3 : index
    %c0_27 = arith.constant 0 : index
    %15 = vector.load %arg14[%c3, %c0_27] : memref<6x32xf32, #tpu.memory_space<vmem>>, vector<1x32xf32>
    %c4 = arith.constant 4 : index
    %c0_28 = arith.constant 0 : index
    %16 = vector.load %arg14[%c4, %c0_28] : memref<6x32xf32, #tpu.memory_space<vmem>>, vector<1x32xf32>
    %c5 = arith.constant 5 : index
    %c0_29 = arith.constant 0 : index
    %17 = vector.load %arg14[%c5, %c0_29] : memref<6x32xf32, #tpu.memory_space<vmem>>, vector<1x32xf32>
    %c0_30 = arith.constant 0 : index
    %c0_31 = arith.constant 0 : index
    %c0_32 = arith.constant 0 : index
    %18 = vector.load %arg0[%c0_30, %c0_31, %c0_32] : memref<2x8x32xf32, #tpu.memory_space<vmem>>, vector<1x8x32xf32>
    %19 = vector.shape_cast %18 : vector<1x8x32xf32> to vector<8x32xf32>
    %c0_33 = arith.constant 0 : index
    %c0_34 = arith.constant 0 : index
    %c0_35 = arith.constant 0 : index
    %20 = vector.load %arg1[%c0_33, %c0_34, %c0_35] : memref<2x8x32xf32, #tpu.memory_space<vmem>>, vector<1x8x32xf32>
    %21 = vector.shape_cast %20 : vector<1x8x32xf32> to vector<8x32xf32>
    %22 = tpu.transpose %19, [1, 0] : vector<8x32xf32> -> vector<32x8xf32>
    %cst = arith.constant dense<0.000000e+00> : vector<64x8xf32>
    %23 = tpu.matmul %0, %22, %cst {dimension_numbers = #tpu.dot_dimension_numbers<[1], [0], [0], [1], [0, 0, 1, 1], [], []>} : vector<64x32xf32>, vector<32x8xf32>, vector<64x8xf32> -> vector<64x8xf32>
    %24 = vector.broadcast %1 : vector<64x1xf32> to vector<64x8xf32>
    %25 = arith.addf %23, %24 : vector<64x8xf32>
    %c0_36 = arith.constant 0 : index
    %c0_37 = arith.constant 0 : index
    %c0_38 = arith.constant 0 : index
    %26 = vector.load %arg2[%c0_36, %c0_37, %c0_38] : memref<4x32x8xf32, #tpu.memory_space<vmem>>, vector<1x32x8xf32>
    %27 = vector.shape_cast %26 : vector<1x32x8xf32> to vector<32x8xf32>
    %cst_39 = arith.constant dense<0.000000e+00> : vector<8x8xf32>
    %28 = tpu.matmul %19, %27, %cst_39 {dimension_numbers = #tpu.dot_dimension_numbers<[1], [0], [0], [1], [0, 0, 1, 1], [], []>} : vector<8x32xf32>, vector<32x8xf32>, vector<8x8xf32> -> vector<8x8xf32>
    %c0_40 = arith.constant 0 : index
    %c0_41 = arith.constant 0 : index
    %c0_42 = arith.constant 0 : index
    %29 = vector.load %arg3[%c0_40, %c0_41, %c0_42] : memref<4x1x8xf32, #tpu.memory_space<vmem>>, vector<1x1x8xf32>
    %30 = vector.shape_cast %29 : vector<1x1x8xf32> to vector<1x8xf32>
    %31 = vector.broadcast %30 : vector<1x8xf32> to vector<8x8xf32>
    %32 = arith.addf %28, %31 : vector<8x8xf32>
    %33 = vector.extract_strided_slice %25 {offsets = [0, 0], sizes = [8, 8], strides = [1, 1]} : vector<64x8xf32> to vector<8x8xf32>
    %34 = vector.extract_strided_slice %25 {offsets = [32, 0], sizes = [8, 8], strides = [1, 1]} : vector<64x8xf32> to vector<8x8xf32>
    %cst_43 = arith.constant dense<0.000000e+00> : vector<8x8xf32>
    %35 = tpu.matmul %32, %33, %cst_43 {dimension_numbers = #tpu.dot_dimension_numbers<[1], [0], [0], [1], [0, 0, 1, 1], [], []>} : vector<8x8xf32>, vector<8x8xf32>, vector<8x8xf32> -> vector<8x8xf32>
    %cst_44 = arith.constant dense<0xFF800000> : vector<8xf32>
    %36 = vector.multi_reduction <maximumf>, %35, %cst_44 [1] : vector<8x8xf32> to vector<8xf32>
    %37 = vector.shape_cast %36 : vector<8xf32> to vector<8x1xf32>
    %38 = vector.broadcast %37 : vector<8x1xf32> to vector<8x8xf32>
    %39 = arith.subf %35, %38 : vector<8x8xf32>
    %40 = math.exp %39 : vector<8x8xf32>
    %cst_45 = arith.constant dense<0.000000e+00> : vector<8xf32>
    %41 = vector.multi_reduction <add>, %40, %cst_45 [1] : vector<8x8xf32> to vector<8xf32>
    %42 = vector.shape_cast %41 : vector<8xf32> to vector<8x1xf32>
    %43 = tpu.reciprocal %42 {approx = true} : vector<8x1xf32> -> vector<8x1xf32>
    %44 = vector.broadcast %43 : vector<8x1xf32> to vector<8x8xf32>
    %45 = arith.mulf %40, %44 : vector<8x8xf32>
    %46 = tpu.transpose %34, [1, 0] : vector<8x8xf32> -> vector<8x8xf32>
    %cst_46 = arith.constant dense<0.000000e+00> : vector<8x8xf32>
    %47 = tpu.matmul %45, %46, %cst_46 {dimension_numbers = #tpu.dot_dimension_numbers<[1], [0], [0], [1], [0, 0, 1, 1], [], []>} : vector<8x8xf32>, vector<8x8xf32>, vector<8x8xf32> -> vector<8x8xf32>
    %c1_47 = arith.constant 1 : index
    %c0_48 = arith.constant 0 : index
    %c0_49 = arith.constant 0 : index
    %48 = vector.load %arg2[%c1_47, %c0_48, %c0_49] : memref<4x32x8xf32, #tpu.memory_space<vmem>>, vector<1x32x8xf32>
    %49 = vector.shape_cast %48 : vector<1x32x8xf32> to vector<32x8xf32>
    %cst_50 = arith.constant dense<0.000000e+00> : vector<8x8xf32>
    %50 = tpu.matmul %19, %49, %cst_50 {dimension_numbers = #tpu.dot_dimension_numbers<[1], [0], [0], [1], [0, 0, 1, 1], [], []>} : vector<8x32xf32>, vector<32x8xf32>, vector<8x8xf32> -> vector<8x8xf32>
    %c1_51 = arith.constant 1 : index
    %c0_52 = arith.constant 0 : index
    %c0_53 = arith.constant 0 : index
    %51 = vector.load %arg3[%c1_51, %c0_52, %c0_53] : memref<4x1x8xf32, #tpu.memory_space<vmem>>, vector<1x1x8xf32>
    %52 = vector.shape_cast %51 : vector<1x1x8xf32> to vector<1x8xf32>
    %53 = vector.broadcast %52 : vector<1x8xf32> to vector<8x8xf32>
    %54 = arith.addf %50, %53 : vector<8x8xf32>
    %55 = vector.extract_strided_slice %25 {offsets = [8, 0], sizes = [8, 8], strides = [1, 1]} : vector<64x8xf32> to vector<8x8xf32>
    %56 = vector.extract_strided_slice %25 {offsets = [40, 0], sizes = [8, 8], strides = [1, 1]} : vector<64x8xf32> to vector<8x8xf32>
    %cst_54 = arith.constant dense<0.000000e+00> : vector<8x8xf32>
    %57 = tpu.matmul %54, %55, %cst_54 {dimension_numbers = #tpu.dot_dimension_numbers<[1], [0], [0], [1], [0, 0, 1, 1], [], []>} : vector<8x8xf32>, vector<8x8xf32>, vector<8x8xf32> -> vector<8x8xf32>
    %cst_55 = arith.constant dense<0xFF800000> : vector<8xf32>
    %58 = vector.multi_reduction <maximumf>, %57, %cst_55 [1] : vector<8x8xf32> to vector<8xf32>
    %59 = vector.shape_cast %58 : vector<8xf32> to vector<8x1xf32>
    %60 = vector.broadcast %59 : vector<8x1xf32> to vector<8x8xf32>
    %61 = arith.subf %57, %60 : vector<8x8xf32>
    %62 = math.exp %61 : vector<8x8xf32>
    %cst_56 = arith.constant dense<0.000000e+00> : vector<8xf32>
    %63 = vector.multi_reduction <add>, %62, %cst_56 [1] : vector<8x8xf32> to vector<8xf32>
    %64 = vector.shape_cast %63 : vector<8xf32> to vector<8x1xf32>
    %65 = tpu.reciprocal %64 {approx = true} : vector<8x1xf32> -> vector<8x1xf32>
    %66 = vector.broadcast %65 : vector<8x1xf32> to vector<8x8xf32>
    %67 = arith.mulf %62, %66 : vector<8x8xf32>
    %68 = tpu.transpose %56, [1, 0] : vector<8x8xf32> -> vector<8x8xf32>
    %cst_57 = arith.constant dense<0.000000e+00> : vector<8x8xf32>
    %69 = tpu.matmul %67, %68, %cst_57 {dimension_numbers = #tpu.dot_dimension_numbers<[1], [0], [0], [1], [0, 0, 1, 1], [], []>} : vector<8x8xf32>, vector<8x8xf32>, vector<8x8xf32> -> vector<8x8xf32>
    %c2_58 = arith.constant 2 : index
    %c0_59 = arith.constant 0 : index
    %c0_60 = arith.constant 0 : index
    %70 = vector.load %arg2[%c2_58, %c0_59, %c0_60] : memref<4x32x8xf32, #tpu.memory_space<vmem>>, vector<1x32x8xf32>
    %71 = vector.shape_cast %70 : vector<1x32x8xf32> to vector<32x8xf32>
    %cst_61 = arith.constant dense<0.000000e+00> : vector<8x8xf32>
    %72 = tpu.matmul %19, %71, %cst_61 {dimension_numbers = #tpu.dot_dimension_numbers<[1], [0], [0], [1], [0, 0, 1, 1], [], []>} : vector<8x32xf32>, vector<32x8xf32>, vector<8x8xf32> -> vector<8x8xf32>
    %c2_62 = arith.constant 2 : index
    %c0_63 = arith.constant 0 : index
    %c0_64 = arith.constant 0 : index
    %73 = vector.load %arg3[%c2_62, %c0_63, %c0_64] : memref<4x1x8xf32, #tpu.memory_space<vmem>>, vector<1x1x8xf32>
    %74 = vector.shape_cast %73 : vector<1x1x8xf32> to vector<1x8xf32>
    %75 = vector.broadcast %74 : vector<1x8xf32> to vector<8x8xf32>
    %76 = arith.addf %72, %75 : vector<8x8xf32>
    %77 = vector.extract_strided_slice %25 {offsets = [16, 0], sizes = [8, 8], strides = [1, 1]} : vector<64x8xf32> to vector<8x8xf32>
    %78 = vector.extract_strided_slice %25 {offsets = [48, 0], sizes = [8, 8], strides = [1, 1]} : vector<64x8xf32> to vector<8x8xf32>
    %cst_65 = arith.constant dense<0.000000e+00> : vector<8x8xf32>
    %79 = tpu.matmul %76, %77, %cst_65 {dimension_numbers = #tpu.dot_dimension_numbers<[1], [0], [0], [1], [0, 0, 1, 1], [], []>} : vector<8x8xf32>, vector<8x8xf32>, vector<8x8xf32> -> vector<8x8xf32>
    %cst_66 = arith.constant dense<0xFF800000> : vector<8xf32>
    %80 = vector.multi_reduction <maximumf>, %79, %cst_66 [1] : vector<8x8xf32> to vector<8xf32>
    %81 = vector.shape_cast %80 : vector<8xf32> to vector<8x1xf32>
    %82 = vector.broadcast %81 : vector<8x1xf32> to vector<8x8xf32>
    %83 = arith.subf %79, %82 : vector<8x8xf32>
    %84 = math.exp %83 : vector<8x8xf32>
    %cst_67 = arith.constant dense<0.000000e+00> : vector<8xf32>
    %85 = vector.multi_reduction <add>, %84, %cst_67 [1] : vector<8x8xf32> to vector<8xf32>
    %86 = vector.shape_cast %85 : vector<8xf32> to vector<8x1xf32>
    %87 = tpu.reciprocal %86 {approx = true} : vector<8x1xf32> -> vector<8x1xf32>
    %88 = vector.broadcast %87 : vector<8x1xf32> to vector<8x8xf32>
    %89 = arith.mulf %84, %88 : vector<8x8xf32>
    %90 = tpu.transpose %78, [1, 0] : vector<8x8xf32> -> vector<8x8xf32>
    %cst_68 = arith.constant dense<0.000000e+00> : vector<8x8xf32>
    %91 = tpu.matmul %89, %90, %cst_68 {dimension_numbers = #tpu.dot_dimension_numbers<[1], [0], [0], [1], [0, 0, 1, 1], [], []>} : vector<8x8xf32>, vector<8x8xf32>, vector<8x8xf32> -> vector<8x8xf32>
    %c3_69 = arith.constant 3 : index
    %c0_70 = arith.constant 0 : index
    %c0_71 = arith.constant 0 : index
    %92 = vector.load %arg2[%c3_69, %c0_70, %c0_71] : memref<4x32x8xf32, #tpu.memory_space<vmem>>, vector<1x32x8xf32>
    %93 = vector.shape_cast %92 : vector<1x32x8xf32> to vector<32x8xf32>
    %cst_72 = arith.constant dense<0.000000e+00> : vector<8x8xf32>
    %94 = tpu.matmul %19, %93, %cst_72 {dimension_numbers = #tpu.dot_dimension_numbers<[1], [0], [0], [1], [0, 0, 1, 1], [], []>} : vector<8x32xf32>, vector<32x8xf32>, vector<8x8xf32> -> vector<8x8xf32>
    %c3_73 = arith.constant 3 : index
    %c0_74 = arith.constant 0 : index
    %c0_75 = arith.constant 0 : index
    %95 = vector.load %arg3[%c3_73, %c0_74, %c0_75] : memref<4x1x8xf32, #tpu.memory_space<vmem>>, vector<1x1x8xf32>
    %96 = vector.shape_cast %95 : vector<1x1x8xf32> to vector<1x8xf32>
    %97 = vector.broadcast %96 : vector<1x8xf32> to vector<8x8xf32>
    %98 = arith.addf %94, %97 : vector<8x8xf32>
    %99 = vector.extract_strided_slice %25 {offsets = [24, 0], sizes = [8, 8], strides = [1, 1]} : vector<64x8xf32> to vector<8x8xf32>
    %100 = vector.extract_strided_slice %25 {offsets = [56, 0], sizes = [8, 8], strides = [1, 1]} : vector<64x8xf32> to vector<8x8xf32>
    %cst_76 = arith.constant dense<0.000000e+00> : vector<8x8xf32>
    %101 = tpu.matmul %98, %99, %cst_76 {dimension_numbers = #tpu.dot_dimension_numbers<[1], [0], [0], [1], [0, 0, 1, 1], [], []>} : vector<8x8xf32>, vector<8x8xf32>, vector<8x8xf32> -> vector<8x8xf32>
    %cst_77 = arith.constant dense<0xFF800000> : vector<8xf32>
    %102 = vector.multi_reduction <maximumf>, %101, %cst_77 [1] : vector<8x8xf32> to vector<8xf32>
    %103 = vector.shape_cast %102 : vector<8xf32> to vector<8x1xf32>
    %104 = vector.broadcast %103 : vector<8x1xf32> to vector<8x8xf32>
    %105 = arith.subf %101, %104 : vector<8x8xf32>
    %106 = math.exp %105 : vector<8x8xf32>
    %cst_78 = arith.constant dense<0.000000e+00> : vector<8xf32>
    %107 = vector.multi_reduction <add>, %106, %cst_78 [1] : vector<8x8xf32> to vector<8xf32>
    %108 = vector.shape_cast %107 : vector<8xf32> to vector<8x1xf32>
    %109 = tpu.reciprocal %108 {approx = true} : vector<8x1xf32> -> vector<8x1xf32>
    %110 = vector.broadcast %109 : vector<8x1xf32> to vector<8x8xf32>
    %111 = arith.mulf %106, %110 : vector<8x8xf32>
    %112 = tpu.transpose %100, [1, 0] : vector<8x8xf32> -> vector<8x8xf32>
    %cst_79 = arith.constant dense<0.000000e+00> : vector<8x8xf32>
    %113 = tpu.matmul %111, %112, %cst_79 {dimension_numbers = #tpu.dot_dimension_numbers<[1], [0], [0], [1], [0, 0, 1, 1], [], []>} : vector<8x8xf32>, vector<8x8xf32>, vector<8x8xf32> -> vector<8x8xf32>
    %114 = tpu.concatenate %47, %69, %91, %113 in 1 : vector<8x8xf32>, vector<8x8xf32>, vector<8x8xf32>, vector<8x8xf32> -> vector<8x32xf32>
    %cst_80 = arith.constant dense<0.000000e+00> : vector<8x32xf32>
    %115 = tpu.matmul %114, %2, %cst_80 {dimension_numbers = #tpu.dot_dimension_numbers<[1], [0], [0], [1], [0, 0, 1, 1], [], []>} : vector<8x32xf32>, vector<32x32xf32>, vector<8x32xf32> -> vector<8x32xf32>
    %116 = vector.broadcast %3 : vector<1x32xf32> to vector<8x32xf32>
    %117 = arith.addf %115, %116 : vector<8x32xf32>
    %118 = arith.addf %117, %19 : vector<8x32xf32>
    %cst_81 = arith.constant dense<0.000000e+00> : vector<8xf32>
    %119 = vector.multi_reduction <add>, %118, %cst_81 [1] : vector<8x32xf32> to vector<8xf32>
    %120 = vector.shape_cast %119 : vector<8xf32> to vector<8x1xf32>
    %cst_82 = arith.constant 3.200000e+01 : f32
    %121 = vector.broadcast %cst_82 : f32 to vector<8x1xf32>
    %122 = arith.divf %120, %121 : vector<8x1xf32>
    %123 = vector.broadcast %122 : vector<8x1xf32> to vector<8x32xf32>
    %124 = arith.subf %118, %123 : vector<8x32xf32>
    %125 = arith.mulf %124, %124 : vector<8x32xf32>
    %cst_83 = arith.constant dense<0.000000e+00> : vector<8xf32>
    %126 = vector.multi_reduction <add>, %125, %cst_83 [1] : vector<8x32xf32> to vector<8xf32>
    %127 = vector.shape_cast %126 : vector<8xf32> to vector<8x1xf32>
    %cst_84 = arith.constant 3.200000e+01 : f32
    %128 = vector.broadcast %cst_84 : f32 to vector<8x1xf32>
    %129 = arith.divf %127, %128 : vector<8x1xf32>
    %130 = vector.broadcast %122 : vector<8x1xf32> to vector<8x32xf32>
    %131 = arith.subf %118, %130 : vector<8x32xf32>
    %132 = vector.broadcast %12 : vector<1x32xf32> to vector<8x32xf32>
    %133 = arith.mulf %132, %131 : vector<8x32xf32>
    %cst_85 = arith.constant 9.99999996E-13 : f32
    %134 = vector.broadcast %cst_85 : f32 to vector<8x1xf32>
    %135 = arith.addf %129, %134 : vector<8x1xf32>
    %136 = math.rsqrt %135 : vector<8x1xf32>
    %137 = vector.broadcast %136 : vector<8x1xf32> to vector<8x32xf32>
    %138 = arith.mulf %133, %137 : vector<8x32xf32>
    %139 = vector.broadcast %13 : vector<1x32xf32> to vector<8x32xf32>
    %140 = arith.addf %138, %139 : vector<8x32xf32>
    %141 = tpu.transpose %21, [1, 0] : vector<8x32xf32> -> vector<32x8xf32>
    %cst_86 = arith.constant dense<0.000000e+00> : vector<64x8xf32>
    %142 = tpu.matmul %4, %141, %cst_86 {dimension_numbers = #tpu.dot_dimension_numbers<[1], [0], [0], [1], [0, 0, 1, 1], [], []>} : vector<64x32xf32>, vector<32x8xf32>, vector<64x8xf32> -> vector<64x8xf32>
    %143 = vector.broadcast %5 : vector<64x1xf32> to vector<64x8xf32>
    %144 = arith.addf %142, %143 : vector<64x8xf32>
    %c0_87 = arith.constant 0 : index
    %c0_88 = arith.constant 0 : index
    %c0_89 = arith.constant 0 : index
    %145 = vector.load %arg8[%c0_87, %c0_88, %c0_89] : memref<4x32x8xf32, #tpu.memory_space<vmem>>, vector<1x32x8xf32>
    %146 = vector.shape_cast %145 : vector<1x32x8xf32> to vector<32x8xf32>
    %cst_90 = arith.constant dense<0.000000e+00> : vector<8x8xf32>
    %147 = tpu.matmul %140, %146, %cst_90 {dimension_numbers = #tpu.dot_dimension_numbers<[1], [0], [0], [1], [0, 0, 1, 1], [], []>} : vector<8x32xf32>, vector<32x8xf32>, vector<8x8xf32> -> vector<8x8xf32>
    %c0_91 = arith.constant 0 : index
    %c0_92 = arith.constant 0 : index
    %c0_93 = arith.constant 0 : index
    %148 = vector.load %arg9[%c0_91, %c0_92, %c0_93] : memref<4x1x8xf32, #tpu.memory_space<vmem>>, vector<1x1x8xf32>
    %149 = vector.shape_cast %148 : vector<1x1x8xf32> to vector<1x8xf32>
    %150 = vector.broadcast %149 : vector<1x8xf32> to vector<8x8xf32>
    %151 = arith.addf %147, %150 : vector<8x8xf32>
    %152 = vector.extract_strided_slice %144 {offsets = [0, 0], sizes = [8, 8], strides = [1, 1]} : vector<64x8xf32> to vector<8x8xf32>
    %153 = vector.extract_strided_slice %144 {offsets = [32, 0], sizes = [8, 8], strides = [1, 1]} : vector<64x8xf32> to vector<8x8xf32>
    %cst_94 = arith.constant dense<0.000000e+00> : vector<8x8xf32>
    %154 = tpu.matmul %151, %152, %cst_94 {dimension_numbers = #tpu.dot_dimension_numbers<[1], [0], [0], [1], [0, 0, 1, 1], [], []>} : vector<8x8xf32>, vector<8x8xf32>, vector<8x8xf32> -> vector<8x8xf32>
    %cst_95 = arith.constant dense<0xFF800000> : vector<8xf32>
    %155 = vector.multi_reduction <maximumf>, %154, %cst_95 [1] : vector<8x8xf32> to vector<8xf32>
    %156 = vector.shape_cast %155 : vector<8xf32> to vector<8x1xf32>
    %157 = vector.broadcast %156 : vector<8x1xf32> to vector<8x8xf32>
    %158 = arith.subf %154, %157 : vector<8x8xf32>
    %159 = math.exp %158 : vector<8x8xf32>
    %cst_96 = arith.constant dense<0.000000e+00> : vector<8xf32>
    %160 = vector.multi_reduction <add>, %159, %cst_96 [1] : vector<8x8xf32> to vector<8xf32>
    %161 = vector.shape_cast %160 : vector<8xf32> to vector<8x1xf32>
    %162 = tpu.reciprocal %161 {approx = true} : vector<8x1xf32> -> vector<8x1xf32>
    %163 = vector.broadcast %162 : vector<8x1xf32> to vector<8x8xf32>
    %164 = arith.mulf %159, %163 : vector<8x8xf32>
    %165 = tpu.transpose %153, [1, 0] : vector<8x8xf32> -> vector<8x8xf32>
    %cst_97 = arith.constant dense<0.000000e+00> : vector<8x8xf32>
    %166 = tpu.matmul %164, %165, %cst_97 {dimension_numbers = #tpu.dot_dimension_numbers<[1], [0], [0], [1], [0, 0, 1, 1], [], []>} : vector<8x8xf32>, vector<8x8xf32>, vector<8x8xf32> -> vector<8x8xf32>
    %c1_98 = arith.constant 1 : index
    %c0_99 = arith.constant 0 : index
    %c0_100 = arith.constant 0 : index
    %167 = vector.load %arg8[%c1_98, %c0_99, %c0_100] : memref<4x32x8xf32, #tpu.memory_space<vmem>>, vector<1x32x8xf32>
    %168 = vector.shape_cast %167 : vector<1x32x8xf32> to vector<32x8xf32>
    %cst_101 = arith.constant dense<0.000000e+00> : vector<8x8xf32>
    %169 = tpu.matmul %140, %168, %cst_101 {dimension_numbers = #tpu.dot_dimension_numbers<[1], [0], [0], [1], [0, 0, 1, 1], [], []>} : vector<8x32xf32>, vector<32x8xf32>, vector<8x8xf32> -> vector<8x8xf32>
    %c1_102 = arith.constant 1 : index
    %c0_103 = arith.constant 0 : index
    %c0_104 = arith.constant 0 : index
    %170 = vector.load %arg9[%c1_102, %c0_103, %c0_104] : memref<4x1x8xf32, #tpu.memory_space<vmem>>, vector<1x1x8xf32>
    %171 = vector.shape_cast %170 : vector<1x1x8xf32> to vector<1x8xf32>
    %172 = vector.broadcast %171 : vector<1x8xf32> to vector<8x8xf32>
    %173 = arith.addf %169, %172 : vector<8x8xf32>
    %174 = vector.extract_strided_slice %144 {offsets = [8, 0], sizes = [8, 8], strides = [1, 1]} : vector<64x8xf32> to vector<8x8xf32>
    %175 = vector.extract_strided_slice %144 {offsets = [40, 0], sizes = [8, 8], strides = [1, 1]} : vector<64x8xf32> to vector<8x8xf32>
    %cst_105 = arith.constant dense<0.000000e+00> : vector<8x8xf32>
    %176 = tpu.matmul %173, %174, %cst_105 {dimension_numbers = #tpu.dot_dimension_numbers<[1], [0], [0], [1], [0, 0, 1, 1], [], []>} : vector<8x8xf32>, vector<8x8xf32>, vector<8x8xf32> -> vector<8x8xf32>
    %cst_106 = arith.constant dense<0xFF800000> : vector<8xf32>
    %177 = vector.multi_reduction <maximumf>, %176, %cst_106 [1] : vector<8x8xf32> to vector<8xf32>
    %178 = vector.shape_cast %177 : vector<8xf32> to vector<8x1xf32>
    %179 = vector.broadcast %178 : vector<8x1xf32> to vector<8x8xf32>
    %180 = arith.subf %176, %179 : vector<8x8xf32>
    %181 = math.exp %180 : vector<8x8xf32>
    %cst_107 = arith.constant dense<0.000000e+00> : vector<8xf32>
    %182 = vector.multi_reduction <add>, %181, %cst_107 [1] : vector<8x8xf32> to vector<8xf32>
    %183 = vector.shape_cast %182 : vector<8xf32> to vector<8x1xf32>
    %184 = tpu.reciprocal %183 {approx = true} : vector<8x1xf32> -> vector<8x1xf32>
    %185 = vector.broadcast %184 : vector<8x1xf32> to vector<8x8xf32>
    %186 = arith.mulf %181, %185 : vector<8x8xf32>
    %187 = tpu.transpose %175, [1, 0] : vector<8x8xf32> -> vector<8x8xf32>
    %cst_108 = arith.constant dense<0.000000e+00> : vector<8x8xf32>
    %188 = tpu.matmul %186, %187, %cst_108 {dimension_numbers = #tpu.dot_dimension_numbers<[1], [0], [0], [1], [0, 0, 1, 1], [], []>} : vector<8x8xf32>, vector<8x8xf32>, vector<8x8xf32> -> vector<8x8xf32>
    %c2_109 = arith.constant 2 : index
    %c0_110 = arith.constant 0 : index
    %c0_111 = arith.constant 0 : index
    %189 = vector.load %arg8[%c2_109, %c0_110, %c0_111] : memref<4x32x8xf32, #tpu.memory_space<vmem>>, vector<1x32x8xf32>
    %190 = vector.shape_cast %189 : vector<1x32x8xf32> to vector<32x8xf32>
    %cst_112 = arith.constant dense<0.000000e+00> : vector<8x8xf32>
    %191 = tpu.matmul %140, %190, %cst_112 {dimension_numbers = #tpu.dot_dimension_numbers<[1], [0], [0], [1], [0, 0, 1, 1], [], []>} : vector<8x32xf32>, vector<32x8xf32>, vector<8x8xf32> -> vector<8x8xf32>
    %c2_113 = arith.constant 2 : index
    %c0_114 = arith.constant 0 : index
    %c0_115 = arith.constant 0 : index
    %192 = vector.load %arg9[%c2_113, %c0_114, %c0_115] : memref<4x1x8xf32, #tpu.memory_space<vmem>>, vector<1x1x8xf32>
    %193 = vector.shape_cast %192 : vector<1x1x8xf32> to vector<1x8xf32>
    %194 = vector.broadcast %193 : vector<1x8xf32> to vector<8x8xf32>
    %195 = arith.addf %191, %194 : vector<8x8xf32>
    %196 = vector.extract_strided_slice %144 {offsets = [16, 0], sizes = [8, 8], strides = [1, 1]} : vector<64x8xf32> to vector<8x8xf32>
    %197 = vector.extract_strided_slice %144 {offsets = [48, 0], sizes = [8, 8], strides = [1, 1]} : vector<64x8xf32> to vector<8x8xf32>
    %cst_116 = arith.constant dense<0.000000e+00> : vector<8x8xf32>
    %198 = tpu.matmul %195, %196, %cst_116 {dimension_numbers = #tpu.dot_dimension_numbers<[1], [0], [0], [1], [0, 0, 1, 1], [], []>} : vector<8x8xf32>, vector<8x8xf32>, vector<8x8xf32> -> vector<8x8xf32>
    %cst_117 = arith.constant dense<0xFF800000> : vector<8xf32>
    %199 = vector.multi_reduction <maximumf>, %198, %cst_117 [1] : vector<8x8xf32> to vector<8xf32>
    %200 = vector.shape_cast %199 : vector<8xf32> to vector<8x1xf32>
    %201 = vector.broadcast %200 : vector<8x1xf32> to vector<8x8xf32>
    %202 = arith.subf %198, %201 : vector<8x8xf32>
    %203 = math.exp %202 : vector<8x8xf32>
    %cst_118 = arith.constant dense<0.000000e+00> : vector<8xf32>
    %204 = vector.multi_reduction <add>, %203, %cst_118 [1] : vector<8x8xf32> to vector<8xf32>
    %205 = vector.shape_cast %204 : vector<8xf32> to vector<8x1xf32>
    %206 = tpu.reciprocal %205 {approx = true} : vector<8x1xf32> -> vector<8x1xf32>
    %207 = vector.broadcast %206 : vector<8x1xf32> to vector<8x8xf32>
    %208 = arith.mulf %203, %207 : vector<8x8xf32>
    %209 = tpu.transpose %197, [1, 0] : vector<8x8xf32> -> vector<8x8xf32>
    %cst_119 = arith.constant dense<0.000000e+00> : vector<8x8xf32>
    %210 = tpu.matmul %208, %209, %cst_119 {dimension_numbers = #tpu.dot_dimension_numbers<[1], [0], [0], [1], [0, 0, 1, 1], [], []>} : vector<8x8xf32>, vector<8x8xf32>, vector<8x8xf32> -> vector<8x8xf32>
    %c3_120 = arith.constant 3 : index
    %c0_121 = arith.constant 0 : index
    %c0_122 = arith.constant 0 : index
    %211 = vector.load %arg8[%c3_120, %c0_121, %c0_122] : memref<4x32x8xf32, #tpu.memory_space<vmem>>, vector<1x32x8xf32>
    %212 = vector.shape_cast %211 : vector<1x32x8xf32> to vector<32x8xf32>
    %cst_123 = arith.constant dense<0.000000e+00> : vector<8x8xf32>
    %213 = tpu.matmul %140, %212, %cst_123 {dimension_numbers = #tpu.dot_dimension_numbers<[1], [0], [0], [1], [0, 0, 1, 1], [], []>} : vector<8x32xf32>, vector<32x8xf32>, vector<8x8xf32> -> vector<8x8xf32>
    %c3_124 = arith.constant 3 : index
    %c0_125 = arith.constant 0 : index
    %c0_126 = arith.constant 0 : index
    %214 = vector.load %arg9[%c3_124, %c0_125, %c0_126] : memref<4x1x8xf32, #tpu.memory_space<vmem>>, vector<1x1x8xf32>
    %215 = vector.shape_cast %214 : vector<1x1x8xf32> to vector<1x8xf32>
    %216 = vector.broadcast %215 : vector<1x8xf32> to vector<8x8xf32>
    %217 = arith.addf %213, %216 : vector<8x8xf32>
    %218 = vector.extract_strided_slice %144 {offsets = [24, 0], sizes = [8, 8], strides = [1, 1]} : vector<64x8xf32> to vector<8x8xf32>
    %219 = vector.extract_strided_slice %144 {offsets = [56, 0], sizes = [8, 8], strides = [1, 1]} : vector<64x8xf32> to vector<8x8xf32>
    %cst_127 = arith.constant dense<0.000000e+00> : vector<8x8xf32>
    %220 = tpu.matmul %217, %218, %cst_127 {dimension_numbers = #tpu.dot_dimension_numbers<[1], [0], [0], [1], [0, 0, 1, 1], [], []>} : vector<8x8xf32>, vector<8x8xf32>, vector<8x8xf32> -> vector<8x8xf32>
    %cst_128 = arith.constant dense<0xFF800000> : vector<8xf32>
    %221 = vector.multi_reduction <maximumf>, %220, %cst_128 [1] : vector<8x8xf32> to vector<8xf32>
    %222 = vector.shape_cast %221 : vector<8xf32> to vector<8x1xf32>
    %223 = vector.broadcast %222 : vector<8x1xf32> to vector<8x8xf32>
    %224 = arith.subf %220, %223 : vector<8x8xf32>
    %225 = math.exp %224 : vector<8x8xf32>
    %cst_129 = arith.constant dense<0.000000e+00> : vector<8xf32>
    %226 = vector.multi_reduction <add>, %225, %cst_129 [1] : vector<8x8xf32> to vector<8xf32>
    %227 = vector.shape_cast %226 : vector<8xf32> to vector<8x1xf32>
    %228 = tpu.reciprocal %227 {approx = true} : vector<8x1xf32> -> vector<8x1xf32>
    %229 = vector.broadcast %228 : vector<8x1xf32> to vector<8x8xf32>
    %230 = arith.mulf %225, %229 : vector<8x8xf32>
    %231 = tpu.transpose %219, [1, 0] : vector<8x8xf32> -> vector<8x8xf32>
    %cst_130 = arith.constant dense<0.000000e+00> : vector<8x8xf32>
    %232 = tpu.matmul %230, %231, %cst_130 {dimension_numbers = #tpu.dot_dimension_numbers<[1], [0], [0], [1], [0, 0, 1, 1], [], []>} : vector<8x8xf32>, vector<8x8xf32>, vector<8x8xf32> -> vector<8x8xf32>
    %233 = tpu.concatenate %166, %188, %210, %232 in 1 : vector<8x8xf32>, vector<8x8xf32>, vector<8x8xf32>, vector<8x8xf32> -> vector<8x32xf32>
    %cst_131 = arith.constant dense<0.000000e+00> : vector<8x32xf32>
    %234 = tpu.matmul %233, %6, %cst_131 {dimension_numbers = #tpu.dot_dimension_numbers<[1], [0], [0], [1], [0, 0, 1, 1], [], []>} : vector<8x32xf32>, vector<32x32xf32>, vector<8x32xf32> -> vector<8x32xf32>
    %235 = vector.broadcast %7 : vector<1x32xf32> to vector<8x32xf32>
    %236 = arith.addf %234, %235 : vector<8x32xf32>
    %237 = arith.addf %236, %140 : vector<8x32xf32>
    %cst_132 = arith.constant dense<0.000000e+00> : vector<8xf32>
    %238 = vector.multi_reduction <add>, %237, %cst_132 [1] : vector<8x32xf32> to vector<8xf32>
    %239 = vector.shape_cast %238 : vector<8xf32> to vector<8x1xf32>
    %cst_133 = arith.constant 3.200000e+01 : f32
    %240 = vector.broadcast %cst_133 : f32 to vector<8x1xf32>
    %241 = arith.divf %239, %240 : vector<8x1xf32>
    %242 = vector.broadcast %241 : vector<8x1xf32> to vector<8x32xf32>
    %243 = arith.subf %237, %242 : vector<8x32xf32>
    %244 = arith.mulf %243, %243 : vector<8x32xf32>
    %cst_134 = arith.constant dense<0.000000e+00> : vector<8xf32>
    %245 = vector.multi_reduction <add>, %244, %cst_134 [1] : vector<8x32xf32> to vector<8xf32>
    %246 = vector.shape_cast %245 : vector<8xf32> to vector<8x1xf32>
    %cst_135 = arith.constant 3.200000e+01 : f32
    %247 = vector.broadcast %cst_135 : f32 to vector<8x1xf32>
    %248 = arith.divf %246, %247 : vector<8x1xf32>
    %249 = vector.broadcast %241 : vector<8x1xf32> to vector<8x32xf32>
    %250 = arith.subf %237, %249 : vector<8x32xf32>
    %251 = vector.broadcast %14 : vector<1x32xf32> to vector<8x32xf32>
    %252 = arith.mulf %251, %250 : vector<8x32xf32>
    %cst_136 = arith.constant 9.99999996E-13 : f32
    %253 = vector.broadcast %cst_136 : f32 to vector<8x1xf32>
    %254 = arith.addf %248, %253 : vector<8x1xf32>
    %255 = math.rsqrt %254 : vector<8x1xf32>
    %256 = vector.broadcast %255 : vector<8x1xf32> to vector<8x32xf32>
    %257 = arith.mulf %252, %256 : vector<8x32xf32>
    %258 = vector.broadcast %15 : vector<1x32xf32> to vector<8x32xf32>
    %259 = arith.addf %257, %258 : vector<8x32xf32>
    %cst_137 = arith.constant dense<0.000000e+00> : vector<8x64xf32>
    %260 = tpu.matmul %259, %8, %cst_137 {dimension_numbers = #tpu.dot_dimension_numbers<[1], [0], [0], [1], [0, 0, 1, 1], [], []>} : vector<8x32xf32>, vector<32x64xf32>, vector<8x64xf32> -> vector<8x64xf32>
    %261 = vector.broadcast %9 : vector<1x64xf32> to vector<8x64xf32>
    %262 = arith.addf %260, %261 : vector<8x64xf32>
    %cst_138 = arith.constant 0.000000e+00 : f32
    %263 = vector.broadcast %cst_138 : f32 to vector<8x64xf32>
    %264 = arith.maximumf %262, %263 : vector<8x64xf32>
    %cst_139 = arith.constant dense<0.000000e+00> : vector<8x32xf32>
    %265 = tpu.matmul %264, %10, %cst_139 {dimension_numbers = #tpu.dot_dimension_numbers<[1], [0], [0], [1], [0, 0, 1, 1], [], []>} : vector<8x64xf32>, vector<64x32xf32>, vector<8x32xf32> -> vector<8x32xf32>
    %266 = vector.broadcast %11 : vector<1x32xf32> to vector<8x32xf32>
    %267 = arith.addf %265, %266 : vector<8x32xf32>
    %268 = arith.addf %267, %259 : vector<8x32xf32>
    %cst_140 = arith.constant dense<0.000000e+00> : vector<8xf32>
    %269 = vector.multi_reduction <add>, %268, %cst_140 [1] : vector<8x32xf32> to vector<8xf32>
    %270 = vector.shape_cast %269 : vector<8xf32> to vector<8x1xf32>
    %cst_141 = arith.constant 3.200000e+01 : f32
    %271 = vector.broadcast %cst_141 : f32 to vector<8x1xf32>
    %272 = arith.divf %270, %271 : vector<8x1xf32>
    %273 = vector.broadcast %272 : vector<8x1xf32> to vector<8x32xf32>
    %274 = arith.subf %268, %273 : vector<8x32xf32>
    %275 = arith.mulf %274, %274 : vector<8x32xf32>
    %cst_142 = arith.constant dense<0.000000e+00> : vector<8xf32>
    %276 = vector.multi_reduction <add>, %275, %cst_142 [1] : vector<8x32xf32> to vector<8xf32>
    %277 = vector.shape_cast %276 : vector<8xf32> to vector<8x1xf32>
    %cst_143 = arith.constant 3.200000e+01 : f32
    %278 = vector.broadcast %cst_143 : f32 to vector<8x1xf32>
    %279 = arith.divf %277, %278 : vector<8x1xf32>
    %280 = vector.broadcast %272 : vector<8x1xf32> to vector<8x32xf32>
    %281 = arith.subf %268, %280 : vector<8x32xf32>
    %282 = vector.broadcast %16 : vector<1x32xf32> to vector<8x32xf32>
    %283 = arith.mulf %282, %281 : vector<8x32xf32>
    %cst_144 = arith.constant 9.99999996E-13 : f32
    %284 = vector.broadcast %cst_144 : f32 to vector<8x1xf32>
    %285 = arith.addf %279, %284 : vector<8x1xf32>
    %286 = math.rsqrt %285 : vector<8x1xf32>
    %287 = vector.broadcast %286 : vector<8x1xf32> to vector<8x32xf32>
    %288 = arith.mulf %283, %287 : vector<8x32xf32>
    %289 = vector.broadcast %17 : vector<1x32xf32> to vector<8x32xf32>
    %290 = arith.addf %288, %289 : vector<8x32xf32>
    %c0_145 = arith.constant 0 : index
    %c0_146 = arith.constant 0 : index
    %c0_147 = arith.constant 0 : index
    %291 = vector.load %arg19[%c0_145, %c0_146, %c0_147] : memref<2x8x32xf32, #tpu.memory_space<vmem>>, vector<1x8x32xf32>
    %292 = vector.shape_cast %291 : vector<1x8x32xf32> to vector<8x32xf32>
    %293 = vector.shape_cast %290 : vector<8x32xf32> to vector<1x8x32xf32>
    tpu.vector_store %arg19[%c0_145, %c0_146, %c0_147], %293 {strides = array<i32>} : memref<2x8x32xf32, #tpu.memory_space<vmem>>, vector<1x8x32xf32>,
    %c1_148 = arith.constant 1 : index
    %c0_149 = arith.constant 0 : index
    %c0_150 = arith.constant 0 : index
    %294 = vector.load %arg0[%c1_148, %c0_149, %c0_150] : memref<2x8x32xf32, #tpu.memory_space<vmem>>, vector<1x8x32xf32>
    %295 = vector.shape_cast %294 : vector<1x8x32xf32> to vector<8x32xf32>
    %c1_151 = arith.constant 1 : index
    %c0_152 = arith.constant 0 : index
    %c0_153 = arith.constant 0 : index
    %296 = vector.load %arg1[%c1_151, %c0_152, %c0_153] : memref<2x8x32xf32, #tpu.memory_space<vmem>>, vector<1x8x32xf32>
    %297 = vector.shape_cast %296 : vector<1x8x32xf32> to vector<8x32xf32>
    %298 = tpu.transpose %295, [1, 0] : vector<8x32xf32> -> vector<32x8xf32>
    %cst_154 = arith.constant dense<0.000000e+00> : vector<64x8xf32>
    %299 = tpu.matmul %0, %298, %cst_154 {dimension_numbers = #tpu.dot_dimension_numbers<[1], [0], [0], [1], [0, 0, 1, 1], [], []>} : vector<64x32xf32>, vector<32x8xf32>, vector<64x8xf32> -> vector<64x8xf32>
    %300 = vector.broadcast %1 : vector<64x1xf32> to vector<64x8xf32>
    %301 = arith.addf %299, %300 : vector<64x8xf32>
    %c0_155 = arith.constant 0 : index
    %c0_156 = arith.constant 0 : index
    %c0_157 = arith.constant 0 : index
    %302 = vector.load %arg2[%c0_155, %c0_156, %c0_157] : memref<4x32x8xf32, #tpu.memory_space<vmem>>, vector<1x32x8xf32>
    %303 = vector.shape_cast %302 : vector<1x32x8xf32> to vector<32x8xf32>
    %cst_158 = arith.constant dense<0.000000e+00> : vector<8x8xf32>
    %304 = tpu.matmul %295, %303, %cst_158 {dimension_numbers = #tpu.dot_dimension_numbers<[1], [0], [0], [1], [0, 0, 1, 1], [], []>} : vector<8x32xf32>, vector<32x8xf32>, vector<8x8xf32> -> vector<8x8xf32>
    %c0_159 = arith.constant 0 : index
    %c0_160 = arith.constant 0 : index
    %c0_161 = arith.constant 0 : index
    %305 = vector.load %arg3[%c0_159, %c0_160, %c0_161] : memref<4x1x8xf32, #tpu.memory_space<vmem>>, vector<1x1x8xf32>
    %306 = vector.shape_cast %305 : vector<1x1x8xf32> to vector<1x8xf32>
    %307 = vector.broadcast %306 : vector<1x8xf32> to vector<8x8xf32>
    %308 = arith.addf %304, %307 : vector<8x8xf32>
    %309 = vector.extract_strided_slice %301 {offsets = [0, 0], sizes = [8, 8], strides = [1, 1]} : vector<64x8xf32> to vector<8x8xf32>
    %310 = vector.extract_strided_slice %301 {offsets = [32, 0], sizes = [8, 8], strides = [1, 1]} : vector<64x8xf32> to vector<8x8xf32>
    %cst_162 = arith.constant dense<0.000000e+00> : vector<8x8xf32>
    %311 = tpu.matmul %308, %309, %cst_162 {dimension_numbers = #tpu.dot_dimension_numbers<[1], [0], [0], [1], [0, 0, 1, 1], [], []>} : vector<8x8xf32>, vector<8x8xf32>, vector<8x8xf32> -> vector<8x8xf32>
    %cst_163 = arith.constant dense<0xFF800000> : vector<8xf32>
    %312 = vector.multi_reduction <maximumf>, %311, %cst_163 [1] : vector<8x8xf32> to vector<8xf32>
    %313 = vector.shape_cast %312 : vector<8xf32> to vector<8x1xf32>
    %314 = vector.broadcast %313 : vector<8x1xf32> to vector<8x8xf32>
    %315 = arith.subf %311, %314 : vector<8x8xf32>
    %316 = math.exp %315 : vector<8x8xf32>
    %cst_164 = arith.constant dense<0.000000e+00> : vector<8xf32>
    %317 = vector.multi_reduction <add>, %316, %cst_164 [1] : vector<8x8xf32> to vector<8xf32>
    %318 = vector.shape_cast %317 : vector<8xf32> to vector<8x1xf32>
    %319 = tpu.reciprocal %318 {approx = true} : vector<8x1xf32> -> vector<8x1xf32>
    %320 = vector.broadcast %319 : vector<8x1xf32> to vector<8x8xf32>
    %321 = arith.mulf %316, %320 : vector<8x8xf32>
    %322 = tpu.transpose %310, [1, 0] : vector<8x8xf32> -> vector<8x8xf32>
    %cst_165 = arith.constant dense<0.000000e+00> : vector<8x8xf32>
    %323 = tpu.matmul %321, %322, %cst_165 {dimension_numbers = #tpu.dot_dimension_numbers<[1], [0], [0], [1], [0, 0, 1, 1], [], []>} : vector<8x8xf32>, vector<8x8xf32>, vector<8x8xf32> -> vector<8x8xf32>
    %c1_166 = arith.constant 1 : index
    %c0_167 = arith.constant 0 : index
    %c0_168 = arith.constant 0 : index
    %324 = vector.load %arg2[%c1_166, %c0_167, %c0_168] : memref<4x32x8xf32, #tpu.memory_space<vmem>>, vector<1x32x8xf32>
    %325 = vector.shape_cast %324 : vector<1x32x8xf32> to vector<32x8xf32>
    %cst_169 = arith.constant dense<0.000000e+00> : vector<8x8xf32>
    %326 = tpu.matmul %295, %325, %cst_169 {dimension_numbers = #tpu.dot_dimension_numbers<[1], [0], [0], [1], [0, 0, 1, 1], [], []>} : vector<8x32xf32>, vector<32x8xf32>, vector<8x8xf32> -> vector<8x8xf32>
    %c1_170 = arith.constant 1 : index
    %c0_171 = arith.constant 0 : index
    %c0_172 = arith.constant 0 : index
    %327 = vector.load %arg3[%c1_170, %c0_171, %c0_172] : memref<4x1x8xf32, #tpu.memory_space<vmem>>, vector<1x1x8xf32>
    %328 = vector.shape_cast %327 : vector<1x1x8xf32> to vector<1x8xf32>
    %329 = vector.broadcast %328 : vector<1x8xf32> to vector<8x8xf32>
    %330 = arith.addf %326, %329 : vector<8x8xf32>
    %331 = vector.extract_strided_slice %301 {offsets = [8, 0], sizes = [8, 8], strides = [1, 1]} : vector<64x8xf32> to vector<8x8xf32>
    %332 = vector.extract_strided_slice %301 {offsets = [40, 0], sizes = [8, 8], strides = [1, 1]} : vector<64x8xf32> to vector<8x8xf32>
    %cst_173 = arith.constant dense<0.000000e+00> : vector<8x8xf32>
    %333 = tpu.matmul %330, %331, %cst_173 {dimension_numbers = #tpu.dot_dimension_numbers<[1], [0], [0], [1], [0, 0, 1, 1], [], []>} : vector<8x8xf32>, vector<8x8xf32>, vector<8x8xf32> -> vector<8x8xf32>
    %cst_174 = arith.constant dense<0xFF800000> : vector<8xf32>
    %334 = vector.multi_reduction <maximumf>, %333, %cst_174 [1] : vector<8x8xf32> to vector<8xf32>
    %335 = vector.shape_cast %334 : vector<8xf32> to vector<8x1xf32>
    %336 = vector.broadcast %335 : vector<8x1xf32> to vector<8x8xf32>
    %337 = arith.subf %333, %336 : vector<8x8xf32>
    %338 = math.exp %337 : vector<8x8xf32>
    %cst_175 = arith.constant dense<0.000000e+00> : vector<8xf32>
    %339 = vector.multi_reduction <add>, %338, %cst_175 [1] : vector<8x8xf32> to vector<8xf32>
    %340 = vector.shape_cast %339 : vector<8xf32> to vector<8x1xf32>
    %341 = tpu.reciprocal %340 {approx = true} : vector<8x1xf32> -> vector<8x1xf32>
    %342 = vector.broadcast %341 : vector<8x1xf32> to vector<8x8xf32>
    %343 = arith.mulf %338, %342 : vector<8x8xf32>
    %344 = tpu.transpose %332, [1, 0] : vector<8x8xf32> -> vector<8x8xf32>
    %cst_176 = arith.constant dense<0.000000e+00> : vector<8x8xf32>
    %345 = tpu.matmul %343, %344, %cst_176 {dimension_numbers = #tpu.dot_dimension_numbers<[1], [0], [0], [1], [0, 0, 1, 1], [], []>} : vector<8x8xf32>, vector<8x8xf32>, vector<8x8xf32> -> vector<8x8xf32>
    %c2_177 = arith.constant 2 : index
    %c0_178 = arith.constant 0 : index
    %c0_179 = arith.constant 0 : index
    %346 = vector.load %arg2[%c2_177, %c0_178, %c0_179] : memref<4x32x8xf32, #tpu.memory_space<vmem>>, vector<1x32x8xf32>
    %347 = vector.shape_cast %346 : vector<1x32x8xf32> to vector<32x8xf32>
    %cst_180 = arith.constant dense<0.000000e+00> : vector<8x8xf32>
    %348 = tpu.matmul %295, %347, %cst_180 {dimension_numbers = #tpu.dot_dimension_numbers<[1], [0], [0], [1], [0, 0, 1, 1], [], []>} : vector<8x32xf32>, vector<32x8xf32>, vector<8x8xf32> -> vector<8x8xf32>
    %c2_181 = arith.constant 2 : index
    %c0_182 = arith.constant 0 : index
    %c0_183 = arith.constant 0 : index
    %349 = vector.load %arg3[%c2_181, %c0_182, %c0_183] : memref<4x1x8xf32, #tpu.memory_space<vmem>>, vector<1x1x8xf32>
    %350 = vector.shape_cast %349 : vector<1x1x8xf32> to vector<1x8xf32>
    %351 = vector.broadcast %350 : vector<1x8xf32> to vector<8x8xf32>
    %352 = arith.addf %348, %351 : vector<8x8xf32>
    %353 = vector.extract_strided_slice %301 {offsets = [16, 0], sizes = [8, 8], strides = [1, 1]} : vector<64x8xf32> to vector<8x8xf32>
    %354 = vector.extract_strided_slice %301 {offsets = [48, 0], sizes = [8, 8], strides = [1, 1]} : vector<64x8xf32> to vector<8x8xf32>
    %cst_184 = arith.constant dense<0.000000e+00> : vector<8x8xf32>
    %355 = tpu.matmul %352, %353, %cst_184 {dimension_numbers = #tpu.dot_dimension_numbers<[1], [0], [0], [1], [0, 0, 1, 1], [], []>} : vector<8x8xf32>, vector<8x8xf32>, vector<8x8xf32> -> vector<8x8xf32>
    %cst_185 = arith.constant dense<0xFF800000> : vector<8xf32>
    %356 = vector.multi_reduction <maximumf>, %355, %cst_185 [1] : vector<8x8xf32> to vector<8xf32>
    %357 = vector.shape_cast %356 : vector<8xf32> to vector<8x1xf32>
    %358 = vector.broadcast %357 : vector<8x1xf32> to vector<8x8xf32>
    %359 = arith.subf %355, %358 : vector<8x8xf32>
    %360 = math.exp %359 : vector<8x8xf32>
    %cst_186 = arith.constant dense<0.000000e+00> : vector<8xf32>
    %361 = vector.multi_reduction <add>, %360, %cst_186 [1] : vector<8x8xf32> to vector<8xf32>
    %362 = vector.shape_cast %361 : vector<8xf32> to vector<8x1xf32>
    %363 = tpu.reciprocal %362 {approx = true} : vector<8x1xf32> -> vector<8x1xf32>
    %364 = vector.broadcast %363 : vector<8x1xf32> to vector<8x8xf32>
    %365 = arith.mulf %360, %364 : vector<8x8xf32>
    %366 = tpu.transpose %354, [1, 0] : vector<8x8xf32> -> vector<8x8xf32>
    %cst_187 = arith.constant dense<0.000000e+00> : vector<8x8xf32>
    %367 = tpu.matmul %365, %366, %cst_187 {dimension_numbers = #tpu.dot_dimension_numbers<[1], [0], [0], [1], [0, 0, 1, 1], [], []>} : vector<8x8xf32>, vector<8x8xf32>, vector<8x8xf32> -> vector<8x8xf32>
    %c3_188 = arith.constant 3 : index
    %c0_189 = arith.constant 0 : index
    %c0_190 = arith.constant 0 : index
    %368 = vector.load %arg2[%c3_188, %c0_189, %c0_190] : memref<4x32x8xf32, #tpu.memory_space<vmem>>, vector<1x32x8xf32>
    %369 = vector.shape_cast %368 : vector<1x32x8xf32> to vector<32x8xf32>
    %cst_191 = arith.constant dense<0.000000e+00> : vector<8x8xf32>
    %370 = tpu.matmul %295, %369, %cst_191 {dimension_numbers = #tpu.dot_dimension_numbers<[1], [0], [0], [1], [0, 0, 1, 1], [], []>} : vector<8x32xf32>, vector<32x8xf32>, vector<8x8xf32> -> vector<8x8xf32>
    %c3_192 = arith.constant 3 : index
    %c0_193 = arith.constant 0 : index
    %c0_194 = arith.constant 0 : index
    %371 = vector.load %arg3[%c3_192, %c0_193, %c0_194] : memref<4x1x8xf32, #tpu.memory_space<vmem>>, vector<1x1x8xf32>
    %372 = vector.shape_cast %371 : vector<1x1x8xf32> to vector<1x8xf32>
    %373 = vector.broadcast %372 : vector<1x8xf32> to vector<8x8xf32>
    %374 = arith.addf %370, %373 : vector<8x8xf32>
    %375 = vector.extract_strided_slice %301 {offsets = [24, 0], sizes = [8, 8], strides = [1, 1]} : vector<64x8xf32> to vector<8x8xf32>
    %376 = vector.extract_strided_slice %301 {offsets = [56, 0], sizes = [8, 8], strides = [1, 1]} : vector<64x8xf32> to vector<8x8xf32>
    %cst_195 = arith.constant dense<0.000000e+00> : vector<8x8xf32>
    %377 = tpu.matmul %374, %375, %cst_195 {dimension_numbers = #tpu.dot_dimension_numbers<[1], [0], [0], [1], [0, 0, 1, 1], [], []>} : vector<8x8xf32>, vector<8x8xf32>, vector<8x8xf32> -> vector<8x8xf32>
    %cst_196 = arith.constant dense<0xFF800000> : vector<8xf32>
    %378 = vector.multi_reduction <maximumf>, %377, %cst_196 [1] : vector<8x8xf32> to vector<8xf32>
    %379 = vector.shape_cast %378 : vector<8xf32> to vector<8x1xf32>
    %380 = vector.broadcast %379 : vector<8x1xf32> to vector<8x8xf32>
    %381 = arith.subf %377, %380 : vector<8x8xf32>
    %382 = math.exp %381 : vector<8x8xf32>
    %cst_197 = arith.constant dense<0.000000e+00> : vector<8xf32>
    %383 = vector.multi_reduction <add>, %382, %cst_197 [1] : vector<8x8xf32> to vector<8xf32>
    %384 = vector.shape_cast %383 : vector<8xf32> to vector<8x1xf32>
    %385 = tpu.reciprocal %384 {approx = true} : vector<8x1xf32> -> vector<8x1xf32>
    %386 = vector.broadcast %385 : vector<8x1xf32> to vector<8x8xf32>
    %387 = arith.mulf %382, %386 : vector<8x8xf32>
    %388 = tpu.transpose %376, [1, 0] : vector<8x8xf32> -> vector<8x8xf32>
    %cst_198 = arith.constant dense<0.000000e+00> : vector<8x8xf32>
    %389 = tpu.matmul %387, %388, %cst_198 {dimension_numbers = #tpu.dot_dimension_numbers<[1], [0], [0], [1], [0, 0, 1, 1], [], []>} : vector<8x8xf32>, vector<8x8xf32>, vector<8x8xf32> -> vector<8x8xf32>
    %390 = tpu.concatenate %323, %345, %367, %389 in 1 : vector<8x8xf32>, vector<8x8xf32>, vector<8x8xf32>, vector<8x8xf32> -> vector<8x32xf32>
    %cst_199 = arith.constant dense<0.000000e+00> : vector<8x32xf32>
    %391 = tpu.matmul %390, %2, %cst_199 {dimension_numbers = #tpu.dot_dimension_numbers<[1], [0], [0], [1], [0, 0, 1, 1], [], []>} : vector<8x32xf32>, vector<32x32xf32>, vector<8x32xf32> -> vector<8x32xf32>
    %392 = vector.broadcast %3 : vector<1x32xf32> to vector<8x32xf32>
    %393 = arith.addf %391, %392 : vector<8x32xf32>
    %394 = arith.addf %393, %295 : vector<8x32xf32>
    %cst_200 = arith.constant dense<0.000000e+00> : vector<8xf32>
    %395 = vector.multi_reduction <add>, %394, %cst_200 [1] : vector<8x32xf32> to vector<8xf32>
    %396 = vector.shape_cast %395 : vector<8xf32> to vector<8x1xf32>
    %cst_201 = arith.constant 3.200000e+01 : f32
    %397 = vector.broadcast %cst_201 : f32 to vector<8x1xf32>
    %398 = arith.divf %396, %397 : vector<8x1xf32>
    %399 = vector.broadcast %398 : vector<8x1xf32> to vector<8x32xf32>
    %400 = arith.subf %394, %399 : vector<8x32xf32>
    %401 = arith.mulf %400, %400 : vector<8x32xf32>
    %cst_202 = arith.constant dense<0.000000e+00> : vector<8xf32>
    %402 = vector.multi_reduction <add>, %401, %cst_202 [1] : vector<8x32xf32> to vector<8xf32>
    %403 = vector.shape_cast %402 : vector<8xf32> to vector<8x1xf32>
    %cst_203 = arith.constant 3.200000e+01 : f32
    %404 = vector.broadcast %cst_203 : f32 to vector<8x1xf32>
    %405 = arith.divf %403, %404 : vector<8x1xf32>
    %406 = vector.broadcast %398 : vector<8x1xf32> to vector<8x32xf32>
    %407 = arith.subf %394, %406 : vector<8x32xf32>
    %408 = vector.broadcast %12 : vector<1x32xf32> to vector<8x32xf32>
    %409 = arith.mulf %408, %407 : vector<8x32xf32>
    %cst_204 = arith.constant 9.99999996E-13 : f32
    %410 = vector.broadcast %cst_204 : f32 to vector<8x1xf32>
    %411 = arith.addf %405, %410 : vector<8x1xf32>
    %412 = math.rsqrt %411 : vector<8x1xf32>
    %413 = vector.broadcast %412 : vector<8x1xf32> to vector<8x32xf32>
    %414 = arith.mulf %409, %413 : vector<8x32xf32>
    %415 = vector.broadcast %13 : vector<1x32xf32> to vector<8x32xf32>
    %416 = arith.addf %414, %415 : vector<8x32xf32>
    %417 = tpu.transpose %297, [1, 0] : vector<8x32xf32> -> vector<32x8xf32>
    %cst_205 = arith.constant dense<0.000000e+00> : vector<64x8xf32>
    %418 = tpu.matmul %4, %417, %cst_205 {dimension_numbers = #tpu.dot_dimension_numbers<[1], [0], [0], [1], [0, 0, 1, 1], [], []>} : vector<64x32xf32>, vector<32x8xf32>, vector<64x8xf32> -> vector<64x8xf32>
    %419 = vector.broadcast %5 : vector<64x1xf32> to vector<64x8xf32>
    %420 = arith.addf %418, %419 : vector<64x8xf32>
    %c0_206 = arith.constant 0 : index
    %c0_207 = arith.constant 0 : index
    %c0_208 = arith.constant 0 : index
    %421 = vector.load %arg8[%c0_206, %c0_207, %c0_208] : memref<4x32x8xf32, #tpu.memory_space<vmem>>, vector<1x32x8xf32>
    %422 = vector.shape_cast %421 : vector<1x32x8xf32> to vector<32x8xf32>
    %cst_209 = arith.constant dense<0.000000e+00> : vector<8x8xf32>
    %423 = tpu.matmul %416, %422, %cst_209 {dimension_numbers = #tpu.dot_dimension_numbers<[1], [0], [0], [1], [0, 0, 1, 1], [], []>} : vector<8x32xf32>, vector<32x8xf32>, vector<8x8xf32> -> vector<8x8xf32>
    %c0_210 = arith.constant 0 : index
    %c0_211 = arith.constant 0 : index
    %c0_212 = arith.constant 0 : index
    %424 = vector.load %arg9[%c0_210, %c0_211, %c0_212] : memref<4x1x8xf32, #tpu.memory_space<vmem>>, vector<1x1x8xf32>
    %425 = vector.shape_cast %424 : vector<1x1x8xf32> to vector<1x8xf32>
    %426 = vector.broadcast %425 : vector<1x8xf32> to vector<8x8xf32>
    %427 = arith.addf %423, %426 : vector<8x8xf32>
    %428 = vector.extract_strided_slice %420 {offsets = [0, 0], sizes = [8, 8], strides = [1, 1]} : vector<64x8xf32> to vector<8x8xf32>
    %429 = vector.extract_strided_slice %420 {offsets = [32, 0], sizes = [8, 8], strides = [1, 1]} : vector<64x8xf32> to vector<8x8xf32>
    %cst_213 = arith.constant dense<0.000000e+00> : vector<8x8xf32>
    %430 = tpu.matmul %427, %428, %cst_213 {dimension_numbers = #tpu.dot_dimension_numbers<[1], [0], [0], [1], [0, 0, 1, 1], [], []>} : vector<8x8xf32>, vector<8x8xf32>, vector<8x8xf32> -> vector<8x8xf32>
    %cst_214 = arith.constant dense<0xFF800000> : vector<8xf32>
    %431 = vector.multi_reduction <maximumf>, %430, %cst_214 [1] : vector<8x8xf32> to vector<8xf32>
    %432 = vector.shape_cast %431 : vector<8xf32> to vector<8x1xf32>
    %433 = vector.broadcast %432 : vector<8x1xf32> to vector<8x8xf32>
    %434 = arith.subf %430, %433 : vector<8x8xf32>
    %435 = math.exp %434 : vector<8x8xf32>
    %cst_215 = arith.constant dense<0.000000e+00> : vector<8xf32>
    %436 = vector.multi_reduction <add>, %435, %cst_215 [1] : vector<8x8xf32> to vector<8xf32>
    %437 = vector.shape_cast %436 : vector<8xf32> to vector<8x1xf32>
    %438 = tpu.reciprocal %437 {approx = true} : vector<8x1xf32> -> vector<8x1xf32>
    %439 = vector.broadcast %438 : vector<8x1xf32> to vector<8x8xf32>
    %440 = arith.mulf %435, %439 : vector<8x8xf32>
    %441 = tpu.transpose %429, [1, 0] : vector<8x8xf32> -> vector<8x8xf32>
    %cst_216 = arith.constant dense<0.000000e+00> : vector<8x8xf32>
    %442 = tpu.matmul %440, %441, %cst_216 {dimension_numbers = #tpu.dot_dimension_numbers<[1], [0], [0], [1], [0, 0, 1, 1], [], []>} : vector<8x8xf32>, vector<8x8xf32>, vector<8x8xf32> -> vector<8x8xf32>
    %c1_217 = arith.constant 1 : index
    %c0_218 = arith.constant 0 : index
    %c0_219 = arith.constant 0 : index
    %443 = vector.load %arg8[%c1_217, %c0_218, %c0_219] : memref<4x32x8xf32, #tpu.memory_space<vmem>>, vector<1x32x8xf32>
    %444 = vector.shape_cast %443 : vector<1x32x8xf32> to vector<32x8xf32>
    %cst_220 = arith.constant dense<0.000000e+00> : vector<8x8xf32>
    %445 = tpu.matmul %416, %444, %cst_220 {dimension_numbers = #tpu.dot_dimension_numbers<[1], [0], [0], [1], [0, 0, 1, 1], [], []>} : vector<8x32xf32>, vector<32x8xf32>, vector<8x8xf32> -> vector<8x8xf32>
    %c1_221 = arith.constant 1 : index
    %c0_222 = arith.constant 0 : index
    %c0_223 = arith.constant 0 : index
    %446 = vector.load %arg9[%c1_221, %c0_222, %c0_223] : memref<4x1x8xf32, #tpu.memory_space<vmem>>, vector<1x1x8xf32>
    %447 = vector.shape_cast %446 : vector<1x1x8xf32> to vector<1x8xf32>
    %448 = vector.broadcast %447 : vector<1x8xf32> to vector<8x8xf32>
    %449 = arith.addf %445, %448 : vector<8x8xf32>
    %450 = vector.extract_strided_slice %420 {offsets = [8, 0], sizes = [8, 8], strides = [1, 1]} : vector<64x8xf32> to vector<8x8xf32>
    %451 = vector.extract_strided_slice %420 {offsets = [40, 0], sizes = [8, 8], strides = [1, 1]} : vector<64x8xf32> to vector<8x8xf32>
    %cst_224 = arith.constant dense<0.000000e+00> : vector<8x8xf32>
    %452 = tpu.matmul %449, %450, %cst_224 {dimension_numbers = #tpu.dot_dimension_numbers<[1], [0], [0], [1], [0, 0, 1, 1], [], []>} : vector<8x8xf32>, vector<8x8xf32>, vector<8x8xf32> -> vector<8x8xf32>
    %cst_225 = arith.constant dense<0xFF800000> : vector<8xf32>
    %453 = vector.multi_reduction <maximumf>, %452, %cst_225 [1] : vector<8x8xf32> to vector<8xf32>
    %454 = vector.shape_cast %453 : vector<8xf32> to vector<8x1xf32>
    %455 = vector.broadcast %454 : vector<8x1xf32> to vector<8x8xf32>
    %456 = arith.subf %452, %455 : vector<8x8xf32>
    %457 = math.exp %456 : vector<8x8xf32>
    %cst_226 = arith.constant dense<0.000000e+00> : vector<8xf32>
    %458 = vector.multi_reduction <add>, %457, %cst_226 [1] : vector<8x8xf32> to vector<8xf32>
    %459 = vector.shape_cast %458 : vector<8xf32> to vector<8x1xf32>
    %460 = tpu.reciprocal %459 {approx = true} : vector<8x1xf32> -> vector<8x1xf32>
    %461 = vector.broadcast %460 : vector<8x1xf32> to vector<8x8xf32>
    %462 = arith.mulf %457, %461 : vector<8x8xf32>
    %463 = tpu.transpose %451, [1, 0] : vector<8x8xf32> -> vector<8x8xf32>
    %cst_227 = arith.constant dense<0.000000e+00> : vector<8x8xf32>
    %464 = tpu.matmul %462, %463, %cst_227 {dimension_numbers = #tpu.dot_dimension_numbers<[1], [0], [0], [1], [0, 0, 1, 1], [], []>} : vector<8x8xf32>, vector<8x8xf32>, vector<8x8xf32> -> vector<8x8xf32>
    %c2_228 = arith.constant 2 : index
    %c0_229 = arith.constant 0 : index
    %c0_230 = arith.constant 0 : index
    %465 = vector.load %arg8[%c2_228, %c0_229, %c0_230] : memref<4x32x8xf32, #tpu.memory_space<vmem>>, vector<1x32x8xf32>
    %466 = vector.shape_cast %465 : vector<1x32x8xf32> to vector<32x8xf32>
    %cst_231 = arith.constant dense<0.000000e+00> : vector<8x8xf32>
    %467 = tpu.matmul %416, %466, %cst_231 {dimension_numbers = #tpu.dot_dimension_numbers<[1], [0], [0], [1], [0, 0, 1, 1], [], []>} : vector<8x32xf32>, vector<32x8xf32>, vector<8x8xf32> -> vector<8x8xf32>
    %c2_232 = arith.constant 2 : index
    %c0_233 = arith.constant 0 : index
    %c0_234 = arith.constant 0 : index
    %468 = vector.load %arg9[%c2_232, %c0_233, %c0_234] : memref<4x1x8xf32, #tpu.memory_space<vmem>>, vector<1x1x8xf32>
    %469 = vector.shape_cast %468 : vector<1x1x8xf32> to vector<1x8xf32>
    %470 = vector.broadcast %469 : vector<1x8xf32> to vector<8x8xf32>
    %471 = arith.addf %467, %470 : vector<8x8xf32>
    %472 = vector.extract_strided_slice %420 {offsets = [16, 0], sizes = [8, 8], strides = [1, 1]} : vector<64x8xf32> to vector<8x8xf32>
    %473 = vector.extract_strided_slice %420 {offsets = [48, 0], sizes = [8, 8], strides = [1, 1]} : vector<64x8xf32> to vector<8x8xf32>
    %cst_235 = arith.constant dense<0.000000e+00> : vector<8x8xf32>
    %474 = tpu.matmul %471, %472, %cst_235 {dimension_numbers = #tpu.dot_dimension_numbers<[1], [0], [0], [1], [0, 0, 1, 1], [], []>} : vector<8x8xf32>, vector<8x8xf32>, vector<8x8xf32> -> vector<8x8xf32>
    %cst_236 = arith.constant dense<0xFF800000> : vector<8xf32>
    %475 = vector.multi_reduction <maximumf>, %474, %cst_236 [1] : vector<8x8xf32> to vector<8xf32>
    %476 = vector.shape_cast %475 : vector<8xf32> to vector<8x1xf32>
    %477 = vector.broadcast %476 : vector<8x1xf32> to vector<8x8xf32>
    %478 = arith.subf %474, %477 : vector<8x8xf32>
    %479 = math.exp %478 : vector<8x8xf32>
    %cst_237 = arith.constant dense<0.000000e+00> : vector<8xf32>
    %480 = vector.multi_reduction <add>, %479, %cst_237 [1] : vector<8x8xf32> to vector<8xf32>
    %481 = vector.shape_cast %480 : vector<8xf32> to vector<8x1xf32>
    %482 = tpu.reciprocal %481 {approx = true} : vector<8x1xf32> -> vector<8x1xf32>
    %483 = vector.broadcast %482 : vector<8x1xf32> to vector<8x8xf32>
    %484 = arith.mulf %479, %483 : vector<8x8xf32>
    %485 = tpu.transpose %473, [1, 0] : vector<8x8xf32> -> vector<8x8xf32>
    %cst_238 = arith.constant dense<0.000000e+00> : vector<8x8xf32>
    %486 = tpu.matmul %484, %485, %cst_238 {dimension_numbers = #tpu.dot_dimension_numbers<[1], [0], [0], [1], [0, 0, 1, 1], [], []>} : vector<8x8xf32>, vector<8x8xf32>, vector<8x8xf32> -> vector<8x8xf32>
    %c3_239 = arith.constant 3 : index
    %c0_240 = arith.constant 0 : index
    %c0_241 = arith.constant 0 : index
    %487 = vector.load %arg8[%c3_239, %c0_240, %c0_241] : memref<4x32x8xf32, #tpu.memory_space<vmem>>, vector<1x32x8xf32>
    %488 = vector.shape_cast %487 : vector<1x32x8xf32> to vector<32x8xf32>
    %cst_242 = arith.constant dense<0.000000e+00> : vector<8x8xf32>
    %489 = tpu.matmul %416, %488, %cst_242 {dimension_numbers = #tpu.dot_dimension_numbers<[1], [0], [0], [1], [0, 0, 1, 1], [], []>} : vector<8x32xf32>, vector<32x8xf32>, vector<8x8xf32> -> vector<8x8xf32>
    %c3_243 = arith.constant 3 : index
    %c0_244 = arith.constant 0 : index
    %c0_245 = arith.constant 0 : index
    %490 = vector.load %arg9[%c3_243, %c0_244, %c0_245] : memref<4x1x8xf32, #tpu.memory_space<vmem>>, vector<1x1x8xf32>
    %491 = vector.shape_cast %490 : vector<1x1x8xf32> to vector<1x8xf32>
    %492 = vector.broadcast %491 : vector<1x8xf32> to vector<8x8xf32>
    %493 = arith.addf %489, %492 : vector<8x8xf32>
    %494 = vector.extract_strided_slice %420 {offsets = [24, 0], sizes = [8, 8], strides = [1, 1]} : vector<64x8xf32> to vector<8x8xf32>
    %495 = vector.extract_strided_slice %420 {offsets = [56, 0], sizes = [8, 8], strides = [1, 1]} : vector<64x8xf32> to vector<8x8xf32>
    %cst_246 = arith.constant dense<0.000000e+00> : vector<8x8xf32>
    %496 = tpu.matmul %493, %494, %cst_246 {dimension_numbers = #tpu.dot_dimension_numbers<[1], [0], [0], [1], [0, 0, 1, 1], [], []>} : vector<8x8xf32>, vector<8x8xf32>, vector<8x8xf32> -> vector<8x8xf32>
    %cst_247 = arith.constant dense<0xFF800000> : vector<8xf32>
    %497 = vector.multi_reduction <maximumf>, %496, %cst_247 [1] : vector<8x8xf32> to vector<8xf32>
    %498 = vector.shape_cast %497 : vector<8xf32> to vector<8x1xf32>
    %499 = vector.broadcast %498 : vector<8x1xf32> to vector<8x8xf32>
    %500 = arith.subf %496, %499 : vector<8x8xf32>
    %501 = math.exp %500 : vector<8x8xf32>
    %cst_248 = arith.constant dense<0.000000e+00> : vector<8xf32>
    %502 = vector.multi_reduction <add>, %501, %cst_248 [1] : vector<8x8xf32> to vector<8xf32>
    %503 = vector.shape_cast %502 : vector<8xf32> to vector<8x1xf32>
    %504 = tpu.reciprocal %503 {approx = true} : vector<8x1xf32> -> vector<8x1xf32>
    %505 = vector.broadcast %504 : vector<8x1xf32> to vector<8x8xf32>
    %506 = arith.mulf %501, %505 : vector<8x8xf32>
    %507 = tpu.transpose %495, [1, 0] : vector<8x8xf32> -> vector<8x8xf32>
    %cst_249 = arith.constant dense<0.000000e+00> : vector<8x8xf32>
    %508 = tpu.matmul %506, %507, %cst_249 {dimension_numbers = #tpu.dot_dimension_numbers<[1], [0], [0], [1], [0, 0, 1, 1], [], []>} : vector<8x8xf32>, vector<8x8xf32>, vector<8x8xf32> -> vector<8x8xf32>
    %509 = tpu.concatenate %442, %464, %486, %508 in 1 : vector<8x8xf32>, vector<8x8xf32>, vector<8x8xf32>, vector<8x8xf32> -> vector<8x32xf32>
    %cst_250 = arith.constant dense<0.000000e+00> : vector<8x32xf32>
    %510 = tpu.matmul %509, %6, %cst_250 {dimension_numbers = #tpu.dot_dimension_numbers<[1], [0], [0], [1], [0, 0, 1, 1], [], []>} : vector<8x32xf32>, vector<32x32xf32>, vector<8x32xf32> -> vector<8x32xf32>
    %511 = vector.broadcast %7 : vector<1x32xf32> to vector<8x32xf32>
    %512 = arith.addf %510, %511 : vector<8x32xf32>
    %513 = arith.addf %512, %416 : vector<8x32xf32>
    %cst_251 = arith.constant dense<0.000000e+00> : vector<8xf32>
    %514 = vector.multi_reduction <add>, %513, %cst_251 [1] : vector<8x32xf32> to vector<8xf32>
    %515 = vector.shape_cast %514 : vector<8xf32> to vector<8x1xf32>
    %cst_252 = arith.constant 3.200000e+01 : f32
    %516 = vector.broadcast %cst_252 : f32 to vector<8x1xf32>
    %517 = arith.divf %515, %516 : vector<8x1xf32>
    %518 = vector.broadcast %517 : vector<8x1xf32> to vector<8x32xf32>
    %519 = arith.subf %513, %518 : vector<8x32xf32>
    %520 = arith.mulf %519, %519 : vector<8x32xf32>
    %cst_253 = arith.constant dense<0.000000e+00> : vector<8xf32>
    %521 = vector.multi_reduction <add>, %520, %cst_253 [1] : vector<8x32xf32> to vector<8xf32>
    %522 = vector.shape_cast %521 : vector<8xf32> to vector<8x1xf32>
    %cst_254 = arith.constant 3.200000e+01 : f32
    %523 = vector.broadcast %cst_254 : f32 to vector<8x1xf32>
    %524 = arith.divf %522, %523 : vector<8x1xf32>
    %525 = vector.broadcast %517 : vector<8x1xf32> to vector<8x32xf32>
    %526 = arith.subf %513, %525 : vector<8x32xf32>
    %527 = vector.broadcast %14 : vector<1x32xf32> to vector<8x32xf32>
    %528 = arith.mulf %527, %526 : vector<8x32xf32>
    %cst_255 = arith.constant 9.99999996E-13 : f32
    %529 = vector.broadcast %cst_255 : f32 to vector<8x1xf32>
    %530 = arith.addf %524, %529 : vector<8x1xf32>
    %531 = math.rsqrt %530 : vector<8x1xf32>
    %532 = vector.broadcast %531 : vector<8x1xf32> to vector<8x32xf32>
    %533 = arith.mulf %528, %532 : vector<8x32xf32>
    %534 = vector.broadcast %15 : vector<1x32xf32> to vector<8x32xf32>
    %535 = arith.addf %533, %534 : vector<8x32xf32>
    %cst_256 = arith.constant dense<0.000000e+00> : vector<8x64xf32>
    %536 = tpu.matmul %535, %8, %cst_256 {dimension_numbers = #tpu.dot_dimension_numbers<[1], [0], [0], [1], [0, 0, 1, 1], [], []>} : vector<8x32xf32>, vector<32x64xf32>, vector<8x64xf32> -> vector<8x64xf32>
    %537 = vector.broadcast %9 : vector<1x64xf32> to vector<8x64xf32>
    %538 = arith.addf %536, %537 : vector<8x64xf32>
    %cst_257 = arith.constant 0.000000e+00 : f32
    %539 = vector.broadcast %cst_257 : f32 to vector<8x64xf32>
    %540 = arith.maximumf %538, %539 : vector<8x64xf32>
    %cst_258 = arith.constant dense<0.000000e+00> : vector<8x32xf32>
    %541 = tpu.matmul %540, %10, %cst_258 {dimension_numbers = #tpu.dot_dimension_numbers<[1], [0], [0], [1], [0, 0, 1, 1], [], []>} : vector<8x64xf32>, vector<64x32xf32>, vector<8x32xf32> -> vector<8x32xf32>
    %542 = vector.broadcast %11 : vector<1x32xf32> to vector<8x32xf32>
    %543 = arith.addf %541, %542 : vector<8x32xf32>
    %544 = arith.addf %543, %535 : vector<8x32xf32>
    %cst_259 = arith.constant dense<0.000000e+00> : vector<8xf32>
    %545 = vector.multi_reduction <add>, %544, %cst_259 [1] : vector<8x32xf32> to vector<8xf32>
    %546 = vector.shape_cast %545 : vector<8xf32> to vector<8x1xf32>
    %cst_260 = arith.constant 3.200000e+01 : f32
    %547 = vector.broadcast %cst_260 : f32 to vector<8x1xf32>
    %548 = arith.divf %546, %547 : vector<8x1xf32>
    %549 = vector.broadcast %548 : vector<8x1xf32> to vector<8x32xf32>
    %550 = arith.subf %544, %549 : vector<8x32xf32>
    %551 = arith.mulf %550, %550 : vector<8x32xf32>
    %cst_261 = arith.constant dense<0.000000e+00> : vector<8xf32>
    %552 = vector.multi_reduction <add>, %551, %cst_261 [1] : vector<8x32xf32> to vector<8xf32>
    %553 = vector.shape_cast %552 : vector<8xf32> to vector<8x1xf32>
    %cst_262 = arith.constant 3.200000e+01 : f32
    %554 = vector.broadcast %cst_262 : f32 to vector<8x1xf32>
    %555 = arith.divf %553, %554 : vector<8x1xf32>
    %556 = vector.broadcast %548 : vector<8x1xf32> to vector<8x32xf32>
    %557 = arith.subf %544, %556 : vector<8x32xf32>
    %558 = vector.broadcast %16 : vector<1x32xf32> to vector<8x32xf32>
    %559 = arith.mulf %558, %557 : vector<8x32xf32>
    %cst_263 = arith.constant 9.99999996E-13 : f32
    %560 = vector.broadcast %cst_263 : f32 to vector<8x1xf32>
    %561 = arith.addf %555, %560 : vector<8x1xf32>
    %562 = math.rsqrt %561 : vector<8x1xf32>
    %563 = vector.broadcast %562 : vector<8x1xf32> to vector<8x32xf32>
    %564 = arith.mulf %559, %563 : vector<8x32xf32>
    %565 = vector.broadcast %17 : vector<1x32xf32> to vector<8x32xf32>
    %566 = arith.addf %564, %565 : vector<8x32xf32>
    %c1_264 = arith.constant 1 : index
    %c0_265 = arith.constant 0 : index
    %c0_266 = arith.constant 0 : index
    %567 = vector.load %arg19[%c1_264, %c0_265, %c0_266] : memref<2x8x32xf32, #tpu.memory_space<vmem>>, vector<1x8x32xf32>
    %568 = vector.shape_cast %567 : vector<1x8x32xf32> to vector<8x32xf32>
    %569 = vector.shape_cast %566 : vector<8x32xf32> to vector<1x8x32xf32>
    tpu.vector_store %arg19[%c1_264, %c0_265, %c0_266], %569 {strides = array<i32>} : memref<2x8x32xf32, #tpu.memory_space<vmem>>, vector<1x8x32xf32>,
    return
  }
}

</mosaic_0001>

<bundles_post_ra>
// kernel: tpu_custom_call.1
= control target key start
LH: loop header
LB: loop body
LE: loop exit
PB: predicated region body
PF: predicated region fallthrough
CT: control target
= control target key end

     0   :  { %s7741_s0 = inlined_call_operand.vmem [shape: f32[2,8,32], index: 0, kind: input, shape index: {}]   ;;  %s7742_s1 = inlined_call_operand.vmem [shape: f32[2,8,32], index: 1, kind: input, shape index: {}]   ;;  %s7743_s2 = inlined_call_operand.vmem [shape: f32[4,32,8], index: 2, kind: input, shape index: {}]   ;;  %s7744_s3 = inlined_call_operand.vmem [shape: f32[4,1,8], index: 3, kind: input, shape index: {}]   ;;  %s7745_s4 = inlined_call_operand.vmem [shape: f32[64,32], index: 4, kind: input, shape index: {}]   ;;  %s7746_s5 = inlined_call_operand.vmem [shape: f32[64,1], index: 5, kind: input, shape index: {}]   ;;  %s7747_s6 = inlined_call_operand.vmem [shape: f32[32,32], index: 6, kind: input, shape index: {}]   ;;  %s7748_s7 = inlined_call_operand.vmem [shape: f32[1,32], index: 7, kind: input, shape index: {}]   ;;  %s7749_s8 = inlined_call_operand.vmem [shape: f32[4,32,8], index: 8, kind: input, shape index: {}]   ;;  %s7750_s9 = inlined_call_operand.vmem [shape: f32[4,1,8], index: 9, kind: input, shape index: {}]   ;;  %s7751_s10 = inlined_call_operand.vmem [shape: f32[64,32], index: 10, kind: input, shape index: {}]   ;;  %s7752_s11 = inlined_call_operand.vmem [shape: f32[64,1], index: 11, kind: input, shape index: {}]   ;;  %s7753_s12 = inlined_call_operand.vmem [shape: f32[32,32], index: 12, kind: input, shape index: {}]   ;;  %s7754_s13 = inlined_call_operand.vmem [shape: f32[1,32], index: 13, kind: input, shape index: {}]   ;;  %s7755_s14 = inlined_call_operand.vmem [shape: f32[6,32], index: 14, kind: input, shape index: {}]   ;;  %s7756_s15 = inlined_call_operand.vmem [shape: f32[32,64], index: 15, kind: input, shape index: {}]   ;;  %s7757_s16 = inlined_call_operand.vmem [shape: f32[1,64], index: 16, kind: input, shape index: {}]   ;;  %s7758_s17 = inlined_call_operand.vmem [shape: f32[64,32], index: 17, kind: input, shape index: {}]   ;;  %s7759_s18 = inlined_call_operand.vmem [shape: f32[1,32], index: 18, kind: input, shape index: {}]   ;;  %s7760_s19 = inlined_call_operand.hbm [shape: f32[2,8,32], index: 19, kind: output, shape index: {}]  }
   0x1   :  { %7765 = sst [smem:[#allocation5_spill]] %s7741_s0 }
   0x2   :  { %7766 = sst [smem:[#allocation6_spill]] %s7742_s1 }
   0x3   :  { %7767 = sst [smem:[#allocation7_spill]] %s7743_s2 }
   0x4   :  { %7768 = sst [smem:[#allocation8_spill]] %s7744_s3 }
   0x5   :  { %s7769_s20 = sld [smem:[#allocation5_spill]]  ;;  %vm167_vm0 = vcmask 261120   ;;  %v67_v1 = vld [vmem:[%s7745_s4 + $0x20] sm:$0xff]  ;;  %v68_v3 = vld [vmem:[%s7745_s4 + $0x28] sm:$0xff]  ;;  %v69_v6 = vld [vmem:[%s7745_s4 + $0x30] sm:$0xff]  ;;  %v6434_v7 = vmov 0.0  }
   0x6   :  { %v63_v2 = vld [vmem:[%s7745_s4] sm:$0xff]  ;;  %v64_v4 = vld [vmem:[%s7745_s4 + $0x8] sm:$0xff]  ;;  %5812 = vmatprep.mubr.msk.f32.mxu1 %vm167_vm0, %v67_v1  ;;  %s7770_s28 = sld [smem:[#allocation7_spill]]  ;;  %v6435_v8 = vmov 0  }
   0x7   :  { %5806 = vmatprep.mubr.msk.f32.mxu0 %vm167_vm0, %v63_v2  ;;  %6311 = vset.pattern.permute.xlu1 %v6435_v8 }
   0xb   :  { %v6545_v0 = vld [vmem:[%s7769_s20] sm:$0xff] }
   0xc   :  { %6300 = vmatprep.subr.msk.mxu1 %vm167_vm0, %v6545_v0  ;;  %5804 = vmatprep.subr.msk.mxu0 %vm167_vm0, %v6545_v0  ;;  %v303_v5 = vld [vmem:[%s7770_s28 + $0x18] sm:$0xff] }
   0xd   :  { %6301 = vmatpush3.xpose.msk.msra.mxu1 %vm167_vm0, %v6545_v0  ;;  %5805 = vmatpush3.xpose.msk.msra.mxu0 %vm167_vm0, %v6545_v0 }
   0xe   :  { %5818 = vmatprep.subr.mxu1 %v6434_v7 }
   0xf   :  { %24 = vsyncpa [#allocation3], 0  ;;  %v302_v9 = vld [vmem:[%s7770_s28 + $0x10] sm:$0xff]  ;;  %v75_v10 = vld [vmem:[%s7746_s5 + $0x20] sm:$0xff]  ;;  %6310 = vset.pattern.permute.xlu0 %v6435_v8  ;;  %vm6436_vm1 = vmmov 0   ;;  %5839 = vmatprep.subr.mxu0 %v6434_v7  ;;  %s7771_s21 = sld [smem:[#allocation8_spill]] }
  0x10   :  { %5813 = vmatmul.mubr.msk.f32.vlgmr.msra.gmra.mxu1 %vm167_vm0, %v68_v3  ;;  %5807 = vmatmul.mubr.msk.f32.vlgmr.msra.gmra.mxu0 %vm167_vm0, %v64_v4  ;;  %v70_v11 = vld [vmem:[%s7745_s4 + $0x38] sm:$0xff]  ;;  %v301_v12 = vld [vmem:[%s7770_s28 + $0x8] sm:$0xff]  ;;  %v71_v13 = vld [vmem:[%s7746_s5] sm:$0xff]  ;;  %vm381_vm2 = vcmask 64512   ;;  %s6437_s27 = smov 16   ;;  %s6438_s30 = smov 8  }
  0x11   :  { %5819 = vmatpush3.msra.mxu1 %v303_v5  ;;  %5815 = vmatprep.mubr.msk.f32.mxu1 %vm167_vm0, %v69_v6  ;;  %v300_v14 = vld [vmem:[%s7770_s28] sm:$0xff]  ;;  %v5397_v29 = vld [vmem:[%s7770_s28 + $0x38] sm:$0xff]  ;;  %v65_v30 = vld [vmem:[%s7745_s4 + $0x10] sm:$0xff]  ;;  %s7772_s0 = sld [smem:[#allocation6_spill]]  ;;  %vm1284_vm3 = vcmask 130048   ;;  %vm1286_vm4 = vcmask 195584  }
  0x12   :  { %5820 = vmatprep.subr.mxu1 %v6434_v7  ;;  %149 = vperm.xlu1 %6311, %v75_v10   ;;  %v5396_v31 = vld [vmem:[%s7770_s28 + $0x30] sm:$0xff]  ;;  %v66_v32 = vld [vmem:[%s7745_s4 + $0x18] sm:$0xff]  ;;  %v5395_v33 = vld [vmem:[%s7770_s28 + $0x28] sm:$0xff]  ;;  %vm2741_vm5 = vcmask 523264  }
  0x13   :  { %5821 = vmatpush3.msra.mxu1 %v302_v9  ;;  %129 = vperm.xlu0 %6310, %v71_v13   ;;  %v5394_v34 = vld [vmem:[%s7770_s28 + $0x20] sm:$0xff]  ;;  %v76_v38 = vld [vmem:[%s7746_s5 + $0x28] sm:$0xff]  ;;  %v5407_v58 = vld [vmem:[%s7770_s28 + $0x58] sm:$0xff] }
  0x14   :  { %5816 = vmatmul.mubr.msk.f32.gmra.mxu1 %vm167_vm0, %v70_v11  ;;  %5822 = vmatprep.subr.mxu1 %v6434_v7  ;;  %v72_v46 = vld [vmem:[%s7746_s5 + $0x8] sm:$0xff]  ;;  %v5406_v59 = vld [vmem:[%s7770_s28 + $0x50] sm:$0xff]  ;;  %v5404_v61 = vld [vmem:[%s7770_s28 + $0x40] sm:$0xff] }
  0x15   :  { %5823 = vmatpush3.msra.mxu1 %v301_v12  ;;  %5826 = vmatprep.mubr.msk.f32.mxu1 %vm6436_vm1, %v6434_v7  ;;  %v5389_v23 = vld [vmem:[%s7771_s21] ss:$0 sm:$0xff]  ;;  %v5399_v54 = vld [vmem:[%s7771_s21 + $0x1] ss:$0 sm:$0xff]  ;;  %v5405_v60 = vld [vmem:[%s7770_s28 + $0x48] sm:$0xff] }
  0x16   :  { %5824 = vmatprep.subr.mxu1 %v6434_v7  ;;  %5840 = vmatpush3.msra.mxu0 %v5397_v29  ;;  %v73_v10 = vld [vmem:[%s7746_s5 + $0x10] sm:$0xff] }
  0x17   :  { %5825 = vmatpush3.msra.mxu1 %v300_v14  ;;  %5809 = vmatprep.mubr.msk.f32.mxu0 %vm167_vm0, %v65_v30 }
  0x18   :  { %5827 = vmatmul.mubr.msk.f32.vlgmr.msra.gmra.mxu1 %vm167_vm0, %v6545_v0  ;;  %5829 = vmatprep.subr.mxu1 %v6434_v7 }
  0x19   :  { %5831 = vmatprep.mubr.msk.f32.mxu1 %vm6436_vm1, %v6434_v7  ;;  %5841 = vmatprep.subr.mxu0 %v6434_v7 }
  0x1a   :  { %5810 = vmatmul.mubr.msk.f32.gmra.mxu0 %vm167_vm0, %v66_v32 }
  0x1b   :  { %5842 = vmatpush3.msra.mxu0 %v5396_v31  ;;  %5847 = vmatprep.mubr.msk.f32.mxu0 %vm6436_vm1, %v6434_v7 }
  0x1c   :  { %5843 = vmatprep.subr.mxu0 %v6434_v7 }
  0x1d   :  { %5844 = vmatpush3.msra.mxu0 %v5395_v33  ;;  %v77_v33 = vld [vmem:[%s7746_s5 + $0x30] sm:$0xff] }
  0x1e   :  { %5845 = vmatprep.subr.mxu0 %v6434_v7 }
  0x1f   :  { %5846 = vmatpush3.msra.mxu0 %v5394_v34  ;;  %v74_v34 = vld [vmem:[%s7746_s5 + $0x18] sm:$0xff] }
  0x20   :  { %5848 = vmatmul.mubr.msk.f32.vlgmr.msra.gmra.mxu0 %vm167_vm0, %v6545_v0  ;;  %5855 = vmatprep.subr.mxu0 %v6434_v7 }
  0x21   :  { %5857 = vmatprep.mubr.msk.f32.mxu0 %vm6436_vm1, %v6434_v7 }
  0x8d   :  { %v6622_v24 = vpop.permute.xlu1 %149 }
  0x8e   :  { %v6609_v15 = vpop.permute.xlu0 %129 }
  0xd0   :  { %v5814_v16 = vpop.f32.mrf.mxu1  ;;  %v6611_v17 = vpop.f32.mrf.mxu0 }
  0xd2   :  { %v281_v18 = vpop.f32.mrf.mxu1  ;;  %v261_v19 = vpop.f32.mrf.mxu0 }
  0xd3   :  { %v262_v20 = vadd.f32 %v261_v19, %v6609_v15  ;;  %v282_v27 = vadd.f32 %v281_v18, %v6622_v24 }
  0xd4   :  { %v6614_v21 = vpop.f32.mrf.mxu1 }
  0xd5   :  { %5830 = vmatpush3.msra.mxu1 %v262_v20 }
  0xd6   :  { %v6616_v22 = vpop.f32.mrf.mxu1  ;;  %5834 = vmatprep.subr.mxu1 %v6434_v7 }
  0xd8   :  { %v377_v25 = vpop.f32.mrf.mxu1 }
  0xd9   :  { %v378_v26 = vadd.f32 %v5389_v23, %v377_v25  ;;  %v5417_v23 = vld [vmem:[%s7770_s28 + $0x78] sm:$0xff]  ;;  %v5416_v25 = vld [vmem:[%s7770_s28 + $0x70] sm:$0xff] }
  0xda   :  { %v5828_v28 = vpop.f32.mrf.mxu1  ;;  %v6673_v47 = vpop.f32.mrf.mxu0 }
  0xdb   :  { %5832 = vmatmul.mubr.msk.f32.vlgmr.msra.gmra.mxu1 %vm381_vm2, %v378_v26  ;;  %v5415_v26 = vld [vmem:[%s7770_s28 + $0x68] sm:$0xff] }
  0xdc   :  { %5835 = vmatpush3.xpose.msk.msra.mxu1 %vm381_vm2, %v282_v27  ;;  %5836 = vmatprep.mubr.msk.f32.mxu1 %vm6436_vm1, %v6434_v7  ;;  %v271_v48 = vpop.f32.mrf.mxu0  ;;  %v5414_v27 = vld [vmem:[%s7770_s28 + $0x60] sm:$0xff] }
  0xdd   :  { %5850 = vmatprep.subr.mxu1 %v6434_v7 }
  0xe0   :  { %v621_v49 = vpop.f32.mrf.mxu0 }
  0xe1   :  { %v622_v57 = vadd.f32 %v5399_v54, %v621_v49  ;;  %v5419_v49 = vld [vmem:[%s7771_s21 + $0x3] ss:$0 sm:$0xff] }
  0xe2   :  { %v5849_v50 = vpop.f32.mrf.mxu0 }
 0x19b   :  { %v451_v35 = vpop.f32.mrf.mxu1 }
 0x19c   :  { %v455_v36 = vsel %vm381_vm2, %v451_v35, -inf }
 0x19d   :  { %456 = vmax.xlane.f32.xlu0 %v455_v36  ;;  %v5833_v37 = vpop.f32.mrf.mxu1 }
 0x1b3   :  { %154 = vperm.xlu0 %6310, %v76_v38  }
 0x226   :  { %v457_v39 = vpop.xlane.xlu0 %456 }
 0x227   :  { %v458_v40 = vsub.f32 %v451_v35, %v457_v39 }
 0x229   :  { %v459_v41 = vmul.f32 1.442695, %v458_v40 }
 0x22b   :  { %6312 = vpow2.f32 %v459_v41 }
 0x22e   :  { %v6664_v42 = vpop.permute.xlu0 %154 }
 0x22f   :  { %v287_v43 = vadd.f32 %v5814_v16, %v6664_v42 }
 0x231   :  { %5856 = vmatpush3.xpose.msk.msra.mxu0 %vm381_vm2, %v287_v43 }
 0x232   :  { %5871 = vmatprep.subr.mxu0 %v6434_v7 }
 0x238   :  { %v6313_v44 = vpop.eup %6312 }
 0x239   :  { %v461_v45 = vsel %vm381_vm2, %v6313_v44, 0.0 }
 0x23a   :  { %462 = vadd.xlane.f32.xlu1 %v461_v45 }
 0x24b   :  { %134 = vperm.xlu1 %6311, %v72_v46  }
 0x2c3   :  { %v463_v51 = vpop.xlane.xlu1 %462 }
 0x2c4   :  { %6314 = vrcp.f32 %v463_v51 }
 0x2c7   :  { %v6675_v52 = vpop.permute.xlu1 %134 }
 0x2c8   :  { %v267_v56 = vadd.f32 %v6611_v17, %v6675_v52  ;;  %v5409_v17 = vld [vmem:[%s7771_s21 + $0x2] ss:$0 sm:$0xff] }
 0x2d1   :  { %v6315_v53 = vpop.eup %6314 }
 0x2d2   :  { %v465_v55 = vmul.f32 %v6315_v53, %v6313_v44 }
 0x2d4   :  { %5837 = vmatmul.mubr.msk.f32.vlgmr.msra.gmra.mxu1 %vm381_vm2, %v465_v55 }
 0x2d5   :  { %5851 = vmatpush3.msra.mxu1 %v267_v56  ;;  %5852 = vmatprep.mubr.msk.f32.mxu1 %vm6436_vm1, %v6434_v7 }
 0x2d6   :  { %5860 = vmatprep.subr.mxu1 %v6434_v7 }
 0x2d8   :  { %5853 = vmatmul.mubr.msk.f32.vlgmr.msra.gmra.mxu1 %vm381_vm2, %v622_v57 }
 0x2d9   :  { %5868 = vmatprep.mubr.msk.f32.mxu1 %vm6436_vm1, %v6434_v7  ;;  %5861 = vmatpush3.msra.mxu1 %v5407_v58 }
 0x2da   :  { %5862 = vmatprep.subr.mxu1 %v6434_v7 }
 0x2db   :  { %5863 = vmatpush3.msra.mxu1 %v5406_v59 }
 0x2dc   :  { %5864 = vmatprep.subr.mxu1 %v6434_v7 }
 0x2dd   :  { %5865 = vmatpush3.msra.mxu1 %v5405_v60 }
 0x2de   :  { %5866 = vmatprep.subr.mxu1 %v6434_v7 }
 0x2df   :  { %5867 = vmatpush3.msra.mxu1 %v5404_v61 }
 0x2e0   :  { %5869 = vmatmul.mubr.msk.f32.vlgmr.msra.gmra.mxu1 %vm167_vm0, %v6545_v0  ;;  %5881 = vmatprep.subr.mxu1 %v6434_v7 }
 0x2e1   :  { %5889 = vmatprep.mubr.msk.f32.mxu1 %vm6436_vm1, %v6434_v7  ;;  %5882 = vmatpush3.msra.mxu1 %v5417_v23 }
 0x2e2   :  { %5883 = vmatprep.subr.mxu1 %v6434_v7 }
 0x2e3   :  { %5884 = vmatpush3.msra.mxu1 %v5416_v25 }
 0x2e4   :  { %5885 = vmatprep.subr.mxu1 %v6434_v7 }
 0x2e5   :  { %5886 = vmatpush3.msra.mxu1 %v5415_v26 }
 0x2e6   :  { %5887 = vmatprep.subr.mxu1 %v6434_v7 }
 0x2e7   :  { %5888 = vmatpush3.msra.mxu1 %v5414_v27 }
 0x2e8   :  { %5890 = vmatmul.mubr.msk.f32.vlgmr.msra.gmra.mxu1 %vm167_vm0, %v6545_v0  ;;  %5902 = vmatprep.subr.mxu1 %v6434_v7 }
 0x2e9   :  { %5910 = vmatprep.mubr.msk.f32.mxu1 %vm6436_vm1, %v6434_v7 }
 0x394   :  { %v6709_v62 = vpop.f32.mrf.mxu1 }
 0x396   :  { %v5838_v63 = vpop.f32.mrf.mxu1 }
 0x397   :  { %v78_v63 = vld [vmem:[%s7746_s5 + $0x38] sm:$0xff]  ;;  %s6439_s5 = smov 24  }
 0x398   :  { %v694_v1 = vpop.f32.mrf.mxu1 }
 0x399   :  { %v698_v2 = vsel %vm381_vm2, %v694_v1, -inf }
 0x39a   :  { %699 = vmax.xlane.f32.xlu1 %v698_v2  ;;  %v5854_v3 = vpop.f32.mrf.mxu1 }
 0x3a0   :  { %v864_v11 = vpop.f32.mrf.mxu1 }
 0x3a1   :  { %v865_v20 = vadd.f32 %v5409_v17, %v864_v11  ;;  %v84_v11 = vld [vmem:[%s7751_s10] sm:$0xff] }
 0x3a2   :  { %v5870_v12 = vpop.f32.mrf.mxu1  ;;  %v88_v17 = vld [vmem:[%s7751_s10 + $0x20] sm:$0xff] }
 0x3a3   :  { %v85_v12 = vld [vmem:[%s7751_s10 + $0x8] sm:$0xff] }
 0x3a8   :  { %v1107_v43 = vpop.f32.mrf.mxu1 }
 0x3a9   :  { %v1108_v51 = vadd.f32 %v5419_v49, %v1107_v43 }
 0x3aa   :  { %v5891_v44 = vpop.f32.mrf.mxu1 }
 0x423   :  { %v700_v4 = vpop.xlane.xlu1 %699 }
 0x424   :  { %v701_v5 = vsub.f32 %v694_v1, %v700_v4 }
 0x426   :  { %v702_v6 = vmul.f32 1.442695, %v701_v5 }
 0x428   :  { %6316 = vpow2.f32 %v702_v6  ;;  %v82_v6 = vld [vmem:[%s7747_s6 + $0x18] sm:$0xff] }
 0x429   :  { %5903 = vmatpush3.msra.mxu1 %v82_v6  ;;  %v5437_v6 = vld [vmem:[%s7750_s9] ss:$0 sm:$0xff] }
 0x42a   :  { %5904 = vmatprep.subr.mxu1 %v6434_v7 }
 0x435   :  { %v6317_v8 = vpop.eup %6316 }
 0x436   :  { %v704_v9 = vsel %vm381_vm2, %v6317_v8, 0.0 }
 0x437   :  { %705 = vadd.xlane.f32.xlu0 %v704_v9  ;;  %v79_v9 = vld [vmem:[%s7747_s6] sm:$0xff] }
 0x44d   :  { %139 = vperm.xlu0 %6310, %v73_v10   ;;  %v126_v10 = vld [vmem:[%s7772_s0] sm:$0xff] }
 0x4c0   :  { %v706_v13 = vpop.xlane.xlu0 %705 }
 0x4c1   :  { %6318 = vrcp.f32 %v706_v13  ;;  %v86_v13 = vld [vmem:[%s7751_s10 + $0x10] sm:$0xff] }
 0x4c8   :  { %v6716_v14 = vpop.permute.xlu0 %139 }
 0x4c9   :  { %v272_v19 = vadd.f32 %v271_v48, %v6716_v14 }
 0x4ce   :  { %v6319_v16 = vpop.eup %6318 }
 0x4cf   :  { %v708_v18 = vmul.f32 %v6319_v16, %v6317_v8  ;;  %v81_v8 = vld [vmem:[%s7747_s6 + $0x10] sm:$0xff]  ;;  %v87_v16 = vld [vmem:[%s7751_s10 + $0x18] sm:$0xff] }
 0x4d0   :  { %5905 = vmatpush3.msra.mxu1 %v81_v8 }
 0x4d1   :  { %5858 = vmatmul.mubr.msk.f32.vlgmr.msra.gmra.mxu0 %vm381_vm2, %v708_v18  ;;  %5906 = vmatprep.subr.mxu1 %v6434_v7  ;;  %v89_v18 = vld [vmem:[%s7751_s10 + $0x28] sm:$0xff] }
 0x4d2   :  { %5872 = vmatpush3.msra.mxu0 %v272_v19  ;;  %5873 = vmatprep.mubr.msk.f32.mxu0 %vm6436_vm1, %v6434_v7 }
 0x4d3   :  { %5876 = vmatprep.subr.mxu0 %v6434_v7 }
 0x4d5   :  { %5874 = vmatmul.mubr.msk.f32.vlgmr.msra.gmra.mxu0 %vm381_vm2, %v865_v20 }
 0x4d6   :  { %5878 = vmatprep.mubr.msk.f32.mxu0 %vm6436_vm1, %v6434_v7 }
 0x591   :  { %v781_v28 = vpop.f32.mrf.mxu0 }
 0x593   :  { %v5859_v29 = vpop.f32.mrf.mxu0 }
 0x595   :  { %v937_v30 = vpop.f32.mrf.mxu0 }
 0x596   :  { %v941_v31 = vsel %vm381_vm2, %v937_v30, -inf }
 0x597   :  { %942 = vmax.xlane.f32.xlu1 %v941_v31  ;;  %v5875_v32 = vpop.f32.mrf.mxu0 }
 0x5a8   :  { %159 = vperm.xlu1 %6311, %v77_v33  }
 0x5ac   :  { %144 = vperm.xlu1 %6311, %v74_v34  }
 0x620   :  { %v943_v35 = vpop.xlane.xlu1 %942 }
 0x621   :  { %v944_v36 = vsub.f32 %v937_v30, %v943_v35  ;;  %v5424_v30 = vld [vmem:[%s7748_s7] ss:$0 sm:$0xff] }
 0x622   :  { %v92_v35 = vld [vmem:[%s7752_s11] sm:$0xff] }
 0x623   :  { %v945_v37 = vmul.f32 1.442695, %v944_v36  ;;  %v96_v36 = vld [vmem:[%s7752_s11 + $0x20] sm:$0xff] }
 0x624   :  { %v6756_v38 = vpop.permute.xlu1 %159 }
 0x625   :  { %6320 = vpow2.f32 %v945_v37  ;;  %v292_v39 = vadd.f32 %v6616_v22, %v6756_v38 }
 0x627   :  { %5877 = vmatpush3.xpose.msk.msra.mxu0 %vm381_vm2, %v292_v39 }
 0x628   :  { %5892 = vmatprep.subr.mxu0 %v6434_v7  ;;  %v6763_v46 = vpop.permute.xlu1 %144 }
 0x629   :  { %v277_v50 = vadd.f32 %v6673_v47, %v6763_v46 }
 0x632   :  { %v6321_v40 = vpop.eup %6320 }
 0x633   :  { %v947_v41 = vsel %vm381_vm2, %v6321_v40, 0.0 }
 0x634   :  { %948 = vadd.xlane.f32.xlu0 %v947_v41 }
 0x6bd   :  { %v949_v45 = vpop.xlane.xlu0 %948 }
 0x6be   :  { %6322 = vrcp.f32 %v949_v45 }
 0x6cb   :  { %v6323_v48 = vpop.eup %6322 }
 0x6cc   :  { %v951_v22 = vmul.f32 %v6323_v48, %v6321_v40 }
 0x6ce   :  { %5879 = vmatmul.mubr.msk.f32.vlgmr.msra.gmra.mxu0 %vm381_vm2, %v951_v22 }
 0x6cf   :  { %5893 = vmatpush3.msra.mxu0 %v277_v50  ;;  %5894 = vmatprep.mubr.msk.f32.mxu0 %vm6436_vm1, %v6434_v7 }
 0x6d0   :  { %5897 = vmatprep.subr.mxu0 %v6434_v7 }
 0x6d2   :  { %5895 = vmatmul.mubr.msk.f32.vlgmr.msra.gmra.mxu0 %vm381_vm2, %v1108_v51 }
 0x6d3   :  { %5899 = vmatprep.mubr.msk.f32.mxu0 %vm6436_vm1, %v6434_v7 }
 0x78e   :  { %v1024_v53 = vpop.f32.mrf.mxu0 }
 0x790   :  { %v5880_v54 = vpop.f32.mrf.mxu0 }
 0x791   :  { %v1567_v54 = vld [vmem:[%s7749_s8 + $0x18] sm:$0xff] }
 0x792   :  { %v1180_v55 = vpop.f32.mrf.mxu0 }
 0x793   :  { %v1184_v56 = vsel %vm381_vm2, %v1180_v55, -inf }
 0x794   :  { %1185 = vmax.xlane.f32.xlu1 %v1184_v56  ;;  %v5896_v47 = vpop.f32.mrf.mxu0  ;;  %v1565_v56 = vld [vmem:[%s7749_s8 + $0x8] sm:$0xff] }
 0x795   :  { %v1564_v47 = vld [vmem:[%s7749_s8] sm:$0xff] }
 0x7a5   :  { %1276 = vrot.lane.b32.xlu1 %v1024_v53, %s6437_s27 }
 0x81d   :  { %v1186_v57 = vpop.xlane.xlu1 %1185 }
 0x81e   :  { %v1187_v58 = vsub.f32 %v1180_v55, %v1186_v57  ;;  %v1566_v55 = vld [vmem:[%s7749_s8 + $0x10] sm:$0xff] }
 0x820   :  { %v1188_v59 = vmul.f32 1.442695, %v1187_v58 }
 0x821   :  { %v1277_v26 = vpop.permute.xlu1 %1276 }
 0x822   :  { %6324 = vpow2.f32 %v1188_v59 }
 0x82f   :  { %v6325_v60 = vpop.eup %6324 }
 0x830   :  { %v1190_v61 = vsel %vm381_vm2, %v6325_v60, 0.0 }
 0x831   :  { %1191 = vadd.xlane.f32.xlu0 %v1190_v61 }
 0x847   :  { %164 = vperm.xlu0 %6310, %v78_v63  }
 0x84b   :  { %1272 = vrot.lane.b32.xlu0 %v781_v28, %s6438_s30 }
 0x8ba   :  { %v1192_v1 = vpop.xlane.xlu0 %1191 }
 0x8bb   :  { %6326 = vrcp.f32 %v1192_v1  ;;  %v5427_v1 = vld [vmem:[%s7755_s14 + $0x1] ss:$0 sm:$0xff] }
 0x8c2   :  { %v6784_v2 = vpop.permute.xlu0 %164 }
 0x8c3   :  { %v297_v3 = vadd.f32 %v6614_v21, %v6784_v2  ;;  %v80_v21 = vld [vmem:[%s7747_s6 + $0x8] sm:$0xff] }
 0x8c4   :  { %5907 = vmatpush3.msra.mxu1 %v80_v21 }
 0x8c5   :  { %5898 = vmatpush3.xpose.msk.msra.mxu0 %vm381_vm2, %v297_v3  ;;  %5908 = vmatprep.subr.mxu1 %v6434_v7 }
 0x8c6   :  { %5909 = vmatpush3.msra.mxu1 %v79_v9  ;;  %5913 = vmatprep.subr.msk.mxu0 %vm167_vm0, %v126_v10  ;;  %v1273_v23 = vpop.permute.xlu0 %1272  ;;  %v5445_v9 = vld [vmem:[%s7749_s8 + $0x38] sm:$0xff] }
 0x8c7   :  { %5927 = vmatprep.subr.mxu1 %v6434_v7  ;;  %v1283_v25 = vsel %vm381_vm2, %v6709_v62, %v1273_v23  ;;  %v5464_v23 = vld [vmem:[%s7749_s8 + $0x70] sm:$0xff] }
 0x8c8   :  { %v6327_v4 = vpop.eup %6326  ;;  %v1285_v27 = vsel %vm1284_vm3, %v1283_v25, %v1277_v26  ;;  %v5463_v25 = vld [vmem:[%s7749_s8 + $0x68] sm:$0xff]  ;;  %v5462_v26 = vld [vmem:[%s7749_s8 + $0x60] sm:$0xff] }
 0x8c9   :  { %v1194_v5 = vmul.f32 %v6327_v4, %v6325_v60  ;;  %v5426_v60 = vld [vmem:[%s7755_s14] ss:$0 sm:$0xff] }
 0x8cb   :  { %5900 = vmatmul.mubr.msk.f32.vlgmr.msra.gmra.mxu0 %vm381_vm2, %v1194_v5 }
 0x8cc   :  { %5915 = vmatprep.mubr.msk.f32.mxu0 %vm167_vm0, %v84_v11  ;;  %5914 = vmatpush3.xpose.msk.msra.mxu0 %vm167_vm0, %v126_v10  ;;  %v5444_v11 = vld [vmem:[%s7749_s8 + $0x30] sm:$0xff] }
 0x8cd   :  { %5943 = vmatprep.subr.mxu0 %v6434_v7 }
 0x8cf   :  { %5916 = vmatmul.mubr.msk.f32.vlgmr.msra.gmra.mxu0 %vm167_vm0, %v85_v12  ;;  %v5443_v12 = vld [vmem:[%s7749_s8 + $0x28] sm:$0xff] }
 0x8d0   :  { %5918 = vmatprep.mubr.msk.f32.mxu0 %vm167_vm0, %v86_v13  ;;  %v5442_v13 = vld [vmem:[%s7749_s8 + $0x20] sm:$0xff] }
 0x8d3   :  { %5919 = vmatmul.mubr.msk.f32.gmra.mxu0 %vm167_vm0, %v87_v16  ;;  %v5455_v16 = vld [vmem:[%s7749_s8 + $0x58] sm:$0xff] }
 0x8d4   :  { %5921 = vmatprep.mubr.msk.f32.mxu0 %vm167_vm0, %v88_v17  ;;  %v5454_v17 = vld [vmem:[%s7749_s8 + $0x50] sm:$0xff] }
 0x8d7   :  { %5922 = vmatmul.mubr.msk.f32.gmra.mxu0 %vm167_vm0, %v89_v18  ;;  %v5453_v18 = vld [vmem:[%s7749_s8 + $0x48] sm:$0xff] }
 0x98b   :  { %v1267_v19 = vpop.f32.mrf.mxu0 }
 0x98c   :  { %1280 = vrot.lane.b32.xlu0 %v1267_v19, %s6439_s5  ;;  %v5452_v19 = vld [vmem:[%s7749_s8 + $0x40] sm:$0xff] }
 0x98d   :  { %v5901_v20 = vpop.f32.mrf.mxu0 }
 0x98e   :  { %v5465_v20 = vld [vmem:[%s7749_s8 + $0x78] sm:$0xff] }
 0x98f   :  { %v6855_v37 = vpop.f32.mrf.mxu0 }
 0x991   :  { %v1525_v39 = vpop.f32.mrf.mxu0 }
 0x993   :  { %v6857_v40 = vpop.f32.mrf.mxu0 }
 0x995   :  { %v6859_v43 = vpop.f32.mrf.mxu0 }
 0x997   :  { %v6861_v48 = vpop.f32.mrf.mxu0 }
 0x999   :  { %v1545_v50 = vpop.f32.mrf.mxu0 }
 0x9fe   :  { %v1281_v28 = vpop.permute.xlu0 %1280 }
 0x9ff   :  { %v1287_v29 = vsel %vm1286_vm4, %v1285_v27, %v1281_v28 }
 0xa00   :  { %5911 = vmatmul.mubr.msk.f32.vlgmr.msra.gmra.mxu1 %vm167_vm0, %v1287_v29 }
 0xa01   :  { %5935 = vmatprep.mubr.msk.f32.mxu1 %vm6436_vm1, %v6434_v7  ;;  %5928 = vmatpush3.msra.mxu1 %v1567_v54 }
 0xa02   :  { %5929 = vmatprep.subr.mxu1 %v6434_v7 }
 0xa03   :  { %5930 = vmatpush3.msra.mxu1 %v1566_v55 }
 0xa04   :  { %5931 = vmatprep.subr.mxu1 %v6434_v7 }
 0xa05   :  { %5932 = vmatpush3.msra.mxu1 %v1565_v56  ;;  %v5447_v56 = vld [vmem:[%s7750_s9 + $0x1] ss:$0 sm:$0xff] }
 0xa06   :  { %5933 = vmatprep.subr.mxu1 %v6434_v7 }
 0xa07   :  { %5934 = vmatpush3.msra.mxu1 %v1564_v47 }
 0xa08   :  { %5938 = vmatprep.subr.mxu1 %v6434_v7 }
 0xac0   :  { %v1363_v31 = vpop.f32.mrf.mxu1 }
 0xac1   :  { %v1364_v32 = vadd.f32 %v5424_v30, %v1363_v31 }
 0xac2   :  { %v5912_v62 = vpop.f32.mrf.mxu1 }
 0xac3   :  { %v1367_v33 = vadd.f32 %v1364_v32, %v6545_v0 }
 0xac5   :  { %v1368_v34 = vsel %vm167_vm0, %v1367_v33, 0.0 }
 0xac6   :  { %1369 = vadd.xlane.f32.xlu0 %v1368_v34 }
 0xadc   :  { %1394 = vperm.xlu0 %6310, %v92_v35  }
 0xae0   :  { %1414 = vperm.xlu0 %6310, %v96_v36  }
 0xb4f   :  { %v1370_v41 = vpop.xlane.xlu0 %1369 }
 0xb50   :  { %v1372_v0 = vmul.f32 0.03125, %v1370_v41 }
 0xb52   :  { %v1373_v44 = vsub.f32 %v1367_v33, %v1372_v0 }
 0xb54   :  { %v1374_v45 = vmul.f32 %v1373_v44, %v1373_v44  ;;  %v1383_v61 = vmul.f32 %v5426_v60, %v1373_v44  ;;  %v93_v44 = vld [vmem:[%s7752_s11 + $0x8] sm:$0xff] }
 0xb56   :  { %v1375_v49 = vsel %vm167_vm0, %v1374_v45, 0.0  ;;  %v6979_v45 = vld [vmem:[%s7751_s10 + $0x30] sm:$0xff] }
 0xb57   :  { %1376 = vadd.xlane.f32.xlu1 %v1375_v49  ;;  %v6864_v22 = vpop.permute.xlu0 %1394  ;;  %5924 = vmatprep.mubr.msk.f32.mxu0 %vm167_vm0, %v6979_v45  ;;  %v6986_v49 = vld [vmem:[%s7751_s10 + $0x38] sm:$0xff] }
 0xb58   :  { %v1526_v5 = vadd.f32 %v1525_v39, %v6864_v22  ;;  %5925 = vmatmul.mubr.msk.f32.gmra.mxu0 %vm167_vm0, %v6986_v49 }
 0xb59   :  { %5945 = vmatprep.mubr.msk.f32.mxu0 %vm6436_vm1, %v6434_v7 }
 0xb5b   :  { %v6866_v51 = vpop.permute.xlu0 %1414 }
 0xb5c   :  { %v1546_v53 = vadd.f32 %v1545_v50, %v6866_v51 }
 0xb5e   :  { %5944 = vmatpush3.xpose.msk.msra.mxu0 %vm381_vm2, %v1546_v53 }
 0xb5f   :  { %5959 = vmatprep.subr.mxu0 %v6434_v7 }
 0xbe0   :  { %v1377_v57 = vpop.xlane.xlu1 %1376 }
 0xbe1   :  { %v1378_v58 = vmul.f32 0.03125, %v1377_v57 }
 0xbe3   :  { %v1384_v59 = vadd.f32 1e-12, %v1378_v58 }
 0xbe5   :  { %6328 = vrsqrt.f32 %v1384_v59 }
 0xbf2   :  { %v6329_v63 = vpop.eup %6328 }
 0xbf3   :  { %v1386_v3 = vmul.f32 %v6329_v63, %v1383_v61 }
 0xbf5   :  { %v6893_v4 = vadd.f32 %v5427_v1, %v1386_v3  ;;  %v97_v3 = vld [vmem:[%s7752_s11 + $0x28] sm:$0xff] }
 0xbf7   :  { %5936 = vmatmul.mubr.msk.f32.vlgmr.msra.gmra.mxu1 %vm167_vm0, %v6893_v4 }
 0xbf8   :  { %5939 = vmatpush3.msra.mxu1 %v1526_v5  ;;  %5940 = vmatprep.mubr.msk.f32.mxu1 %vm6436_vm1, %v6434_v7 }
 0xbf9   :  { %5948 = vmatprep.subr.mxu1 %v6434_v7 }
 0xc18   :  { %v7006_v58 = vpop.f32.mrf.mxu0 }
 0xc1a   :  { %v1555_v59 = vpop.f32.mrf.mxu0 }
 0xcb7   :  { %v1644_v8 = vpop.f32.mrf.mxu1 }
 0xcb8   :  { %v1645_v21 = vadd.f32 %v5437_v6, %v1644_v8 }
 0xcb9   :  { %v5937_v10 = vpop.f32.mrf.mxu1 }
 0xcba   :  { %5941 = vmatmul.mubr.msk.f32.vlgmr.msra.gmra.mxu1 %vm381_vm2, %v1645_v21 }
 0xcbb   :  { %5949 = vmatpush3.msra.mxu1 %v5445_v9  ;;  %5956 = vmatprep.mubr.msk.f32.mxu1 %vm6436_vm1, %v6434_v7 }
 0xcbc   :  { %5950 = vmatprep.subr.mxu1 %v6434_v7 }
 0xcbd   :  { %5951 = vmatpush3.msra.mxu1 %v5444_v11 }
 0xcbe   :  { %5952 = vmatprep.subr.mxu1 %v6434_v7 }
 0xcbf   :  { %5953 = vmatpush3.msra.mxu1 %v5443_v12  ;;  %v94_v12 = vld [vmem:[%s7752_s11 + $0x10] sm:$0xff] }
 0xcc0   :  { %5954 = vmatprep.subr.mxu1 %v6434_v7 }
 0xcc1   :  { %5955 = vmatpush3.msra.mxu1 %v5442_v13 }
 0xcc2   :  { %5957 = vmatmul.mubr.msk.f32.vlgmr.msra.gmra.mxu1 %vm167_vm0, %v6893_v4  ;;  %5969 = vmatprep.subr.mxu1 %v6434_v7 }
 0xcc3   :  { %5970 = vmatpush3.msra.mxu1 %v5455_v16  ;;  %5977 = vmatprep.mubr.msk.f32.mxu1 %vm6436_vm1, %v6434_v7 }
 0xcc4   :  { %5971 = vmatprep.subr.mxu1 %v6434_v7 }
 0xcc5   :  { %5972 = vmatpush3.msra.mxu1 %v5454_v17 }
 0xcc6   :  { %5973 = vmatprep.subr.mxu1 %v6434_v7 }
 0xcc7   :  { %5974 = vmatpush3.msra.mxu1 %v5453_v18 }
 0xcc8   :  { %5975 = vmatprep.subr.mxu1 %v6434_v7 }
 0xcc9   :  { %5976 = vmatpush3.msra.mxu1 %v5452_v19 }
 0xcca   :  { %5978 = vmatmul.mubr.msk.f32.vlgmr.msra.gmra.mxu1 %vm167_vm0, %v6893_v4  ;;  %5990 = vmatprep.subr.mxu1 %v6434_v7 }
 0xccb   :  { %5991 = vmatpush3.msra.mxu1 %v5465_v20  ;;  %5998 = vmatprep.mubr.msk.f32.mxu1 %vm6436_vm1, %v6434_v7 }
 0xccc   :  { %5992 = vmatprep.subr.mxu1 %v6434_v7 }
 0xccd   :  { %5993 = vmatpush3.msra.mxu1 %v5464_v23 }
 0xcce   :  { %5994 = vmatprep.subr.mxu1 %v6434_v7 }
 0xccf   :  { %5995 = vmatpush3.msra.mxu1 %v5463_v25 }
 0xcd0   :  { %5996 = vmatprep.subr.mxu1 %v6434_v7 }
 0xcd1   :  { %5997 = vmatpush3.msra.mxu1 %v5462_v26 }
 0xcd2   :  { %5999 = vmatmul.mubr.msk.f32.vlgmr.msra.gmra.mxu1 %vm167_vm0, %v6893_v4  ;;  %6011 = vmatprep.subr.mxu1 %v6434_v7 }
 0xcd3   :  { %6019 = vmatprep.mubr.msk.f32.mxu1 %vm6436_vm1, %v6434_v7 }
 0xd7a   :  { %v1717_v27 = vpop.f32.mrf.mxu1 }
 0xd7b   :  { %v1721_v28 = vsel %vm381_vm2, %v1717_v27, -inf }
 0xd7c   :  { %1722 = vmax.xlane.f32.xlu1 %v1721_v28  ;;  %v5942_v29 = vpop.f32.mrf.mxu1  ;;  %v98_v28 = vld [vmem:[%s7752_s11 + $0x30] sm:$0xff] }
 0xd82   :  { %v1887_v30 = vpop.f32.mrf.mxu1 }
 0xd83   :  { %v1888_v57 = vadd.f32 %v5447_v56, %v1887_v30 }
 0xd84   :  { %v5958_v31 = vpop.f32.mrf.mxu1 }
 0xd8a   :  { %v6968_v32 = vpop.f32.mrf.mxu1 }
 0xd8c   :  { %v5979_v62 = vpop.f32.mrf.mxu1 }
 0xd92   :  { %v6970_v33 = vpop.f32.mrf.mxu1 }
 0xd94   :  { %v6000_v34 = vpop.f32.mrf.mxu1 }
 0xe05   :  { %v1723_v35 = vpop.xlane.xlu1 %1722 }
 0xe06   :  { %v1724_v36 = vsub.f32 %v1717_v27, %v1723_v35 }
 0xe08   :  { %v1725_v39 = vmul.f32 1.442695, %v1724_v36  ;;  %v95_v36 = vld [vmem:[%s7752_s11 + $0x18] sm:$0xff] }
 0xe0a   :  { %6330 = vpow2.f32 %v1725_v39 }
 0xe17   :  { %v6331_v41 = vpop.eup %6330 }
 0xe18   :  { %v1727_v0 = vsel %vm381_vm2, %v6331_v41, 0.0 }
 0xe19   :  { %1728 = vadd.xlane.f32.xlu1 %v1727_v0 }
 0xe2a   :  { %1399 = vperm.xlu1 %6311, %v93_v44  }
 0xea2   :  { %v1729_v50 = vpop.xlane.xlu1 %1728 }
 0xea3   :  { %6332 = vrcp.f32 %v1729_v50  ;;  %v5467_v50 = vld [vmem:[%s7750_s9 + $0x3] ss:$0 sm:$0xff] }
 0xea6   :  { %v6992_v53 = vpop.permute.xlu1 %1399 }
 0xea7   :  { %v1531_v47 = vadd.f32 %v6855_v37, %v6992_v53 }
 0xeb0   :  { %v6333_v54 = vpop.eup %6332 }
 0xeb1   :  { %v1731_v55 = vmul.f32 %v6333_v54, %v6331_v41 }
 0xeb3   :  { %5946 = vmatmul.mubr.msk.f32.vlgmr.msra.gmra.mxu0 %vm381_vm2, %v1731_v55  ;;  %v2374_v55 = vadd.f32 %v5467_v50, %v6970_v33  ;;  %v7155_v50 = vld [vmem:[%s7769_s20 + $0x8] sm:$0xff] }
 0xeb4   :  { %5960 = vmatpush3.msra.mxu0 %v1531_v47  ;;  %5961 = vmatprep.mubr.msk.f32.mxu0 %vm6436_vm1, %v6434_v7 }
 0xeb5   :  { %5964 = vmatprep.subr.mxu0 %v6434_v7 }
 0xeb7   :  { %5962 = vmatmul.mubr.msk.f32.vlgmr.msra.gmra.mxu0 %vm381_vm2, %v1888_v57 }
 0xeb8   :  { %5966 = vmatprep.mubr.msk.f32.mxu0 %vm6436_vm1, %v6434_v7 }
 0xf73   :  { %v7008_v60 = vpop.f32.mrf.mxu0 }
 0xf75   :  { %v5947_v37 = vpop.f32.mrf.mxu0 }
 0xf76   :  { %v99_v37 = vld [vmem:[%s7752_s11 + $0x38] sm:$0xff] }
 0xf77   :  { %v1960_v61 = vpop.f32.mrf.mxu0 }
 0xf78   :  { %v1964_v63 = vsel %vm381_vm2, %v1960_v61, -inf }
 0xf79   :  { %1965 = vmax.xlane.f32.xlu0 %v1964_v63  ;;  %v5963_v1 = vpop.f32.mrf.mxu0 }
 0xf8f   :  { %1419 = vperm.xlu0 %6310, %v97_v3  }
0x1002   :  { %v1966_v5 = vpop.xlane.xlu0 %1965 }
0x1003   :  { %v1967_v6 = vsub.f32 %v1960_v61, %v1966_v5 }
0x1005   :  { %v1968_v8 = vmul.f32 1.442695, %v1967_v6 }
0x1007   :  { %6334 = vpow2.f32 %v1968_v8 }
0x100a   :  { %v7014_v21 = vpop.permute.xlu0 %1419 }
0x100b   :  { %v1551_v9 = vadd.f32 %v6861_v48, %v7014_v21  ;;  %v5457_v48 = vld [vmem:[%s7750_s9 + $0x2] ss:$0 sm:$0xff] }
0x100c   :  { %v2131_v20 = vadd.f32 %v5457_v48, %v6968_v32 }
0x100d   :  { %5965 = vmatpush3.xpose.msk.msra.mxu0 %vm381_vm2, %v1551_v9 }
0x100e   :  { %5980 = vmatprep.subr.mxu0 %v6434_v7 }
0x1014   :  { %v6335_v10 = vpop.eup %6334 }
0x1015   :  { %v1970_v11 = vsel %vm381_vm2, %v6335_v10, 0.0 }
0x1016   :  { %1971 = vadd.xlane.f32.xlu1 %v1970_v11  ;;  %v7091_v11 = vld [vmem:[%s7753_s12 + $0x10] sm:$0xff] }
0x1027   :  { %1404 = vperm.xlu1 %6311, %v94_v12   ;;  %v7098_v12 = vld [vmem:[%s7753_s12 + $0x8] sm:$0xff] }
0x109f   :  { %v1972_v13 = vpop.xlane.xlu1 %1971 }
0x10a0   :  { %6336 = vrcp.f32 %v1972_v13  ;;  %v7107_v13 = vld [vmem:[%s7753_s12] sm:$0xff] }
0x10a3   :  { %v7024_v16 = vpop.permute.xlu1 %1404 }
0x10a4   :  { %v1536_v19 = vadd.f32 %v6859_v43, %v7024_v16 }
0x10ad   :  { %v6337_v17 = vpop.eup %6336 }
0x10ae   :  { %v1974_v18 = vmul.f32 %v6337_v17, %v6335_v10 }
0x10b0   :  { %5967 = vmatmul.mubr.msk.f32.vlgmr.msra.gmra.mxu0 %vm381_vm2, %v1974_v18 }
0x10b1   :  { %5981 = vmatpush3.msra.mxu0 %v1536_v19  ;;  %5982 = vmatprep.mubr.msk.f32.mxu0 %vm6436_vm1, %v6434_v7 }
0x10b2   :  { %5985 = vmatprep.subr.mxu0 %v6434_v7 }
0x10b4   :  { %5983 = vmatmul.mubr.msk.f32.vlgmr.msra.gmra.mxu0 %vm381_vm2, %v2131_v20 }
0x10b5   :  { %5987 = vmatprep.mubr.msk.f32.mxu0 %vm6436_vm1, %v6434_v7 }
0x1170   :  { %v2047_v23 = vpop.f32.mrf.mxu0 }
0x1172   :  { %v5968_v25 = vpop.f32.mrf.mxu0 }
0x1174   :  { %v2203_v26 = vpop.f32.mrf.mxu0 }
0x1175   :  { %v2207_v43 = vsel %vm381_vm2, %v2203_v26, -inf }
0x1176   :  { %2208 = vmax.xlane.f32.xlu0 %v2207_v43  ;;  %v5984_v27 = vpop.f32.mrf.mxu0  ;;  %v5472_v43 = vld [vmem:[%s7754_s13] ss:$0 sm:$0xff] }
0x118c   :  { %1424 = vperm.xlu0 %6310, %v98_v28  }
0x11ff   :  { %v2209_v29 = vpop.xlane.xlu0 %2208 }
0x1200   :  { %v2210_v30 = vsub.f32 %v2203_v26, %v2209_v29 }
0x1202   :  { %v2211_v31 = vmul.f32 1.442695, %v2210_v30 }
0x1204   :  { %6338 = vpow2.f32 %v2211_v31 }
0x1207   :  { %v7043_v32 = vpop.permute.xlu0 %1424 }
0x1208   :  { %v1556_v62 = vadd.f32 %v1555_v59, %v7043_v32 }
0x120a   :  { %5986 = vmatpush3.xpose.msk.msra.mxu0 %vm381_vm2, %v1556_v62 }
0x120b   :  { %6001 = vmatprep.subr.mxu0 %v6434_v7 }
0x1211   :  { %v6339_v34 = vpop.eup %6338 }
0x1212   :  { %v2213_v35 = vsel %vm381_vm2, %v6339_v34, 0.0 }
0x1213   :  { %2214 = vadd.xlane.f32.xlu1 %v2213_v35 }
0x1224   :  { %1409 = vperm.xlu1 %6311, %v95_v36  }
0x129c   :  { %v2215_v39 = vpop.xlane.xlu1 %2214 }
0x129d   :  { %6340 = vrcp.f32 %v2215_v39  ;;  %v7128_v39 = vld [vmem:[%s7756_s15 + $0x18] sm:$0xff] }
0x12a0   :  { %v7052_v41 = vpop.permute.xlu1 %1409 }
0x12a1   :  { %v1541_v54 = vadd.f32 %v6857_v40, %v7052_v41 }
0x12aa   :  { %v6341_v0 = vpop.eup %6340 }
0x12ab   :  { %v2217_v44 = vmul.f32 %v6341_v0, %v6339_v34  ;;  %v7133_v0 = vld [vmem:[%s7756_s15 + $0x10] sm:$0xff] }
0x12ad   :  { %5988 = vmatmul.mubr.msk.f32.vlgmr.msra.gmra.mxu0 %vm381_vm2, %v2217_v44  ;;  %v7147_v44 = vld [vmem:[%s7756_s15] sm:$0xff] }
0x12ae   :  { %6002 = vmatpush3.msra.mxu0 %v1541_v54  ;;  %6003 = vmatprep.mubr.msk.f32.mxu0 %vm6436_vm1, %v6434_v7  ;;  %v7162_v54 = vld [vmem:[%s7758_s17 + $0x38] sm:$0xff] }
0x12af   :  { %6006 = vmatprep.subr.mxu0 %v6434_v7 }
0x12b1   :  { %6004 = vmatmul.mubr.msk.f32.vlgmr.msra.gmra.mxu0 %vm381_vm2, %v2374_v55  ;;  %v7167_v55 = vld [vmem:[%s7758_s17 + $0x30] sm:$0xff] }
0x12b2   :  { %6008 = vmatprep.mubr.msk.f32.mxu0 %vm6436_vm1, %v6434_v7 }
0x136d   :  { %v2290_v56 = vpop.f32.mrf.mxu0 }
0x136f   :  { %v5989_v47 = vpop.f32.mrf.mxu0 }
0x1370   :  { %v7181_v47 = vld [vmem:[%s7758_s17 + $0x20] sm:$0xff] }
0x1371   :  { %v2446_v57 = vpop.f32.mrf.mxu0 }
0x1372   :  { %v2450_v40 = vsel %vm381_vm2, %v2446_v57, -inf }
0x1373   :  { %2451 = vmax.xlane.f32.xlu0 %v2450_v40  ;;  %v6005_v59 = vpop.f32.mrf.mxu0 }
0x1389   :  { %1429 = vperm.xlu0 %6310, %v99_v37  }
0x138d   :  { %2542 = vrot.lane.b32.xlu0 %v2290_v56, %s6437_s27  ;;  %v7174_v56 = vld [vmem:[%s7758_s17 + $0x28] sm:$0xff] }
0x13fc   :  { %v2452_v33 = vpop.xlane.xlu0 %2451 }
0x13fd   :  { %v2453_v61 = vsub.f32 %v2446_v57, %v2452_v33  ;;  %v7188_v57 = vld [vmem:[%s7758_s17 + $0x18] sm:$0xff]  ;;  %v5474_v33 = vld [vmem:[%s7755_s14 + $0x2] ss:$0 sm:$0xff] }
0x13ff   :  { %v2454_v63 = vmul.f32 1.442695, %v2453_v61 }
0x1401   :  { %6342 = vpow2.f32 %v2454_v63 }
0x1404   :  { %v7072_v1 = vpop.permute.xlu0 %1429 }
0x1405   :  { %v1561_v3 = vadd.f32 %v7006_v58, %v7072_v1  ;;  %v7086_v58 = vld [vmem:[%s7753_s12 + $0x18] sm:$0xff] }
0x1406   :  { %6012 = vmatpush3.msra.mxu1 %v7086_v58 }
0x1407   :  { %6007 = vmatpush3.xpose.msk.msra.mxu0 %vm381_vm2, %v1561_v3  ;;  %6013 = vmatprep.subr.mxu1 %v6434_v7  ;;  %v5475_v3 = vld [vmem:[%s7755_s14 + $0x3] ss:$0 sm:$0xff] }
0x1408   :  { %6022 = vmatprep.subr.mxu0 %v6434_v7  ;;  %6014 = vmatpush3.msra.mxu1 %v7091_v11  ;;  %v2543_v19 = vpop.permute.xlu0 %2542 }
0x1409   :  { %6015 = vmatprep.subr.mxu1 %v6434_v7 }
0x140a   :  { %6016 = vmatpush3.msra.mxu1 %v7098_v12 }
0x140b   :  { %6017 = vmatprep.subr.mxu1 %v6434_v7 }
0x140c   :  { %6018 = vmatpush3.msra.mxu1 %v7107_v13 }
0x140d   :  { %6033 = vmatprep.subr.mxu1 %v6434_v7 }
0x140e   :  { %v6343_v5 = vpop.eup %6342 }
0x140f   :  { %v2456_v6 = vsel %vm381_vm2, %v6343_v5, 0.0 }
0x1410   :  { %2457 = vadd.xlane.f32.xlu1 %v2456_v6 }
0x1421   :  { %2538 = vrot.lane.b32.xlu1 %v2047_v23, %s6438_s30 }
0x1499   :  { %v2458_v8 = vpop.xlane.xlu1 %2457 }
0x149a   :  { %6344 = vrcp.f32 %v2458_v8  ;;  %v6388_v8 = vld [vmem:[%s7745_s4] sm:$0xff] }
0x149d   :  { %v2539_v48 = vpop.permute.xlu1 %2538 }
0x149e   :  { %v2549_v20 = vsel %vm381_vm2, %v7008_v60, %v2539_v48  ;;  %v2953_v48 = vld [vmem:[%s7770_s28 + $0x8] sm:$0xff] }
0x149f   :  { %v2550_v23 = vsel %vm1284_vm3, %v2549_v20, %v2543_v19  ;;  %v6391_v19 = vld [vmem:[%s7745_s4 + $0x18] sm:$0xff]  ;;  %v2952_v20 = vld [vmem:[%s7770_s28] sm:$0xff] }
0x14a7   :  { %v6345_v9 = vpop.eup %6344 }
0x14a8   :  { %v2460_v10 = vmul.f32 %v6345_v9, %v6343_v5  ;;  %v2955_v9 = vld [vmem:[%s7770_s28 + $0x18] sm:$0xff] }
0x14aa   :  { %6009 = vmatmul.mubr.msk.f32.vlgmr.msra.gmra.mxu0 %vm381_vm2, %v2460_v10  ;;  %v6389_v10 = vld [vmem:[%s7745_s4 + $0x8] sm:$0xff] }
0x14ab   :  { %6030 = vmatprep.mubr.msk.f32.mxu0 %vm6436_vm1, %v6434_v7  ;;  %6023 = vmatpush3.msra.mxu0 %v7128_v39 }
0x14ac   :  { %6024 = vmatprep.subr.mxu0 %v6434_v7 }
0x14ad   :  { %6025 = vmatpush3.msra.mxu0 %v7133_v0 }
0x14ae   :  { %6026 = vmatprep.subr.mxu0 %v6434_v7 }
0x156a   :  { %v2533_v17 = vpop.f32.mrf.mxu0 }
0x156b   :  { %2546 = vrot.lane.b32.xlu0 %v2533_v17, %s6439_s5  ;;  %v2954_v17 = vld [vmem:[%s7770_s28 + $0x10] sm:$0xff] }
0x156c   :  { %v6010_v18 = vpop.f32.mrf.mxu0 }
0x156d   :  { %v6390_v18 = vld [vmem:[%s7745_s4 + $0x10] sm:$0xff] }
0x15dd   :  { %v2547_v25 = vpop.permute.xlu0 %2546 }
0x15de   :  { %v2551_v26 = vsel %vm1286_vm4, %v2550_v23, %v2547_v25  ;;  %v6392_v23 = vld [vmem:[%s7745_s4 + $0x20] sm:$0xff]  ;;  %v6393_v25 = vld [vmem:[%s7745_s4 + $0x28] sm:$0xff] }
0x15df   :  { %6020 = vmatmul.mubr.msk.f32.vlgmr.msra.gmra.mxu1 %vm167_vm0, %v2551_v26  ;;  %v6394_v26 = vld [vmem:[%s7745_s4 + $0x30] sm:$0xff] }
0x15e0   :  { %6049 = vmatprep.mubr.msk.f32.mxu1 %vm6436_vm1, %v6434_v7  ;;  %6034 = vmatpush3.msra.mxu1 %v7162_v54 }
0x15e1   :  { %6035 = vmatprep.subr.mxu1 %v6434_v7 }
0x15e2   :  { %6036 = vmatpush3.msra.mxu1 %v7167_v55 }
0x15e3   :  { %6037 = vmatprep.subr.mxu1 %v6434_v7 }
0x15e4   :  { %6038 = vmatpush3.msra.mxu1 %v7174_v56 }
0x15e5   :  { %6039 = vmatprep.subr.mxu1 %v6434_v7 }
0x15e6   :  { %6040 = vmatpush3.msra.mxu1 %v7181_v47 }
0x15e7   :  { %6041 = vmatprep.subr.mxu1 %v6434_v7 }
0x15e8   :  { %6042 = vmatpush3.msra.mxu1 %v7188_v57 }
0x15e9   :  { %6043 = vmatprep.subr.mxu1 %v6434_v7 }
0x169f   :  { %v2627_v27 = vpop.f32.mrf.mxu1 }
0x16a0   :  { %v2628_v28 = vadd.f32 %v5472_v43, %v2627_v27  ;;  %v6395_v43 = vld [vmem:[%s7745_s4 + $0x38] sm:$0xff]  ;;  %v7264_v27 = vld [vmem:[%s7758_s17 + $0x10] sm:$0xff] }
0x16a1   :  { %v6021_v29 = vpop.f32.mrf.mxu1  ;;  %6044 = vmatpush3.msra.mxu1 %v7264_v27 }
0x16a2   :  { %v2631_v30 = vadd.f32 %v2628_v28, %v6893_v4  ;;  %v7140_v4 = vld [vmem:[%s7756_s15 + $0x8] sm:$0xff]  ;;  %6045 = vmatprep.subr.mxu1 %v6434_v7  ;;  %v7277_v29 = vld [vmem:[%s7758_s17] sm:$0xff] }
0x16a3   :  { %6027 = vmatpush3.msra.mxu0 %v7140_v4  ;;  %v7271_v28 = vld [vmem:[%s7758_s17 + $0x8] sm:$0xff] }
0x16a4   :  { %v2632_v60 = vsel %vm167_vm0, %v2631_v30, 0.0  ;;  %6028 = vmatprep.subr.mxu0 %v6434_v7  ;;  %6046 = vmatpush3.msra.mxu1 %v7271_v28 }
0x16a5   :  { %2633 = vadd.xlane.f32.xlu0 %v2632_v60  ;;  %6029 = vmatpush3.msra.mxu0 %v7147_v44 }
0x16a6   :  { %6052 = vmatprep.subr.msk.mxu0 %vm167_vm0, %v7155_v50  ;;  %6047 = vmatprep.subr.mxu1 %v6434_v7 }
0x16a7   :  { %6048 = vmatpush3.msra.mxu1 %v7277_v29 }
0x16a8   :  { %6077 = vmatprep.subr.mxu1 %v6434_v7 }
0x172e   :  { %v2634_v31 = vpop.xlane.xlu0 %2633 }
0x172f   :  { %v2635_v62 = vmul.f32 0.03125, %v2634_v31 }
0x1731   :  { %v2636_v34 = vsub.f32 %v2631_v30, %v2635_v62  ;;  %v7285_v30 = vld [vmem:[%s7757_s16] ss:$0 sm:$0xff] }
0x1733   :  { %v2637_v35 = vmul.f32 %v2636_v34, %v2636_v34  ;;  %v2646_v61 = vmul.f32 %v5474_v33, %v2636_v34 }
0x1735   :  { %v2638_v36 = vsel %vm167_vm0, %v2637_v35, 0.0 }
0x1736   :  { %2639 = vadd.xlane.f32.xlu1 %v2638_v36 }
0x17bf   :  { %v2640_v40 = vpop.xlane.xlu1 %2639 }
0x17c0   :  { %v2641_v59 = vmul.f32 0.03125, %v2640_v40 }
0x17c2   :  { %v2647_v37 = vadd.f32 1e-12, %v2641_v59 }
0x17c4   :  { %6346 = vrsqrt.f32 %v2647_v37 }
0x17d1   :  { %v6347_v63 = vpop.eup %6346 }
0x17d2   :  { %v2649_v5 = vmul.f32 %v6347_v63, %v2646_v61 }
0x17d4   :  { %v7200_v6 = vadd.f32 %v5475_v3, %v2649_v5  ;;  %v5493_v5 = vld [vmem:[%s7771_s21] ss:$0 sm:$0xff] }
0x17d6   :  { %6031 = vmatmul.mubr.msk.f32.vlgmr.msra.gmra.mxu0 %vm167_vm0, %v7200_v6 }
0x17d7   :  { %6053 = vmatpush3.xpose.msk.msra.mxu0 %vm167_vm0, %v7155_v50  ;;  %6054 = vmatprep.mubr.msk.f32.mxu0 %vm167_vm0, %v6388_v8 }
0x17d8   :  { %6066 = vmatprep.subr.mxu0 %v6434_v7 }
0x17da   :  { %6055 = vmatmul.mubr.msk.f32.vlgmr.msra.gmra.mxu0 %vm167_vm0, %v6389_v10 }
0x17db   :  { %6067 = vmatpush3.msra.mxu0 %v2955_v9  ;;  %6057 = vmatprep.mubr.msk.f32.mxu0 %vm167_vm0, %v6390_v18  ;;  %v5500_v18 = vld [vmem:[%s7770_s28 + $0x30] sm:$0xff] }
0x17dc   :  { %6068 = vmatprep.subr.mxu0 %v6434_v7 }
0x17dd   :  { %6069 = vmatpush3.msra.mxu0 %v2954_v17  ;;  %v5501_v17 = vld [vmem:[%s7770_s28 + $0x38] sm:$0xff] }
0x17de   :  { %6058 = vmatmul.mubr.msk.f32.gmra.mxu0 %vm167_vm0, %v6391_v19  ;;  %6070 = vmatprep.subr.mxu0 %v6434_v7 }
0x17df   :  { %6060 = vmatprep.mubr.msk.f32.mxu0 %vm167_vm0, %v6392_v23  ;;  %6071 = vmatpush3.msra.mxu0 %v2953_v48  ;;  %v5498_v48 = vld [vmem:[%s7770_s28 + $0x20] sm:$0xff] }
0x17e0   :  { %6072 = vmatprep.subr.mxu0 %v6434_v7 }
0x17e1   :  { %6073 = vmatpush3.msra.mxu0 %v2952_v20 }
0x17e2   :  { %6061 = vmatmul.mubr.msk.f32.gmra.mxu0 %vm167_vm0, %v6393_v25  ;;  %6087 = vmatprep.subr.mxu0 %v6434_v7 }
0x17e3   :  { %6063 = vmatprep.mubr.msk.f32.mxu0 %vm167_vm0, %v6394_v26 }
0x17e6   :  { %6064 = vmatmul.mubr.msk.f32.gmra.mxu0 %vm167_vm0, %v6395_v43 }
0x17e7   :  { %6074 = vmatprep.mubr.msk.f32.mxu0 %vm6436_vm1, %v6434_v7 }
0x17ea   :  { %6075 = vmatmul.mubr.msk.f32.vlgmr.msra.gmra.mxu0 %vm167_vm0, %v7155_v50 }
0x17eb   :  { %6095 = vmatprep.mubr.msk.f32.mxu0 %vm6436_vm1, %v6434_v7  ;;  %6088 = vmatpush3.msra.mxu0 %v5501_v17 }
0x17ec   :  { %6089 = vmatprep.subr.mxu0 %v6434_v7 }
0x17ed   :  { %6090 = vmatpush3.msra.mxu0 %v5500_v18 }
0x17ee   :  { %6091 = vmatprep.subr.mxu0 %v6434_v7 }
0x1896   :  { %v2730_v60 = vpop.f32.mrf.mxu0 }
0x1897   :  { %v2731_v31 = vadd.f32 %v7285_v30, %v2730_v60 }
0x1898   :  { %v6032_v62 = vpop.f32.mrf.mxu0 }
0x1899   :  { %v2734_v34 = vmax.f32 %v2731_v31, 0.0 }
0x189a   :  { %v6056_v35 = vpop.f32.mrf.mxu0 }
0x189b   :  { %6050 = vmatmul.mubr.msk.f32.vlgmr.msra.gmra.mxu1 %vm2741_vm5, %v2734_v34 }
0x189c   :  { %v2913_v36 = vpop.f32.mrf.mxu0  ;;  %6079 = vmatprep.mubr.msk.f32.mxu1 %vm6436_vm1, %v6434_v7 }
0x189d   :  { %v2914_v40 = vadd.f32 %v2913_v36, %v6609_v15 }
0x189e   :  { %v7292_v59 = vpop.f32.mrf.mxu0 }
0x189f   :  { %6078 = vmatpush3.msra.mxu1 %v2914_v40 }
0x18a0   :  { %v7294_v37 = vpop.f32.mrf.mxu0  ;;  %6082 = vmatprep.subr.mxu1 %v6434_v7 }
0x18a2   :  { %v6062_v33 = vpop.f32.mrf.mxu0 }
0x18a3   :  { %v2939_v17 = vadd.f32 %v6062_v33, %v6664_v42  ;;  %v5509_v42 = vld [vmem:[%s7770_s28 + $0x48] sm:$0xff]  ;;  %v5508_v33 = vld [vmem:[%s7770_s28 + $0x40] sm:$0xff] }
0x18a4   :  { %v2933_v61 = vpop.f32.mrf.mxu0 }
0x18a5   :  { %v2934_v15 = vadd.f32 %v2933_v61, %v6622_v24  ;;  %v5499_v24 = vld [vmem:[%s7770_s28 + $0x28] sm:$0xff] }
0x18a6   :  { %v7297_v63 = vpop.f32.mrf.mxu0  ;;  %6092 = vmatpush3.msra.mxu0 %v5499_v24 }
0x18a7   :  { %6093 = vmatprep.subr.mxu0 %v6434_v7 }
0x18a8   :  { %v7299_v3 = vpop.f32.mrf.mxu0  ;;  %6094 = vmatpush3.msra.mxu0 %v5498_v48 }
0x18a9   :  { %6096 = vmatmul.mubr.msk.f32.vlgmr.msra.gmra.mxu0 %vm167_vm0, %v7155_v50  ;;  %6108 = vmatprep.subr.mxu0 %v6434_v7 }
0x18aa   :  { %v3029_v8 = vpop.f32.mrf.mxu0  ;;  %6116 = vmatprep.mubr.msk.f32.mxu0 %vm6436_vm1, %v6434_v7 }
0x18ab   :  { %v3030_v9 = vadd.f32 %v5493_v5, %v3029_v8  ;;  %v5503_v8 = vld [vmem:[%s7771_s21 + $0x1] ss:$0 sm:$0xff] }
0x18ac   :  { %v6076_v10 = vpop.f32.mrf.mxu0 }
0x18ad   :  { %6080 = vmatmul.mubr.msk.f32.vlgmr.msra.gmra.mxu1 %vm381_vm2, %v3030_v9 }
0x18ae   :  { %6083 = vmatpush3.xpose.msk.msra.mxu1 %vm381_vm2, %v2934_v15  ;;  %6084 = vmatprep.mubr.msk.f32.mxu1 %vm6436_vm1, %v6434_v7  ;;  %v2919_v15 = vadd.f32 %v6056_v35, %v6675_v52  ;;  %v5511_v52 = vld [vmem:[%s7770_s28 + $0x58] sm:$0xff]  ;;  %v5510_v35 = vld [vmem:[%s7770_s28 + $0x50] sm:$0xff] }
0x18af   :  { %6098 = vmatprep.subr.mxu1 %v6434_v7  ;;  %6109 = vmatpush3.msra.mxu0 %v5511_v52  ;;  %v6398_v52 = vld [vmem:[%s7747_s6 + $0x8] sm:$0xff] }
0x18b0   :  { %6110 = vmatprep.subr.mxu0 %v6434_v7 }
0x18b1   :  { %6111 = vmatpush3.msra.mxu0 %v5510_v35  ;;  %v6399_v35 = vld [vmem:[%s7747_s6] sm:$0xff] }
0x18b2   :  { %6112 = vmatprep.subr.mxu0 %v6434_v7 }
0x18b3   :  { %6113 = vmatpush3.msra.mxu0 %v5509_v42 }
0x18b4   :  { %6114 = vmatprep.subr.mxu0 %v6434_v7 }
0x18b5   :  { %6115 = vmatpush3.msra.mxu0 %v5508_v33 }
0x18b6   :  { %6117 = vmatmul.mubr.msk.f32.vlgmr.msra.gmra.mxu0 %vm167_vm0, %v7155_v50  ;;  %6129 = vmatprep.subr.mxu0 %v6434_v7 }
0x18b7   :  { %6137 = vmatprep.mubr.msk.f32.mxu0 %vm6436_vm1, %v6434_v7 }
0x195b   :  { %v7330_v19 = vpop.f32.mrf.mxu1 }
0x195d   :  { %v6051_v20 = vpop.f32.mrf.mxu1 }
0x1969   :  { %v3270_v36 = vpop.f32.mrf.mxu0 }
0x196a   :  { %v3271_v10 = vadd.f32 %v5503_v8, %v3270_v36  ;;  %v2924_v8 = vadd.f32 %v7294_v37, %v6716_v14  ;;  %v5521_v14 = vld [vmem:[%s7770_s28 + $0x78] sm:$0xff]  ;;  %v5520_v37 = vld [vmem:[%s7770_s28 + $0x70] sm:$0xff] }
0x196b   :  { %v6097_v40 = vpop.f32.mrf.mxu0  ;;  %6130 = vmatpush3.msra.mxu0 %v5521_v14 }
0x196c   :  { %6131 = vmatprep.subr.mxu0 %v6434_v7 }
0x196d   :  { %v3102_v23 = vpop.f32.mrf.mxu1  ;;  %6132 = vmatpush3.msra.mxu0 %v5520_v37 }
0x196e   :  { %v3106_v25 = vsel %vm381_vm2, %v3102_v23, -inf  ;;  %6133 = vmatprep.subr.mxu0 %v6434_v7 }
0x196f   :  { %3107 = vmax.xlane.f32.xlu0 %v3106_v25  ;;  %v6081_v26 = vpop.f32.mrf.mxu1 }
0x19f8   :  { %v3108_v43 = vpop.xlane.xlu0 %3107 }
0x19f9   :  { %v3109_v60 = vsub.f32 %v3102_v23, %v3108_v43 }
0x19fb   :  { %v3110_v31 = vmul.f32 1.442695, %v3109_v60 }
0x19fd   :  { %6348 = vpow2.f32 %v3110_v31 }
0x1a0a   :  { %v6349_v62 = vpop.eup %6348 }
0x1a0b   :  { %v3112_v34 = vsel %vm381_vm2, %v6349_v62, 0.0 }
0x1a0c   :  { %3113 = vadd.xlane.f32.xlu0 %v3112_v34 }
0x1a95   :  { %v3114_v61 = vpop.xlane.xlu0 %3113 }
0x1a96   :  { %6350 = vrcp.f32 %v3114_v61  ;;  %v5513_v61 = vld [vmem:[%s7771_s21 + $0x2] ss:$0 sm:$0xff] }
0x1aa3   :  { %v6351_v5 = vpop.eup %6350 }
0x1aa4   :  { %v3116_v9 = vmul.f32 %v6351_v5, %v6349_v62  ;;  %v3511_v62 = vpop.f32.mrf.mxu0 }
0x1aa6   :  { %6085 = vmatmul.mubr.msk.f32.vlgmr.msra.gmra.mxu1 %vm381_vm2, %v3116_v9  ;;  %v6118_v34 = vpop.f32.mrf.mxu0  ;;  %v3512_v9 = vadd.f32 %v5513_v61, %v3511_v62 }
0x1aa7   :  { %6099 = vmatpush3.msra.mxu1 %v2919_v15  ;;  %6100 = vmatprep.mubr.msk.f32.mxu1 %vm6436_vm1, %v6434_v7  ;;  %v2944_v15 = vadd.f32 %v7299_v3, %v6756_v38  ;;  %v5519_v38 = vld [vmem:[%s7770_s28 + $0x68] sm:$0xff]  ;;  %v5518_v3 = vld [vmem:[%s7770_s28 + $0x60] sm:$0xff] }
0x1aa8   :  { %6103 = vmatprep.subr.mxu1 %v6434_v7  ;;  %6134 = vmatpush3.msra.mxu0 %v5519_v38 }
0x1aa9   :  { %6135 = vmatprep.subr.mxu0 %v6434_v7 }
0x1aaa   :  { %6101 = vmatmul.mubr.msk.f32.vlgmr.msra.gmra.mxu1 %vm381_vm2, %v3271_v10  ;;  %6136 = vmatpush3.msra.mxu0 %v5518_v3  ;;  %v6396_v10 = vld [vmem:[%s7747_s6 + $0x18] sm:$0xff] }
0x1aab   :  { %6104 = vmatpush3.xpose.msk.msra.mxu1 %vm381_vm2, %v2939_v17  ;;  %6105 = vmatprep.mubr.msk.f32.mxu1 %vm6436_vm1, %v6434_v7  ;;  %v6397_v17 = vld [vmem:[%s7747_s6 + $0x10] sm:$0xff] }
0x1aac   :  { %6119 = vmatprep.subr.mxu1 %v6434_v7  ;;  %6138 = vmatmul.mubr.msk.f32.vlgmr.msra.gmra.mxu0 %vm167_vm0, %v7155_v50 }
0x1aad   :  { %6150 = vmatprep.subr.mxu0 %v6434_v7  ;;  %6158 = vmatprep.mubr.msk.f32.mxu0 %vm6436_vm1, %v6434_v7 }
0x1aae   :  { %6151 = vmatpush3.msra.mxu0 %v6396_v10 }
0x1aaf   :  { %6152 = vmatprep.subr.mxu0 %v6434_v7 }
0x1ab0   :  { %6153 = vmatpush3.msra.mxu0 %v6397_v17  ;;  %v5483_v17 = vld [vmem:[%s7772_s0 + $0x8] sm:$0xff] }
0x1ab1   :  { %6154 = vmatprep.subr.mxu0 %v6434_v7 }
0x1ab2   :  { %6155 = vmatpush3.msra.mxu0 %v6398_v52 }
0x1ab3   :  { %6156 = vmatprep.subr.mxu0 %v6434_v7 }
0x1ab4   :  { %6157 = vmatpush3.msra.mxu0 %v6399_v35 }
0x1ab5   :  { %6175 = vmatprep.subr.mxu0 %v6434_v7 }
0x1b66   :  { %v7368_v18 = vpop.f32.mrf.mxu1 }
0x1b68   :  { %v6086_v24 = vpop.f32.mrf.mxu1 }
0x1b6a   :  { %v3343_v48 = vpop.f32.mrf.mxu1 }
0x1b6b   :  { %v3347_v20 = vsel %vm381_vm2, %v3343_v48, -inf }
0x1b6c   :  { %3348 = vmax.xlane.f32.xlu0 %v3347_v20  ;;  %v6102_v23 = vpop.f32.mrf.mxu1 }
0x1bf5   :  { %v3349_v25 = vpop.xlane.xlu0 %3348 }
0x1bf6   :  { %v3350_v26 = vsub.f32 %v3343_v48, %v3349_v25 }
0x1bf8   :  { %v3351_v43 = vmul.f32 1.442695, %v3350_v26 }
0x1bfa   :  { %6352 = vpow2.f32 %v3351_v43 }
0x1c07   :  { %v6353_v60 = vpop.eup %6352 }
0x1c08   :  { %v3353_v31 = vsel %vm381_vm2, %v6353_v60, 0.0 }
0x1c09   :  { %3354 = vadd.xlane.f32.xlu1 %v3353_v31  ;;  %v3752_v31 = vpop.f32.mrf.mxu0 }
0x1c0b   :  { %v6139_v62 = vpop.f32.mrf.mxu0 }
0x1c92   :  { %v3355_v36 = vpop.xlane.xlu1 %3354 }
0x1c93   :  { %6354 = vrcp.f32 %v3355_v36 }
0x1ca0   :  { %v6355_v40 = vpop.eup %6354 }
0x1ca1   :  { %v3357_v5 = vmul.f32 %v6355_v40, %v6353_v60  ;;  %v5523_v40 = vld [vmem:[%s7771_s21 + $0x3] ss:$0 sm:$0xff] }
0x1ca3   :  { %6106 = vmatmul.mubr.msk.f32.vlgmr.msra.gmra.mxu1 %vm381_vm2, %v3357_v5  ;;  %v2929_v5 = vadd.f32 %v7292_v59, %v6763_v46 }
0x1ca4   :  { %6120 = vmatpush3.msra.mxu1 %v2924_v8  ;;  %6121 = vmatprep.mubr.msk.f32.mxu1 %vm6436_vm1, %v6434_v7  ;;  %v3753_v8 = vadd.f32 %v5523_v40, %v3752_v31 }
0x1ca5   :  { %6124 = vmatprep.subr.mxu1 %v6434_v7 }
0x1ca7   :  { %6122 = vmatmul.mubr.msk.f32.vlgmr.msra.gmra.mxu1 %vm381_vm2, %v3512_v9  ;;  %v2949_v9 = vadd.f32 %v7297_v63, %v6784_v2 }
0x1ca8   :  { %6125 = vmatpush3.xpose.msk.msra.mxu1 %vm381_vm2, %v2944_v15  ;;  %6126 = vmatprep.mubr.msk.f32.mxu1 %vm6436_vm1, %v6434_v7 }
0x1ca9   :  { %6140 = vmatprep.subr.mxu1 %v6434_v7 }
0x1d63   :  { %v3430_v42 = vpop.f32.mrf.mxu1 }
0x1d65   :  { %v6107_v33 = vpop.f32.mrf.mxu1 }
0x1d66   :  { %v6400_v33 = vld [vmem:[%s7751_s10] sm:$0xff] }
0x1d67   :  { %v3584_v24 = vpop.f32.mrf.mxu1 }
0x1d68   :  { %v3588_v48 = vsel %vm381_vm2, %v3584_v24, -inf }
0x1d69   :  { %3589 = vmax.xlane.f32.xlu0 %v3588_v48  ;;  %v6123_v20 = vpop.f32.mrf.mxu1  ;;  %v6402_v48 = vld [vmem:[%s7751_s10 + $0x10] sm:$0xff] }
0x1d6a   :  { %v6403_v20 = vld [vmem:[%s7751_s10 + $0x18] sm:$0xff] }
0x1df2   :  { %v3590_v23 = vpop.xlane.xlu0 %3589 }
0x1df3   :  { %v3591_v25 = vsub.f32 %v3584_v24, %v3590_v23  ;;  %v6401_v24 = vld [vmem:[%s7751_s10 + $0x8] sm:$0xff]  ;;  %v6404_v23 = vld [vmem:[%s7751_s10 + $0x20] sm:$0xff] }
0x1df5   :  { %v3592_v26 = vmul.f32 1.442695, %v3591_v25  ;;  %v6405_v25 = vld [vmem:[%s7751_s10 + $0x28] sm:$0xff] }
0x1df7   :  { %6356 = vpow2.f32 %v3592_v26 }
0x1e04   :  { %v6357_v43 = vpop.eup %6356 }
0x1e05   :  { %v3594_v60 = vsel %vm381_vm2, %v6357_v43, 0.0 }
0x1e06   :  { %3595 = vadd.xlane.f32.xlu1 %v3594_v60 }
0x1e8f   :  { %v3596_v34 = vpop.xlane.xlu1 %3595 }
0x1e90   :  { %6358 = vrcp.f32 %v3596_v34 }
0x1e9d   :  { %v6359_v36 = vpop.eup %6358 }
0x1e9e   :  { %v3598_v61 = vmul.f32 %v6359_v36, %v6357_v43 }
0x1ea0   :  { %6127 = vmatmul.mubr.msk.f32.vlgmr.msra.gmra.mxu1 %vm381_vm2, %v3598_v61 }
0x1ea1   :  { %6141 = vmatpush3.msra.mxu1 %v2929_v5  ;;  %6142 = vmatprep.mubr.msk.f32.mxu1 %vm6436_vm1, %v6434_v7 }
0x1ea2   :  { %6145 = vmatprep.subr.mxu1 %v6434_v7 }
0x1ea4   :  { %6143 = vmatmul.mubr.msk.f32.vlgmr.msra.gmra.mxu1 %vm381_vm2, %v3753_v8 }
0x1ea5   :  { %6146 = vmatpush3.xpose.msk.msra.mxu1 %vm381_vm2, %v2949_v9  ;;  %6147 = vmatprep.mubr.msk.f32.mxu1 %vm6436_vm1, %v6434_v7 }
0x1ea6   :  { %6161 = vmatprep.subr.msk.mxu1 %vm167_vm0, %v5483_v17 }
0x1f60   :  { %v3671_v46 = vpop.f32.mrf.mxu1 }
0x1f62   :  { %v6128_v59 = vpop.f32.mrf.mxu1 }
0x1f63   :  { %v6406_v59 = vld [vmem:[%s7748_s7] ss:$0 sm:$0xff] }
0x1f64   :  { %v3825_v15 = vpop.f32.mrf.mxu1 }
0x1f65   :  { %v3829_v14 = vsel %vm381_vm2, %v3825_v15, -inf }
0x1f66   :  { %3830 = vmax.xlane.f32.xlu0 %v3829_v14  ;;  %v6144_v37 = vpop.f32.mrf.mxu1 }
0x1f7c   :  { %3917 = vrot.lane.b32.xlu0 %v3430_v42, %s6438_s30 }
0x1fef   :  { %v3831_v38 = vpop.xlane.xlu0 %3830 }
0x1ff0   :  { %v3832_v3 = vsub.f32 %v3825_v15, %v3831_v38 }
0x1ff2   :  { %v3833_v10 = vmul.f32 1.442695, %v3832_v3 }
0x1ff4   :  { %6360 = vpow2.f32 %v3833_v10 }
0x2001   :  { %v6361_v2 = vpop.eup %6360 }
0x2002   :  { %v3835_v63 = vsel %vm381_vm2, %v6361_v2, 0.0 }
0x2003   :  { %3836 = vadd.xlane.f32.xlu1 %v3835_v63 }
0x2014   :  { %3921 = vrot.lane.b32.xlu1 %v3671_v46, %s6437_s27 }
0x208c   :  { %v3837_v52 = vpop.xlane.xlu1 %3836 }
0x208d   :  { %6362 = vrcp.f32 %v3837_v52  ;;  %v4130_v52 = vld [vmem:[%s7749_s8 + $0x10] sm:$0xff] }
0x2090   :  { %v3922_v61 = vpop.permute.xlu1 %3921 }
0x209a   :  { %v6363_v35 = vpop.eup %6362 }
0x209b   :  { %v3839_v42 = vmul.f32 %v6363_v35, %v6361_v2  ;;  %v4128_v35 = vld [vmem:[%s7749_s8] sm:$0xff] }
0x209d   :  { %6148 = vmatmul.mubr.msk.f32.vlgmr.msra.gmra.mxu1 %vm381_vm2, %v3839_v42 }
0x209e   :  { %6162 = vmatpush3.xpose.msk.msra.mxu1 %vm167_vm0, %v5483_v17  ;;  %6163 = vmatprep.mubr.msk.f32.mxu1 %vm167_vm0, %v6400_v33  ;;  %v4131_v17 = vld [vmem:[%s7749_s8 + $0x18] sm:$0xff] }
0x209f   :  { %6191 = vmatprep.subr.mxu1 %v6434_v7 }
0x20a1   :  { %6164 = vmatmul.mubr.msk.f32.vlgmr.msra.gmra.mxu1 %vm167_vm0, %v6401_v24 }
0x20a2   :  { %6166 = vmatprep.mubr.msk.f32.mxu1 %vm167_vm0, %v6402_v48  ;;  %v6407_v48 = vld [vmem:[%s7755_s14] ss:$0 sm:$0xff] }
0x20a5   :  { %6167 = vmatmul.mubr.msk.f32.gmra.mxu1 %vm167_vm0, %v6403_v20 }
0x20a6   :  { %6169 = vmatprep.mubr.msk.f32.mxu1 %vm167_vm0, %v6404_v23 }
0x20a9   :  { %6170 = vmatmul.mubr.msk.f32.gmra.mxu1 %vm167_vm0, %v6405_v25 }
0x20aa   :  { %6172 = vmatprep.mubr.msk.f32.mxu1 %vm167_vm0, %v6979_v45 }
0x20ad   :  { %6173 = vmatmul.mubr.msk.f32.gmra.mxu1 %vm167_vm0, %v6986_v49  ;;  %v3918_v49 = vpop.permute.xlu0 %3917 }
0x20ae   :  { %6193 = vmatprep.mubr.msk.f32.mxu1 %vm6436_vm1, %v6434_v7  ;;  %v3928_v5 = vsel %vm381_vm2, %v7368_v18, %v3918_v49 }
0x20af   :  { %v3929_v8 = vsel %vm1284_vm3, %v3928_v5, %v3922_v61  ;;  %v5546_v5 = vld [vmem:[%s7749_s8 + $0x38] sm:$0xff] }
0x215d   :  { %v3912_v26 = vpop.f32.mrf.mxu1 }
0x215e   :  { %3925 = vrot.lane.b32.xlu1 %v3912_v26, %s6439_s5  ;;  %v6408_v26 = vld [vmem:[%s7755_s14 + $0x1] ss:$0 sm:$0xff] }
0x215f   :  { %v6149_v43 = vpop.f32.mrf.mxu1 }
0x2161   :  { %v7483_v60 = vpop.f32.mrf.mxu1 }
0x2163   :  { %v4089_v31 = vpop.f32.mrf.mxu1 }
0x2165   :  { %v7485_v62 = vpop.f32.mrf.mxu1 }
0x2167   :  { %v7487_v34 = vpop.f32.mrf.mxu1 }
0x2169   :  { %v7489_v36 = vpop.f32.mrf.mxu1 }
0x216b   :  { %v4109_v45 = vpop.f32.mrf.mxu1 }
0x216c   :  { %v4110_v40 = vadd.f32 %v4109_v45, %v6866_v51  ;;  %v4090_v45 = vadd.f32 %v4089_v31, %v6864_v22  ;;  %v5545_v31 = vld [vmem:[%s7749_s8 + $0x30] sm:$0xff] }
0x216e   :  { %6192 = vmatpush3.xpose.msk.msra.mxu1 %vm381_vm2, %v4110_v40  ;;  %v5538_v40 = vld [vmem:[%s7750_s9] ss:$0 sm:$0xff] }
0x216f   :  { %6207 = vmatprep.subr.mxu1 %v6434_v7 }
0x21d0   :  { %v3926_v9 = vpop.permute.xlu1 %3925 }
0x21d1   :  { %v3930_v46 = vsel %vm1286_vm4, %v3929_v8, %v3926_v9  ;;  %v5544_v8 = vld [vmem:[%s7749_s8 + $0x28] sm:$0xff]  ;;  %v5543_v9 = vld [vmem:[%s7749_s8 + $0x20] sm:$0xff] }
0x21d2   :  { %6159 = vmatmul.mubr.msk.f32.vlgmr.msra.gmra.mxu0 %vm167_vm0, %v3930_v46  ;;  %v5556_v46 = vld [vmem:[%s7749_s8 + $0x58] sm:$0xff] }
0x21d3   :  { %6183 = vmatprep.mubr.msk.f32.mxu0 %vm6436_vm1, %v6434_v7  ;;  %6176 = vmatpush3.msra.mxu0 %v4131_v17 }
0x21d4   :  { %6177 = vmatprep.subr.mxu0 %v6434_v7 }
0x21d5   :  { %6178 = vmatpush3.msra.mxu0 %v4130_v52 }
0x21d6   :  { %6179 = vmatprep.subr.mxu0 %v6434_v7 }
0x2292   :  { %v4000_v51 = vpop.f32.mrf.mxu0 }
0x2293   :  { %v4001_v15 = vadd.f32 %v6406_v59, %v4000_v51  ;;  %v5555_v51 = vld [vmem:[%s7749_s8 + $0x50] sm:$0xff]  ;;  %v5554_v59 = vld [vmem:[%s7749_s8 + $0x48] sm:$0xff] }
0x2294   :  { %v6160_v14 = vpop.f32.mrf.mxu0 }
0x2295   :  { %v4004_v37 = vadd.f32 %v7155_v50, %v4001_v15  ;;  %v4129_v50 = vld [vmem:[%s7749_s8 + $0x8] sm:$0xff]  ;;  %v5553_v15 = vld [vmem:[%s7749_s8 + $0x40] sm:$0xff]  ;;  %v5566_v14 = vld [vmem:[%s7749_s8 + $0x78] sm:$0xff] }
0x2296   :  { %6180 = vmatpush3.msra.mxu0 %v4129_v50 }
0x2297   :  { %v4005_v18 = vsel %vm167_vm0, %v4004_v37, 0.0  ;;  %6181 = vmatprep.subr.mxu0 %v6434_v7 }
0x2298   :  { %4006 = vadd.xlane.f32.xlu0 %v4005_v18  ;;  %6182 = vmatpush3.msra.mxu0 %v4128_v35  ;;  %v5564_v18 = vld [vmem:[%s7749_s8 + $0x68] sm:$0xff] }
0x2299   :  { %6186 = vmatprep.subr.mxu0 %v6434_v7 }
0x2321   :  { %v4007_v38 = vpop.xlane.xlu0 %4006 }
0x2322   :  { %v4008_v3 = vmul.f32 0.03125, %v4007_v38  ;;  %v5563_v38 = vld [vmem:[%s7749_s8 + $0x60] sm:$0xff] }
0x2324   :  { %v4009_v10 = vsub.f32 %v4004_v37, %v4008_v3  ;;  %v5565_v37 = vld [vmem:[%s7749_s8 + $0x70] sm:$0xff] }
0x2326   :  { %v4010_v2 = vmul.f32 %v4009_v10, %v4009_v10  ;;  %v4015_v20 = vmul.f32 %v6407_v48, %v4009_v10 }
0x2328   :  { %v4011_v63 = vsel %vm167_vm0, %v4010_v2, 0.0 }
0x2329   :  { %4012 = vadd.xlane.f32.xlu1 %v4011_v63 }
0x23b2   :  { %v4013_v42 = vpop.xlane.xlu1 %4012 }
0x23b3   :  { %v4014_v33 = vmul.f32 0.03125, %v4013_v42 }
0x23b5   :  { %v4016_v24 = vadd.f32 1e-12, %v4014_v33 }
0x23b7   :  { %6364 = vrsqrt.f32 %v4016_v24 }
0x23c4   :  { %v6365_v23 = vpop.eup %6364 }
0x23c5   :  { %v4018_v25 = vmul.f32 %v6365_v23, %v4015_v20  ;;  %v4095_v23 = vadd.f32 %v7483_v60, %v6992_v53  ;;  %v6174_v53 = vpop.f32.mrf.mxu1 }
0x23c7   :  { %v7529_v43 = vadd.f32 %v6408_v26, %v4018_v25  ;;  %v5548_v25 = vld [vmem:[%s7750_s9 + $0x1] ss:$0 sm:$0xff]  ;;  %v4119_v60 = vpop.f32.mrf.mxu1 }
0x23c9   :  { %6184 = vmatmul.mubr.msk.f32.vlgmr.msra.gmra.mxu0 %vm167_vm0, %v7529_v43 }
0x23ca   :  { %6187 = vmatpush3.msra.mxu0 %v4090_v45  ;;  %6188 = vmatprep.mubr.msk.f32.mxu0 %vm6436_vm1, %v6434_v7  ;;  %v4115_v45 = vadd.f32 %v7489_v36, %v7014_v21 }
0x23cb   :  { %6196 = vmatprep.subr.mxu0 %v6434_v7 }
0x2489   :  { %v4208_v49 = vpop.f32.mrf.mxu0 }
0x248a   :  { %v4209_v61 = vadd.f32 %v5538_v40, %v4208_v49 }
0x248b   :  { %v6185_v22 = vpop.f32.mrf.mxu0 }
0x248c   :  { %6189 = vmatmul.mubr.msk.f32.vlgmr.msra.gmra.mxu0 %vm381_vm2, %v4209_v61 }
0x248d   :  { %6197 = vmatpush3.msra.mxu0 %v5546_v5  ;;  %6204 = vmatprep.mubr.msk.f32.mxu0 %vm6436_vm1, %v6434_v7 }
0x248e   :  { %6198 = vmatprep.subr.mxu0 %v6434_v7 }
0x248f   :  { %6199 = vmatpush3.msra.mxu0 %v5545_v31 }
0x2490   :  { %6200 = vmatprep.subr.mxu0 %v6434_v7 }
0x2491   :  { %6201 = vmatpush3.msra.mxu0 %v5544_v8 }
0x2492   :  { %6202 = vmatprep.subr.mxu0 %v6434_v7 }
0x2493   :  { %6203 = vmatpush3.msra.mxu0 %v5543_v9 }
0x2494   :  { %6205 = vmatmul.mubr.msk.f32.vlgmr.msra.gmra.mxu0 %vm167_vm0, %v7529_v43  ;;  %6217 = vmatprep.subr.mxu0 %v6434_v7 }
0x2495   :  { %6218 = vmatpush3.msra.mxu0 %v5556_v46  ;;  %6225 = vmatprep.mubr.msk.f32.mxu0 %vm6436_vm1, %v6434_v7 }
0x2496   :  { %6219 = vmatprep.subr.mxu0 %v6434_v7 }
0x2497   :  { %6220 = vmatpush3.msra.mxu0 %v5555_v51 }
0x2498   :  { %6221 = vmatprep.subr.mxu0 %v6434_v7 }
0x2499   :  { %6222 = vmatpush3.msra.mxu0 %v5554_v59 }
0x249a   :  { %6223 = vmatprep.subr.mxu0 %v6434_v7 }
0x249b   :  { %6224 = vmatpush3.msra.mxu0 %v5553_v15  ;;  %v4100_v15 = vadd.f32 %v7487_v34, %v7024_v16 }
0x249c   :  { %6226 = vmatmul.mubr.msk.f32.vlgmr.msra.gmra.mxu0 %vm167_vm0, %v7529_v43  ;;  %6238 = vmatprep.subr.mxu0 %v6434_v7 }
0x249d   :  { %6239 = vmatpush3.msra.mxu0 %v5566_v14  ;;  %6246 = vmatprep.mubr.msk.f32.mxu0 %vm6436_vm1, %v6434_v7  ;;  %v5558_v14 = vld [vmem:[%s7750_s9 + $0x2] ss:$0 sm:$0xff] }
0x249e   :  { %6240 = vmatprep.subr.mxu0 %v6434_v7 }
0x249f   :  { %6241 = vmatpush3.msra.mxu0 %v5565_v37 }
0x24a0   :  { %6242 = vmatprep.subr.mxu0 %v6434_v7 }
0x24a1   :  { %6243 = vmatpush3.msra.mxu0 %v5564_v18  ;;  %v4120_v18 = vadd.f32 %v4119_v60, %v7043_v32 }
0x24a2   :  { %6244 = vmatprep.subr.mxu0 %v6434_v7 }
0x24a3   :  { %6245 = vmatpush3.msra.mxu0 %v5563_v38 }
0x24a4   :  { %6247 = vmatmul.mubr.msk.f32.vlgmr.msra.gmra.mxu0 %vm167_vm0, %v7529_v43  ;;  %6259 = vmatprep.subr.mxu0 %v6434_v7 }
0x24a5   :  { %6260 = vmatpush3.msra.mxu0 %v7086_v58  ;;  %6267 = vmatprep.mubr.msk.f32.mxu0 %vm6436_vm1, %v6434_v7 }
0x24a6   :  { %6261 = vmatprep.subr.mxu0 %v6434_v7 }
0x24a7   :  { %6262 = vmatpush3.msra.mxu0 %v7091_v11 }
0x24a8   :  { %6263 = vmatprep.subr.mxu0 %v6434_v7 }
0x24a9   :  { %6264 = vmatpush3.msra.mxu0 %v7098_v12 }
0x24aa   :  { %6265 = vmatprep.subr.mxu0 %v6434_v7 }
0x24ab   :  { %6266 = vmatpush3.msra.mxu0 %v7107_v13 }
0x24ac   :  { %6281 = vmatprep.subr.mxu0 %v6434_v7 }
0x254c   :  { %v4281_v3 = vpop.f32.mrf.mxu0 }
0x254d   :  { %v4285_v58 = vsel %vm381_vm2, %v4281_v3, -inf }
0x254e   :  { %4286 = vmax.xlane.f32.xlu0 %v4285_v58  ;;  %v6190_v10 = vpop.f32.mrf.mxu0 }
0x2554   :  { %v4449_v2 = vpop.f32.mrf.mxu0 }
0x2555   :  { %v4450_v26 = vadd.f32 %v5548_v25, %v4449_v2 }
0x2556   :  { %v6206_v63 = vpop.f32.mrf.mxu0 }
0x255c   :  { %v4690_v17 = vpop.f32.mrf.mxu0 }
0x255d   :  { %v4691_v37 = vadd.f32 %v5558_v14, %v4690_v17 }
0x255e   :  { %v6227_v52 = vpop.f32.mrf.mxu0 }
0x2564   :  { %v7612_v11 = vpop.f32.mrf.mxu0 }
0x2566   :  { %v6248_v50 = vpop.f32.mrf.mxu0 }
0x25d7   :  { %v4287_v35 = vpop.xlane.xlu0 %4286 }
0x25d8   :  { %v4288_v12 = vsub.f32 %v4281_v3, %v4287_v35 }
0x25da   :  { %v4289_v42 = vmul.f32 1.442695, %v4288_v12  ;;  %v4105_v12 = vadd.f32 %v7485_v62, %v7052_v41 }
0x25dc   :  { %6366 = vpow2.f32 %v4289_v42  ;;  %v5568_v42 = vld [vmem:[%s7750_s9 + $0x3] ss:$0 sm:$0xff] }
0x25e9   :  { %v6367_v33 = vpop.eup %6366 }
0x25ea   :  { %v4291_v13 = vsel %vm381_vm2, %v6367_v33, 0.0 }
0x25eb   :  { %4292 = vadd.xlane.f32.xlu0 %v4291_v13  ;;  %v4125_v13 = vadd.f32 %v6174_v53, %v7072_v1 }
0x2674   :  { %v4293_v24 = vpop.xlane.xlu0 %4292 }
0x2675   :  { %6368 = vrcp.f32 %v4293_v24 }
0x2682   :  { %v6369_v48 = vpop.eup %6368 }
0x2683   :  { %v4295_v20 = vmul.f32 %v6369_v48, %v6367_v33  ;;  %v4932_v33 = vadd.f32 %v5568_v42, %v7612_v11 }
0x2685   :  { %6194 = vmatmul.mubr.msk.f32.vlgmr.msra.gmra.mxu1 %vm381_vm2, %v4295_v20 }
0x2686   :  { %6208 = vmatpush3.msra.mxu1 %v4095_v23  ;;  %6209 = vmatprep.mubr.msk.f32.mxu1 %vm6436_vm1, %v6434_v7 }
0x2687   :  { %6212 = vmatprep.subr.mxu1 %v6434_v7 }
0x2689   :  { %6210 = vmatmul.mubr.msk.f32.vlgmr.msra.gmra.mxu1 %vm381_vm2, %v4450_v26 }
0x268a   :  { %6213 = vmatpush3.xpose.msk.msra.mxu1 %vm381_vm2, %v4115_v45  ;;  %6214 = vmatprep.mubr.msk.f32.mxu1 %vm6436_vm1, %v6434_v7 }
0x268b   :  { %6228 = vmatprep.subr.mxu1 %v6434_v7 }
0x2745   :  { %v7631_v40 = vpop.f32.mrf.mxu1 }
0x2747   :  { %v6195_v49 = vpop.f32.mrf.mxu1 }
0x2749   :  { %v4522_v61 = vpop.f32.mrf.mxu1 }
0x274a   :  { %v4526_v5 = vsel %vm381_vm2, %v4522_v61, -inf }
0x274b   :  { %4527 = vmax.xlane.f32.xlu1 %v4526_v5  ;;  %v6211_v22 = vpop.f32.mrf.mxu1 }
0x27d4   :  { %v4528_v21 = vpop.xlane.xlu1 %4527 }
0x27d5   :  { %v4529_v36 = vsub.f32 %v4522_v61, %v4528_v21 }
0x27d7   :  { %v4530_v31 = vmul.f32 1.442695, %v4529_v36 }
0x27d9   :  { %6370 = vpow2.f32 %v4530_v31 }
0x27e6   :  { %v6371_v8 = vpop.eup %6370 }
0x27e7   :  { %v4532_v9 = vsel %vm381_vm2, %v6371_v8, 0.0 }
0x27e8   :  { %4533 = vadd.xlane.f32.xlu0 %v4532_v9 }
0x2871   :  { %v4534_v46 = vpop.xlane.xlu0 %4533 }
0x2872   :  { %6372 = vrcp.f32 %v4534_v46 }
0x287f   :  { %v6373_v51 = vpop.eup %6372 }
0x2880   :  { %v4536_v59 = vmul.f32 %v6373_v51, %v6371_v8 }
0x2882   :  { %6215 = vmatmul.mubr.msk.f32.vlgmr.msra.gmra.mxu1 %vm381_vm2, %v4536_v59 }
0x2883   :  { %6229 = vmatpush3.msra.mxu1 %v4100_v15  ;;  %6230 = vmatprep.mubr.msk.f32.mxu1 %vm6436_vm1, %v6434_v7 }
0x2884   :  { %6233 = vmatprep.subr.mxu1 %v6434_v7 }
0x2886   :  { %6231 = vmatmul.mubr.msk.f32.vlgmr.msra.gmra.mxu1 %vm381_vm2, %v4691_v37 }
0x2887   :  { %6234 = vmatpush3.xpose.msk.msra.mxu1 %vm381_vm2, %v4120_v18  ;;  %6235 = vmatprep.mubr.msk.f32.mxu1 %vm6436_vm1, %v6434_v7  ;;  %v6410_v18 = vld [vmem:[%s7755_s14 + $0x2] ss:$0 sm:$0xff] }
0x2888   :  { %6249 = vmatprep.subr.mxu1 %v6434_v7 }
0x2942   :  { %v4609_v16 = vpop.f32.mrf.mxu1 }
0x2944   :  { %v6216_v34 = vpop.f32.mrf.mxu1 }
0x2946   :  { %v4763_v38 = vpop.f32.mrf.mxu1 }
0x2947   :  { %v4767_v3 = vsel %vm381_vm2, %v4763_v38, -inf }
0x2948   :  { %4768 = vmax.xlane.f32.xlu1 %v4767_v3  ;;  %v6232_v58 = vpop.f32.mrf.mxu1 }
0x29d1   :  { %v4769_v10 = vpop.xlane.xlu1 %4768 }
0x29d2   :  { %v4770_v2 = vsub.f32 %v4763_v38, %v4769_v10  ;;  %v6411_v38 = vld [vmem:[%s7755_s14 + $0x3] ss:$0 sm:$0xff] }
0x29d4   :  { %v4771_v63 = vmul.f32 1.442695, %v4770_v2 }
0x29d6   :  { %6374 = vpow2.f32 %v4771_v63  ;;  %v5480_v63 = vld [vmem:[%s7755_s14 + $0x4] ss:$0 sm:$0xff] }
0x29e3   :  { %v6375_v32 = vpop.eup %6374 }
0x29e4   :  { %v4773_v17 = vsel %vm381_vm2, %v6375_v32, 0.0 }
0x29e5   :  { %4774 = vadd.xlane.f32.xlu0 %v4773_v17 }
0x2a6e   :  { %v4775_v52 = vpop.xlane.xlu0 %4774 }
0x2a6f   :  { %6376 = vrcp.f32 %v4775_v52  ;;  %v5481_v52 = vld [vmem:[%s7755_s14 + $0x5] ss:$0 sm:$0xff]  ;;  %s6440_s14 = smov [#allocation2]  }
0x2a70   :  { %s5369_s21 = sshll.u32 %s6440_s14, 4  ;;  %s5370_s21 = int_to_ptr.vmem [resolvable:$true] %s5369_s21 }
0x2a71   :  { %s6412_s22 = scalar_lea.vmem %s5370_s21, 256  ;;  %p6417_p1 = scmp.lt.s32.totalorder %s5370_s21, %s5370_s21 }
0x2a72   :  { %p6413_p0 = scmp.ne.s32.totalorder %s5370_s21, %s6412_s22  ;;  %p6418_p2 = scmp.lt.s32.totalorder %s6412_s22, %s6412_s22 }
0x2a74   :  { %p6419_p3 = por %p6418_p2, %p6417_p1 }
0x2a76   :  { %p6420_p4 = pnand %p6419_p3, %p6413_p0 }
0x2a7c   :  { %v6377_v50 = vpop.eup %6376 }
0x2a7d   :  { %v4777_v35 = vmul.f32 %v6377_v50, %v6375_v32 }
0x2a7f   :  { %6236 = vmatmul.mubr.msk.f32.vlgmr.msra.gmra.mxu1 %vm381_vm2, %v4777_v35 }
0x2a80   :  { %6250 = vmatpush3.msra.mxu1 %v4105_v12  ;;  %6251 = vmatprep.mubr.msk.f32.mxu1 %vm6436_vm1, %v6434_v7 }
0x2a81   :  { %6254 = vmatprep.subr.mxu1 %v6434_v7 }
0x2a83   :  { %6252 = vmatmul.mubr.msk.f32.vlgmr.msra.gmra.mxu1 %vm381_vm2, %v4932_v33 }
0x2a84   :  { %6255 = vmatpush3.xpose.msk.msra.mxu1 %vm381_vm2, %v4125_v13  ;;  %6256 = vmatprep.mubr.msk.f32.mxu1 %vm6436_vm1, %v6434_v7 }
0x2a85   :  { %6270 = vmatprep.subr.mxu1 %v6434_v7 }
0x2b3f   :  { %v4850_v41 = vpop.f32.mrf.mxu1 }
0x2b41   :  { %v6237_v62 = vpop.f32.mrf.mxu1 }
0x2b43   :  { %v5004_v24 = vpop.f32.mrf.mxu1 }
0x2b44   :  { %v5008_v48 = vsel %vm381_vm2, %v5004_v24, -inf }
0x2b45   :  { %5009 = vmax.xlane.f32.xlu1 %v5008_v48  ;;  %v6253_v11 = vpop.f32.mrf.mxu1 }
0x2b56   :  { %5096 = vrot.lane.b32.xlu1 %v4609_v16, %s6438_s30 }
0x2bce   :  { %v5010_v20 = vpop.xlane.xlu1 %5009 }
0x2bcf   :  { %v5011_v1 = vsub.f32 %v5004_v24, %v5010_v20 }
0x2bd1   :  { %v5012_v23 = vmul.f32 1.442695, %v5011_v1 }
0x2bd3   :  { %6378 = vpow2.f32 %v5012_v23 }
0x2be0   :  { %v6379_v25 = vpop.eup %6378 }
0x2be1   :  { %v5014_v26 = vsel %vm381_vm2, %v6379_v25, 0.0 }
0x2be2   :  { %5015 = vadd.xlane.f32.xlu0 %v5014_v26 }
0x2bf8   :  { %5100 = vrot.lane.b32.xlu0 %v4850_v41, %s6437_s27 }
0x2c6b   :  { %v5016_v45 = vpop.xlane.xlu0 %5015 }
0x2c6c   :  { %6380 = vrcp.f32 %v5016_v45 }
0x2c6f   :  { %v5101_v5 = vpop.permute.xlu0 %5100 }
0x2c79   :  { %v6381_v53 = vpop.eup %6380 }
0x2c7a   :  { %v5018_v60 = vmul.f32 %v6381_v53, %v6379_v25 }
0x2c7c   :  { %6257 = vmatmul.mubr.msk.f32.vlgmr.msra.gmra.mxu1 %vm381_vm2, %v5018_v60 }
0x2c7d   :  { %6271 = vmatpush3.msra.mxu1 %v7128_v39  ;;  %6278 = vmatprep.mubr.msk.f32.mxu1 %vm6436_vm1, %v6434_v7  ;;  %v5097_v39 = vpop.permute.xlu1 %5096 }
0x2c7e   :  { %6272 = vmatprep.subr.mxu1 %v6434_v7  ;;  %v5107_v22 = vsel %vm381_vm2, %v7631_v40, %v5097_v39 }
0x2c7f   :  { %6273 = vmatpush3.msra.mxu1 %v7133_v0  ;;  %v5108_v21 = vsel %vm1284_vm3, %v5107_v22, %v5101_v5 }
0x2c80   :  { %6274 = vmatprep.subr.mxu1 %v6434_v7 }
0x2c81   :  { %6275 = vmatpush3.msra.mxu1 %v7140_v4 }
0x2c82   :  { %6276 = vmatprep.subr.mxu1 %v6434_v7 }
0x2c83   :  { %6277 = vmatpush3.msra.mxu1 %v7147_v44  ;;  %v6409_v44 = vld [vmem:[%s7754_s13] ss:$0 sm:$0xff] }
0x2d3c   :  { %v5091_v49 = vpop.f32.mrf.mxu1 }
0x2d3d   :  { %5104 = vrot.lane.b32.xlu1 %v5091_v49, %s6439_s5 }
0x2d3e   :  { %v6258_v61 = vpop.f32.mrf.mxu1 }
0x2daf   :  { %v5105_v0 = vpop.permute.xlu1 %5104 }
0x2db0   :  { %v5109_v36 = vsel %vm1286_vm4, %v5108_v21, %v5105_v0 }
0x2db1   :  { %6268 = vmatmul.mubr.msk.f32.vlgmr.msra.gmra.mxu0 %vm167_vm0, %v5109_v36 }
0x2db2   :  { %6282 = vmatpush3.msra.mxu0 %v7162_v54  ;;  %6297 = vmatprep.mubr.msk.f32.mxu0 %vm6436_vm1, %v6434_v7 }
0x2db3   :  { %6283 = vmatprep.subr.mxu0 %v6434_v7 }
0x2db4   :  { %6284 = vmatpush3.msra.mxu0 %v7167_v55 }
0x2db5   :  { %6285 = vmatprep.subr.mxu0 %v6434_v7 }
0x2db6   :  { %6286 = vmatpush3.msra.mxu0 %v7174_v56 }
0x2db7   :  { %6287 = vmatprep.subr.mxu0 %v6434_v7 }
0x2db8   :  { %6288 = vmatpush3.msra.mxu0 %v7181_v47 }
0x2db9   :  { %6289 = vmatprep.subr.mxu0 %v6434_v7 }
0x2dba   :  { %6290 = vmatpush3.msra.mxu0 %v7188_v57  ;;  %v5478_v57 = vld [vmem:[%s7759_s18] ss:$0 sm:$0xff] }
0x2dbb   :  { %6291 = vmatprep.subr.mxu0 %v6434_v7 }
0x2dbc   :  { %6292 = vmatpush3.msra.mxu0 %v7264_v27 }
0x2dbd   :  { %6293 = vmatprep.subr.mxu0 %v6434_v7 }
0x2dbe   :  { %6294 = vmatpush3.msra.mxu0 %v7271_v28  ;;  %v2812_v28 = vadd.f32 %v5478_v57, %v7330_v19 }
0x2dbf   :  { %6295 = vmatprep.subr.mxu0 %v6434_v7 }
0x2dc0   :  { %6296 = vmatpush3.msra.mxu0 %v7277_v29  ;;  %v2815_v8 = vadd.f32 %v2812_v28, %v7200_v6 }
0x2e71   :  { %v5179_v4 = vpop.f32.mrf.mxu0 }
0x2e72   :  { %v5180_v54 = vadd.f32 %v6409_v44, %v5179_v4 }
0x2e73   :  { %v6269_v55 = vpop.f32.mrf.mxu0 }
0x2e74   :  { %v5183_v56 = vadd.f32 %v5180_v54, %v7529_v43  ;;  %v2816_v43 = vsel %vm167_vm0, %v2815_v8, 0.0 }
0x2e76   :  { %v5184_v47 = vsel %vm167_vm0, %v5183_v56, 0.0 }
0x2e77   :  { %5185 = vadd.xlane.f32.xlu1 %v5184_v47 }
0x2f00   :  { %v5186_v27 = vpop.xlane.xlu1 %5185 }
0x2f01   :  { %v5187_v7 = vmul.f32 0.03125, %v5186_v27 }
0x2f03   :  { %v5188_v29 = vsub.f32 %v5183_v56, %v5187_v7 }
0x2f05   :  { %v5189_v40 = vmul.f32 %v5188_v29, %v5188_v29  ;;  %v5194_v6 = vmul.f32 %v6410_v18, %v5188_v29 }
0x2f07   :  { %v5190_v31 = vsel %vm167_vm0, %v5189_v40, 0.0 }
0x2f08   :  { %5191 = vadd.xlane.f32.xlu0 %v5190_v31 }
0x2f0c   :  { %2817 = vadd.xlane.f32.xlu0 %v2816_v43 }
0x2f91   :  { %v5192_v9 = vpop.xlane.xlu0 %5191 }
0x2f92   :  { %v5193_v46 = vmul.f32 0.03125, %v5192_v9 }
0x2f94   :  { %v5195_v51 = vadd.f32 1e-12, %v5193_v46 }
0x2f95   :  { %v2818_v59 = vpop.xlane.xlu0 %2817 }
0x2f96   :  { %6382 = vrsqrt.f32 %v5195_v51  ;;  %v2819_v15 = vmul.f32 0.03125, %v2818_v59 }
0x2f98   :  { %v2820_v14 = vsub.f32 %v2815_v8, %v2819_v15 }
0x2f9a   :  { %v2821_v37 = vmul.f32 %v2820_v14, %v2820_v14  ;;  %v2830_v32 = vmul.f32 %v5480_v63, %v2820_v14 }
0x2f9c   :  { %v2822_v19 = vsel %vm167_vm0, %v2821_v37, 0.0 }
0x2f9d   :  { %2823 = vadd.xlane.f32.xlu0 %v2822_v19 }
0x2fa3   :  { %v6383_v16 = vpop.eup %6382 }
0x2fa4   :  { %v5197_v34 = vmul.f32 %v6383_v16, %v5194_v6 }
0x2fa6   :  { %v5198_v3 = vadd.f32 %v6411_v38, %v5197_v34 }
0x2fa8   :  { %6279 = vmatmul.mubr.msk.f32.vlgmr.msra.gmra.mxu1 %vm167_vm0, %v5198_v3 }
0x3026   :  { %v2824_v58 = vpop.xlane.xlu0 %2823 }
0x3027   :  { %v2825_v10 = vmul.f32 0.03125, %v2824_v58 }
0x3029   :  { %v2831_v2 = vadd.f32 1e-12, %v2825_v10 }
0x302b   :  { %6384 = vrsqrt.f32 %v2831_v2 }
0x3038   :  { %v6385_v17 = vpop.eup %6384 }
0x3039   :  { %v2833_v50 = vmul.f32 %v6385_v17, %v2830_v32 }
0x303b   :  { %v2838_v35 = vadd.f32 %v5481_v52, %v2833_v50 }
0x303d   :  { %2839 = vst.msk [vmem:[#allocation2] sm:$0xff] %vm167_vm0, %v2838_v35 }
0x3068   :  { %v5268_v12 = vpop.f32.mrf.mxu1 }
0x3069   :  { %v5269_v42 = vadd.f32 %v7285_v30, %v5268_v12 }
0x306a   :  { %v6280_v33 = vpop.f32.mrf.mxu1 }
0x306b   :  { %v5272_v13 = vmax.f32 %v5269_v42, 0.0 }
0x306d   :  { %6298 = vmatmul.mubr.msk.f32.vlgmr.msra.gmra.mxu0 %vm2741_vm5, %v5272_v13 }
0x312d   :  { %v5342_v41 = vpop.f32.mrf.mxu0 }
0x312e   :  { %v5343_v62 = vadd.f32 %v5478_v57, %v5342_v41 }
0x312f   :  { %v6299_v24 = vpop.f32.mrf.mxu0 }
0x3130   :  { %v5346_v48 = vadd.f32 %v5343_v62, %v5198_v3 }
0x3132   :  { %v5347_v11 = vsel %vm167_vm0, %v5346_v48, 0.0 }
0x3133   :  { %5348 = vadd.xlane.f32.xlu1 %v5347_v11 }
0x31bc   :  { %v5349_v20 = vpop.xlane.xlu1 %5348 }
0x31bd   :  { %v5350_v1 = vmul.f32 0.03125, %v5349_v20 }
0x31bf   :  { %v5351_v23 = vsub.f32 %v5346_v48, %v5350_v1 }
0x31c1   :  { %v5352_v25 = vmul.f32 %v5351_v23, %v5351_v23  ;;  %v5357_v60 = vmul.f32 %v5480_v63, %v5351_v23 }
0x31c3   :  { %v5353_v26 = vsel %vm167_vm0, %v5352_v25, 0.0 }
0x31c4   :  { %5354 = vadd.xlane.f32.xlu1 %v5353_v26 }
0x324d   :  { %v5355_v45 = vpop.xlane.xlu1 %5354 }
0x324e   :  { %v5356_v30 = vmul.f32 0.03125, %v5355_v45 }
0x3250   :  { %v5358_v53 = vadd.f32 1e-12, %v5356_v30 }
0x3252   :  { %6386 = vrsqrt.f32 %v5358_v53 }
0x325f   :  { %v6387_v49 = vpop.eup %6386 }
0x3260   :  { %v5360_v61 = vmul.f32 %v6387_v49, %v5357_v60 }
0x3262   :  { %v5361_v39 = vadd.f32 %v5481_v52, %v5360_v61 }
0x3264   :  { %5363 = vst.msk [vmem:[#allocation2 + $0x8] sm:$0xff] %vm167_vm0, %v5361_v39 }
0x3265   :  { %6423 = shalt.err (!%p6420_p4)
}
0x3266   :  { %s6441_s2 = smov 128  }
0x3267   :  { %5375 = dma.vmem_to_hbm [thread:$0]  %s5370_s21, 256, %s7760_s19, [#allocation3], %s6441_s2, %s6441_s2, %s6438_s30  }
0x3268   :  { %6432 = dma.done.wait [#allocation3], 256  }
0x3269   :  { %6433 = vsyncadd [#allocation3], 4294967040 }
0x326a   :  { %5379 = vsyncpa [#allocation3], 1 }

</bundles_post_ra>
